<compile_context>
chip_gen: v5e
topology: v5e:2x2
jax: 0.10.0
libtpu: 0.0.40
codegen_flags: <defaults>
</compile_context>

<pallas_src>
import jax
import jax.numpy as jnp
from jax.experimental import pallas as pl
from jax.experimental.pallas import tpu as pltpu

_LANE = 128
# Fast path if padded dense A (bf16) fits in this many bytes.
_SMALL_A_BYTES = 2 * 1024 * 1024
# Keep full XW resident in VMEM while its (double-buffered) footprint is small.
_XW_RESIDENT_BYTES = 8 * 1024 * 1024


def _round_up(x, m):
    return (x + m - 1) // m * m


def _pad_to(arr, shape):
    pads = [(0, s - d) for d, s in zip(arr.shape, shape)]
    return jnp.pad(arr, pads)


def _relu(z):
    return jnp.maximum(z, 0.0)


def _log_softmax_masked(num_valid):
    """log_softmax over dim=1 restricted to the first `num_valid` (real) cols."""

    def act(z):
        col = jax.lax.broadcasted_iota(jnp.int32, z.shape, 1)
        valid = col < num_valid
        zmax = jnp.max(jnp.where(valid, z, -jnp.inf), axis=1, keepdims=True)
        s = z - zmax
        denom = jnp.sum(jnp.where(valid, jnp.exp(s), 0.0), axis=1, keepdims=True)
        return s - jnp.log(denom)

    return act


# ---------------------------------------------------------------------------
# XW = X @ W, hoisted out of the A-reduction (computed exactly once).
# ---------------------------------------------------------------------------
def _xw_kernel(x_ref, w_ref, o_ref):
    o_ref[...] = jnp.dot(
        x_ref[...], w_ref[...], preferred_element_type=jnp.float32
    ).astype(o_ref.dtype)


def _compute_xw(x_pad, w_pad, *, tm, out_dtype):
    n_pad, f_pad = x_pad.shape
    h_pad = w_pad.shape[1]
    return pl.pallas_call(
        _xw_kernel,
        out_shape=jax.ShapeDtypeStruct((n_pad, h_pad), out_dtype),
        grid_spec=pltpu.PrefetchScalarGridSpec(
            num_scalar_prefetch=0,
            grid=(n_pad // tm,),
            in_specs=[
                pl.BlockSpec((tm, f_pad), lambda i: (i, 0)),      # X row tile
                pl.BlockSpec((f_pad, h_pad), lambda i: (0, 0)),   # W resident
            ],
            out_specs=pl.BlockSpec((tm, h_pad), lambda i: (i, 0)),
        ),
        compiler_params=pltpu.CompilerParams(dimension_semantics=("parallel",)),
    )(x_pad, w_pad)


# ---------------------------------------------------------------------------
# Tiled aggregation: out = activation(A_hat @ XW + b), K-reduction over A cols.
# ---------------------------------------------------------------------------
def _make_agg_kernel(activation, *, tk, xw_resident, acc_in_out):
    def kernel(a_ref, xw_ref, b_ref, out_ref, *scratch):
        k = pl.program_id(1)
        acc_ref = out_ref if acc_in_out else scratch[0]

        @pl.when(k == 0)
        def _():
            acc_ref[...] = jnp.zeros_like(acc_ref)

        if xw_resident:
            off = pl.multiple_of(k * tk, tk)
            xw = xw_ref[pl.ds(off, tk), :]
        else:
            xw = xw_ref[...]
        acc_ref[...] += jnp.dot(a_ref[...], xw, preferred_element_type=jnp.float32)

        @pl.when(k == pl.num_programs(1) - 1)
        def _():
            z = acc_ref[...] + b_ref[...].astype(jnp.float32)
            out_ref[...] = activation(z).astype(out_ref.dtype)

    return kernel


def _gcn_conv_tiled(a_pad, xw_pad, b_pad, *, tm, tk, activation, out_dtype):
    n_pad = a_pad.shape[0]
    h_pad = xw_pad.shape[1]
    grid = (n_pad // tm, n_pad // tk)

    xw_bytes = 2 * xw_pad.size * xw_pad.dtype.itemsize  # double-buffered estimate
    xw_resident = xw_bytes <= _XW_RESIDENT_BYTES
    if xw_resident:
        # Constant block index -> DMA'd once, stays in VMEM for the whole grid.
        xw_spec = pl.BlockSpec((n_pad, h_pad), lambda i, k: (0, 0))
    else:
        xw_spec = pl.BlockSpec((tk, h_pad), lambda i, k: (k, 0))

    acc_in_out = jnp.dtype(out_dtype) == jnp.dtype(jnp.float32)
    scratch = [] if acc_in_out else [pltpu.VMEM((tm, h_pad), jnp.float32)]

    # Working set at TM=512, TK=2048: 2*(TM*TK*2B)=4 MiB A + resident XW + out;
    # comfortably inside the default scoped VMEM on v5e/v6e and v7x's 32 MiB.
    return pl.pallas_call(
        _make_agg_kernel(
            activation, tk=tk, xw_resident=xw_resident, acc_in_out=acc_in_out
        ),
        out_shape=jax.ShapeDtypeStruct((n_pad, h_pad), out_dtype),
        grid_spec=pltpu.PrefetchScalarGridSpec(
            num_scalar_prefetch=0,
            grid=grid,
            in_specs=[
                pl.BlockSpec((tm, tk), lambda i, k: (i, k)),   # A_hat tile (HBM stream)
                xw_spec,                                       # XW (resident or per-k)
                pl.BlockSpec((1, h_pad), lambda i, k: (0, 0)), # bias (resident)
            ],
            out_specs=pl.BlockSpec((tm, h_pad), lambda i, k: (i, 0)),
            scratch_shapes=scratch,
        ),
        compiler_params=pltpu.CompilerParams(
            dimension_semantics=("parallel", "arbitrary")
        ),
    )(a_pad, xw_pad, b_pad)


# ---------------------------------------------------------------------------
# Small-N fast path: single fused block per layer (no pipeline overhead).
# ---------------------------------------------------------------------------
def _make_fused_kernel(activation):
    def kernel(a_ref, x_ref, w_ref, b_ref, out_ref):
        xw = jnp.dot(x_ref[...], w_ref[...], preferred_element_type=jnp.float32)
        z = jnp.dot(
            a_ref[...], xw.astype(a_ref.dtype), preferred_element_type=jnp.float32
        )
        z = z + b_ref[...].astype(jnp.float32)
        out_ref[...] = activation(z).astype(out_ref.dtype)

    return kernel


def _gcn_conv_small(a_pad, x_pad, w_pad, b_pad, *, activation, out_dtype):
    n_pad = a_pad.shape[0]
    f_pad = x_pad.shape[1]
    h_pad = w_pad.shape[1]
    return pl.pallas_call(
        _make_fused_kernel(activation),
        out_shape=jax.ShapeDtypeStruct((n_pad, h_pad), out_dtype),
        grid_spec=pltpu.PrefetchScalarGridSpec(
            num_scalar_prefetch=0,
            grid=(1,),
            in_specs=[
                pl.BlockSpec((n_pad, n_pad), lambda i: (0, 0)),
                pl.BlockSpec((n_pad, f_pad), lambda i: (0, 0)),
                pl.BlockSpec((f_pad, h_pad), lambda i: (0, 0)),
                pl.BlockSpec((1, h_pad), lambda i: (0, 0)),
            ],
            out_specs=pl.BlockSpec((n_pad, h_pad), lambda i: (0, 0)),
        ),
        compiler_params=pltpu.CompilerParams(dimension_semantics=("arbitrary",)),
    )(a_pad, x_pad, w_pad, b_pad)


# ---------------------------------------------------------------------------
# Full forward.
# ---------------------------------------------------------------------------
def _pick_tiles(n):
    """Tiled-path sizing: pad n to a multiple of TK in {512,1024,2048} chosen to
    minimize padding (bigger TK on ties); TM=512 always divides the result."""
    n128 = _round_up(n, _LANE)
    best = None
    for tk in (2048, 1024, 512):
        n_pad = _round_up(n128, tk)
        if best is None or n_pad < best[0]:
            best = (n_pad, tk)
    n_pad, tk = best
    tm = min(512, n_pad)
    return n_pad, tm, tk


def gcn_forward(a_hat, x, w1, b1, w2, b2):
    """log_softmax(A_hat @ relu(A_hat @ X W1 + b1) W2 + b2), dim=1."""
    n, fin = x.shape
    hid = w1.shape[1]
    ncls = w2.shape[1]

    f_pad = _round_up(fin, _LANE)
    h_pad = _round_up(hid, _LANE)
    c_pad = _round_up(ncls, _LANE)

    n128 = _round_up(n, _LANE)
    small = n128 * n128 * 2 <= _SMALL_A_BYTES
    if small:
        n_pad, tm, tk = n128, None, None
    else:
        n_pad, tm, tk = _pick_tiles(n)

    # Zero-pad + cast: bf16 matmul operands, f32 biases.
    a_p = _pad_to(a_hat, (n_pad, n_pad)).astype(jnp.bfloat16)
    x_p = _pad_to(x, (n_pad, f_pad)).astype(jnp.bfloat16)
    w1_p = _pad_to(w1, (f_pad, h_pad)).astype(jnp.bfloat16)
    b1_p = _pad_to(b1.reshape(1, -1), (1, h_pad)).astype(jnp.float32)
    w2_p = _pad_to(w2, (h_pad, c_pad)).astype(jnp.bfloat16)
    b2_p = _pad_to(b2.reshape(1, -1), (1, c_pad)).astype(jnp.float32)

    logsm = _log_softmax_masked(ncls)

    if small:
        h = _gcn_conv_small(
            a_p, x_p, w1_p, b1_p, activation=_relu, out_dtype=jnp.bfloat16
        )
        # TODO(synk): F.dropout(training=self.training) — identity in eval mode.
        z = _gcn_conv_small(
            a_p, h, w2_p, b2_p, activation=logsm, out_dtype=jnp.float32
        )
    else:
        xw1 = _compute_xw(x_p, w1_p, tm=tm, out_dtype=jnp.bfloat16)
        h = _gcn_conv_tiled(
            a_p, xw1, b1_p, tm=tm, tk=tk, activation=_relu, out_dtype=jnp.bfloat16
        )
        # TODO(synk): dropout (identity in eval mode).
        xw2 = _compute_xw(h, w2_p, tm=tm, out_dtype=jnp.bfloat16)
        z = _gcn_conv_tiled(
            a_p, xw2, b2_p, tm=tm, tk=tk, activation=logsm, out_dtype=jnp.float32
        )

    return z[:n, :ncls]


def build_normalized_adjacency(edge_index, num_nodes):
    """Dense A_hat = D^{-1/2} (A + I) D^{-1/2} from edge_index [2, E] (glue)."""
    src, dst = edge_index[0], edge_index[1]
    adj = jnp.zeros((num_nodes, num_nodes), jnp.float32)
    adj = adj.at[dst, src].add(1.0)
    adj = adj + jnp.eye(num_nodes, dtype=jnp.float32)  # self-loops
    deg = jnp.sum(adj, axis=1)
    dinv_sqrt = jnp.where(deg > 0, 1.0 / jnp.sqrt(deg), 0.0)
    return adj * dinv_sqrt[:, None] * dinv_sqrt[None, :]


def _reference(a_hat, x, w1, b1, w2, b2):
    h = jnp.maximum(a_hat @ (x @ w1) + b1, 0.0)
    z = a_hat @ (h @ w2) + b2
    return jax.nn.log_softmax(z, axis=1)


def _make_problem(key, num_nodes, num_features, hidden, num_classes, num_edges):
    k_x, k_e, k_w1, k_b1, k_w2, k_b2 = jax.random.split(key, 6)
    x = jax.random.normal(k_x, (num_nodes, num_features), jnp.float32)
    e = jax.random.randint(k_e, (2, num_edges), 0, num_nodes)
    edge_index = jnp.concatenate([e, e[::-1]], axis=1)
    a_hat = build_normalized_adjacency(edge_index, num_nodes)
    w1 = jax.random.normal(k_w1, (num_features, hidden), jnp.float32) * jnp.sqrt(
        2.0 / (num_features + hidden)
    )
    b1 = jax.random.normal(k_b1, (1, hidden), jnp.float32) * 0.1
    w2 = jax.random.normal(k_w2, (hidden, num_classes), jnp.float32) * jnp.sqrt(
        2.0 / (hidden + num_classes)
    )
    b2 = jax.random.normal(k_b2, (1, num_classes), jnp.float32) * 0.1
    return a_hat, x, w1, b1, w2, b2


if __name__ == "__main__":
    key = jax.random.PRNGKey(0)
    k1, k2 = jax.random.split(key)
    fwd = jax.jit(gcn_forward)

    # Test 1: small Planetoid-like problem -> fused single-block fast path.
    args1 = _make_problem(k1, num_nodes=300, num_features=16, hidden=16,
                          num_classes=7, num_edges=600)
    out1 = jax.block_until_ready(fwd(*args1))
    ref1 = _reference(*args1)
    assert out1.shape == (300, 7)
    assert bool(jnp.all(jnp.isfinite(out1))), "non-finite output (fast path)"
    err1 = float(jnp.max(jnp.abs(out1 - ref1)))
    assert err1 < 5e-2, f"fast-path mismatch vs reference: max abs err {err1}"

    # Test 2: larger graph -> tiled path (hoisted + VMEM-resident XW, K-reduction).
    args2 = _make_problem(k2, num_nodes=1300, num_features=32, hidden=16,
                          num_classes=7, num_edges=2600)
    out2 = jax.block_until_ready(fwd(*args2))
    ref2 = _reference(*args2)
    assert out2.shape == (1300, 7)
    assert bool(jnp.all(jnp.isfinite(out2))), "non-finite output (tiled path)"
    err2 = float(jnp.max(jnp.abs(out2 - ref2)))
    assert err2 < 5e-2, f"tiled-path mismatch vs reference: max abs err {err2}"

    print("KERNEL_OK")
</pallas_src>

<mosaic_0001>
module attributes {stable_mosaic.version = 11 : i64} {
  func.func @kernel(%arg0: i32, %arg1: memref<384x384xbf16, #tpu.memory_space<vmem>>, %arg2: memref<384x128xbf16, #tpu.memory_space<vmem>>, %arg3: memref<128x128xbf16, #tpu.memory_space<vmem>>, %arg4: memref<1x128xf32, #tpu.memory_space<vmem>>, %arg5: memref<384x128xbf16, #tpu.memory_space<vmem>>) attributes {dimension_semantics = [#tpu.dimension_semantics<arbitrary>], iteration_bounds = array<i64: 1>, scalar_prefetch = 0 : i64, scratch_operands = 0 : i64, tpu.core_type = #tpu.core_type<tc>, window_params = [{pipeline_mode = #tpu.pipeline_mode<synchronous>, transform_indices = @transform_0, window_bounds = array<i64: 384, 384>}, {pipeline_mode = #tpu.pipeline_mode<synchronous>, transform_indices = @transform_1, window_bounds = array<i64: 384, 128>}, {pipeline_mode = #tpu.pipeline_mode<synchronous>, transform_indices = @transform_2, window_bounds = array<i64: 128, 128>}, {pipeline_mode = #tpu.pipeline_mode<synchronous>, transform_indices = @transform_3, window_bounds = array<i64: 1, 128>}, {pipeline_mode = #tpu.pipeline_mode<synchronous>, transform_indices = @transform_4, window_bounds = array<i64: 384, 128>}]} {
    %c0 = arith.constant 0 : index
    %c0_0 = arith.constant 0 : index
    %0 = vector.load %arg2[%c0, %c0_0] : memref<384x128xbf16, #tpu.memory_space<vmem>>, vector<384x128xbf16>
    %c0_1 = arith.constant 0 : index
    %c0_2 = arith.constant 0 : index
    %1 = vector.load %arg3[%c0_1, %c0_2] : memref<128x128xbf16, #tpu.memory_space<vmem>>, vector<128x128xbf16>
    %cst = arith.constant dense<0.000000e+00> : vector<384x128xf32>
    %2 = tpu.matmul %0, %1, %cst {dimension_numbers = #tpu.dot_dimension_numbers<[1], [0], [0], [1], [0, 0, 1, 1], [], []>} : vector<384x128xbf16>, vector<128x128xbf16>, vector<384x128xf32> -> vector<384x128xf32>
    %c0_3 = arith.constant 0 : index
    %c0_4 = arith.constant 0 : index
    %3 = vector.load %arg1[%c0_3, %c0_4] : memref<384x384xbf16, #tpu.memory_space<vmem>>, vector<384x384xbf16>
    %4 = arith.truncf %2 : vector<384x128xf32> to vector<384x128xbf16>
    %cst_5 = arith.constant dense<0.000000e+00> : vector<384x128xf32>
    %5 = tpu.matmul %3, %4, %cst_5 {dimension_numbers = #tpu.dot_dimension_numbers<[1], [0], [0], [1], [0, 0, 1, 1], [], []>} : vector<384x384xbf16>, vector<384x128xbf16>, vector<384x128xf32> -> vector<384x128xf32>
    %c0_6 = arith.constant 0 : index
    %c0_7 = arith.constant 0 : index
    %6 = vector.load %arg4[%c0_6, %c0_7] : memref<1x128xf32, #tpu.memory_space<vmem>>, vector<1x128xf32>
    %7 = vector.broadcast %6 : vector<1x128xf32> to vector<384x128xf32>
    %8 = arith.addf %5, %7 : vector<384x128xf32>
    %cst_8 = arith.constant 0.000000e+00 : f32
    %9 = vector.broadcast %cst_8 : f32 to vector<384x128xf32>
    %10 = arith.maximumf %8, %9 : vector<384x128xf32>
    %11 = arith.truncf %10 : vector<384x128xf32> to vector<384x128xbf16>
    %c0_9 = arith.constant 0 : index
    %c0_10 = arith.constant 0 : index
    %12 = vector.load %arg5[%c0_9, %c0_10] : memref<384x128xbf16, #tpu.memory_space<vmem>>, vector<384x128xbf16>
    tpu.vector_store %arg5[%c0_9, %c0_10], %11 {strides = array<i32>} : memref<384x128xbf16, #tpu.memory_space<vmem>>, vector<384x128xbf16>,
    return
  }
  func.func @transform_0(%arg0: i32) -> (i32, i32) {
    %c0_i32 = arith.constant 0 : i32
    %c0_i32_0 = arith.constant 0 : i32
    %c0_i32_1 = arith.constant 0 : i32
    return %c0_i32, %c0_i32_0 : i32, i32
  }
  func.func @transform_1(%arg0: i32) -> (i32, i32) {
    %c0_i32 = arith.constant 0 : i32
    %c0_i32_0 = arith.constant 0 : i32
    %c0_i32_1 = arith.constant 0 : i32
    return %c0_i32, %c0_i32_0 : i32, i32
  }
  func.func @transform_2(%arg0: i32) -> (i32, i32) {
    %c0_i32 = arith.constant 0 : i32
    %c0_i32_0 = arith.constant 0 : i32
    %c0_i32_1 = arith.constant 0 : i32
    return %c0_i32, %c0_i32_0 : i32, i32
  }
  func.func @transform_3(%arg0: i32) -> (i32, i32) {
    %c0_i32 = arith.constant 0 : i32
    %c0_i32_0 = arith.constant 0 : i32
    %c0_i32_1 = arith.constant 0 : i32
    return %c0_i32, %c0_i32_0 : i32, i32
  }
  func.func @transform_4(%arg0: i32) -> (i32, i32) {
    %c0_i32 = arith.constant 0 : i32
    %c0_i32_0 = arith.constant 0 : i32
    %c0_i32_1 = arith.constant 0 : i32
    return %c0_i32, %c0_i32_0 : i32, i32
  }
}

module attributes {stable_mosaic.version = 11 : i64} {
  func.func @kernel(%arg0: i32, %arg1: memref<384x384xbf16, #tpu.memory_space<vmem>>, %arg2: memref<384x128xbf16, #tpu.memory_space<vmem>>, %arg3: memref<128x128xbf16, #tpu.memory_space<vmem>>, %arg4: memref<1x128xf32, #tpu.memory_space<vmem>>, %arg5: memref<384x128xf32, #tpu.memory_space<vmem>>) attributes {dimension_semantics = [#tpu.dimension_semantics<arbitrary>], iteration_bounds = array<i64: 1>, scalar_prefetch = 0 : i64, scratch_operands = 0 : i64, tpu.core_type = #tpu.core_type<tc>, window_params = [{pipeline_mode = #tpu.pipeline_mode<synchronous>, transform_indices = @transform_0, window_bounds = array<i64: 384, 384>}, {pipeline_mode = #tpu.pipeline_mode<synchronous>, transform_indices = @transform_1, window_bounds = array<i64: 384, 128>}, {pipeline_mode = #tpu.pipeline_mode<synchronous>, transform_indices = @transform_2, window_bounds = array<i64: 128, 128>}, {pipeline_mode = #tpu.pipeline_mode<synchronous>, transform_indices = @transform_3, window_bounds = array<i64: 1, 128>}, {pipeline_mode = #tpu.pipeline_mode<synchronous>, transform_indices = @transform_4, window_bounds = array<i64: 384, 128>}]} {
    %c0 = arith.constant 0 : index
    %c0_0 = arith.constant 0 : index
    %0 = vector.load %arg2[%c0, %c0_0] : memref<384x128xbf16, #tpu.memory_space<vmem>>, vector<384x128xbf16>
    %c0_1 = arith.constant 0 : index
    %c0_2 = arith.constant 0 : index
    %1 = vector.load %arg3[%c0_1, %c0_2] : memref<128x128xbf16, #tpu.memory_space<vmem>>, vector<128x128xbf16>
    %cst = arith.constant dense<0.000000e+00> : vector<384x128xf32>
    %2 = tpu.matmul %0, %1, %cst {dimension_numbers = #tpu.dot_dimension_numbers<[1], [0], [0], [1], [0, 0, 1, 1], [], []>} : vector<384x128xbf16>, vector<128x128xbf16>, vector<384x128xf32> -> vector<384x128xf32>
    %c0_3 = arith.constant 0 : index
    %c0_4 = arith.constant 0 : index
    %3 = vector.load %arg1[%c0_3, %c0_4] : memref<384x384xbf16, #tpu.memory_space<vmem>>, vector<384x384xbf16>
    %4 = arith.truncf %2 : vector<384x128xf32> to vector<384x128xbf16>
    %cst_5 = arith.constant dense<0.000000e+00> : vector<384x128xf32>
    %5 = tpu.matmul %3, %4, %cst_5 {dimension_numbers = #tpu.dot_dimension_numbers<[1], [0], [0], [1], [0, 0, 1, 1], [], []>} : vector<384x384xbf16>, vector<384x128xbf16>, vector<384x128xf32> -> vector<384x128xf32>
    %c0_6 = arith.constant 0 : index
    %c0_7 = arith.constant 0 : index
    %6 = vector.load %arg4[%c0_6, %c0_7] : memref<1x128xf32, #tpu.memory_space<vmem>>, vector<1x128xf32>
    %7 = vector.broadcast %6 : vector<1x128xf32> to vector<384x128xf32>
    %8 = arith.addf %5, %7 : vector<384x128xf32>
    %9 = tpu.iota {dimensions = array<i32: 1>} : vector<384x128xi32>
    %c7_i32 = arith.constant 7 : i32
    %10 = vector.broadcast %c7_i32 : i32 to vector<384x128xi32>
    %11 = arith.cmpi slt, %9, %10 : vector<384x128xi32>
    %cst_8 = arith.constant 0xFF800000 : f32
    %12 = vector.broadcast %cst_8 : f32 to vector<384x128xf32>
    %13 = arith.select %11, %8, %12 : vector<384x128xi1>, vector<384x128xf32>
    %cst_9 = arith.constant dense<0xFF800000> : vector<384xf32>
    %14 = vector.multi_reduction <maximumf>, %13, %cst_9 [1] : vector<384x128xf32> to vector<384xf32>
    %15 = vector.shape_cast %14 : vector<384xf32> to vector<384x1xf32>
    %16 = vector.broadcast %15 : vector<384x1xf32> to vector<384x128xf32>
    %17 = arith.subf %8, %16 : vector<384x128xf32>
    %18 = math.exp %17 : vector<384x128xf32>
    %cst_10 = arith.constant 0.000000e+00 : f32
    %19 = vector.broadcast %cst_10 : f32 to vector<384x128xf32>
    %20 = arith.select %11, %18, %19 : vector<384x128xi1>, vector<384x128xf32>
    %cst_11 = arith.constant dense<0.000000e+00> : vector<384xf32>
    %21 = vector.multi_reduction <add>, %20, %cst_11 [1] : vector<384x128xf32> to vector<384xf32>
    %22 = vector.shape_cast %21 : vector<384xf32> to vector<384x1xf32>
    %23 = math.log %22 : vector<384x1xf32>
    %24 = vector.broadcast %23 : vector<384x1xf32> to vector<384x128xf32>
    %25 = arith.subf %17, %24 : vector<384x128xf32>
    %c0_12 = arith.constant 0 : index
    %c0_13 = arith.constant 0 : index
    %26 = vector.load %arg5[%c0_12, %c0_13] : memref<384x128xf32, #tpu.memory_space<vmem>>, vector<384x128xf32>
    tpu.vector_store %arg5[%c0_12, %c0_13], %25 {strides = array<i32>} : memref<384x128xf32, #tpu.memory_space<vmem>>, vector<384x128xf32>,
    return
  }
  func.func @transform_0(%arg0: i32) -> (i32, i32) {
    %c0_i32 = arith.constant 0 : i32
    %c0_i32_0 = arith.constant 0 : i32
    %c0_i32_1 = arith.constant 0 : i32
    return %c0_i32, %c0_i32_0 : i32, i32
  }
  func.func @transform_1(%arg0: i32) -> (i32, i32) {
    %c0_i32 = arith.constant 0 : i32
    %c0_i32_0 = arith.constant 0 : i32
    %c0_i32_1 = arith.constant 0 : i32
    return %c0_i32, %c0_i32_0 : i32, i32
  }
  func.func @transform_2(%arg0: i32) -> (i32, i32) {
    %c0_i32 = arith.constant 0 : i32
    %c0_i32_0 = arith.constant 0 : i32
    %c0_i32_1 = arith.constant 0 : i32
    return %c0_i32, %c0_i32_0 : i32, i32
  }
  func.func @transform_3(%arg0: i32) -> (i32, i32) {
    %c0_i32 = arith.constant 0 : i32
    %c0_i32_0 = arith.constant 0 : i32
    %c0_i32_1 = arith.constant 0 : i32
    return %c0_i32, %c0_i32_0 : i32, i32
  }
  func.func @transform_4(%arg0: i32) -> (i32, i32) {
    %c0_i32 = arith.constant 0 : i32
    %c0_i32_0 = arith.constant 0 : i32
    %c0_i32_1 = arith.constant 0 : i32
    return %c0_i32, %c0_i32_0 : i32, i32
  }
}

</mosaic_0001>

<bundles_post_ra>
// kernel: gcn_forward.3
= control target key start
LH: loop header
LB: loop body
LE: loop exit
PB: predicated region body
PF: predicated region fallthrough
CT: control target
= control target key end

     0   :  { %s4177_s2 = inlined_call_operand.vmem [shape: bf16[128,128], index: 2, kind: input, shape index: {}]   ;;  %s4178_s1 = inlined_call_operand.vmem [shape: bf16[384,128], index: 1, kind: input, shape index: {}]   ;;  %s4179_s0 = inlined_call_operand.vmem [shape: bf16[384,384], index: 0, kind: input, shape index: {}]   ;;  %s4180_s3 = inlined_call_operand.vmem [shape: f32[1,128], index: 3, kind: input, shape index: {}]   ;;  %s4181_s4 = inlined_call_operand.vmem [shape: f32[384,128], index: 4, kind: output, shape index: {}]  }
   0x1   :  { %v2375_v0 = vld [vmem:[%s4177_s2 + $0x38] sm:$0xff]  ;;  %v2374_v1 = vld [vmem:[%s4177_s2 + $0x30] sm:$0xff]  ;;  %v2373_v2 = vld [vmem:[%s4177_s2 + $0x28] sm:$0xff] }
   0x2   :  { %273 = vmatpush.bf16.msra.mxu0 %v2375_v0  ;;  %v2372_v3 = vld [vmem:[%s4177_s2 + $0x20] sm:$0xff]  ;;  %v2371_v4 = vld [vmem:[%s4177_s2 + $0x18] sm:$0xff]  ;;  %v2370_v5 = vld [vmem:[%s4177_s2 + $0x10] sm:$0xff] }
   0x3   :  { %v2369_v6 = vld [vmem:[%s4177_s2 + $0x8] sm:$0xff]  ;;  %v2368_v7 = vld [vmem:[%s4177_s2] sm:$0xff]  ;;  %v2346_v10 = vld [vmem:[%s4178_s1 + $0x10] sm:$0xff] }
   0x4   :  { %v2344_v8 = vld [vmem:[%s4178_s1] sm:$0xff]  ;;  %v2345_v9 = vld [vmem:[%s4178_s1 + $0x8] sm:$0xff]  ;;  %v2347_v11 = vld [vmem:[%s4178_s1 + $0x18] sm:$0xff] }
   0x5   :  { %v2348_v12 = vld [vmem:[%s4178_s1 + $0x20] sm:$0xff]  ;;  %v2349_v13 = vld [vmem:[%s4178_s1 + $0x28] sm:$0xff]  ;;  %v2350_v14 = vld [vmem:[%s4178_s1 + $0x30] sm:$0xff] }
   0x6   :  { %274 = vmatpush.bf16.msra.mxu0 %v2374_v1  ;;  %v2351_v15 = vld [vmem:[%s4178_s1 + $0x38] sm:$0xff]  ;;  %v2352_v16 = vld [vmem:[%s4178_s1 + $0x40] sm:$0xff]  ;;  %v2353_v20 = vld [vmem:[%s4178_s1 + $0x48] sm:$0xff] }
   0x7   :  { %v2354_v24 = vld [vmem:[%s4178_s1 + $0x50] sm:$0xff]  ;;  %v2355_v28 = vld [vmem:[%s4178_s1 + $0x58] sm:$0xff]  ;;  %v2356_v32 = vld [vmem:[%s4178_s1 + $0x60] sm:$0xff] }
   0x8   :  { %v2357_v35 = vld [vmem:[%s4178_s1 + $0x68] sm:$0xff]  ;;  %v2358_v38 = vld [vmem:[%s4178_s1 + $0x70] sm:$0xff]  ;;  %v2359_v41 = vld [vmem:[%s4178_s1 + $0x78] sm:$0xff] }
   0x9   :  { %v2360_v46 = vld [vmem:[%s4178_s1 + $0x80] sm:$0xff]  ;;  %v2361_v52 = vld [vmem:[%s4178_s1 + $0x88] sm:$0xff]  ;;  %v2362_v56 = vld [vmem:[%s4178_s1 + $0x90] sm:$0xff] }
   0xa   :  { %275 = vmatpush.bf16.msra.mxu0 %v2373_v2  ;;  %v2363_v60 = vld [vmem:[%s4178_s1 + $0x98] sm:$0xff]  ;;  %v2364_v0 = vld [vmem:[%s4178_s1 + $0xa0] sm:$0xff] }
   0xe   :  { %276 = vmatpush.bf16.msra.mxu0 %v2372_v3  ;;  %v2365_v3 = vld [vmem:[%s4178_s1 + $0xa8] sm:$0xff] }
  0x12   :  { %277 = vmatpush.bf16.msra.mxu0 %v2371_v4 }
  0x16   :  { %278 = vmatpush.bf16.msra.mxu0 %v2370_v5 }
  0x1a   :  { %279 = vmatpush.bf16.msra.mxu0 %v2369_v6  ;;  %v2366_v6 = vld [vmem:[%s4178_s1 + $0xb0] sm:$0xff] }
  0x1e   :  { %280 = vmatpush.bf16.msra.mxu0 %v2368_v7 }
  0x21   :  { %281 = vmatmul.bf16.vlgmr.msra.gmra.mxu0 %v2344_v8 }
  0x31   :  { %286 = vmatmul.bf16.gmra.mxu0 %v2345_v9  ;;  %v2367_v9 = vld [vmem:[%s4178_s1 + $0xb8] sm:$0xff] }
  0x41   :  { %291 = vmatmul.bf16.gmra.mxu0 %v2346_v10 }
  0x51   :  { %296 = vmatmul.bf16.gmra.mxu0 %v2347_v11 }
  0x61   :  { %301 = vmatmul.bf16.gmra.mxu0 %v2348_v12 }
  0x71   :  { %306 = vmatmul.bf16.gmra.mxu0 %v2349_v13 }
  0x81   :  { %311 = vmatmul.bf16.gmra.mxu0 %v2350_v14 }
  0x91   :  { %316 = vmatmul.bf16.gmra.mxu0 %v2351_v15 }
  0x9e   :  { %v282_v17 = vpop.f32.mrf.mxu0 }
  0xa1   :  { %321 = vmatmul.bf16.gmra.mxu0 %v2352_v16 }
  0xa6   :  { %v284_v18 = vpop.f32.mrf.mxu0 }
  0xa7   :  { %v498_v19 = vpack.c.bf16 %v284_v18, %v282_v17 }
  0xae   :  { %v287_v21 = vpop.f32.mrf.mxu0 }
  0xb1   :  { %326 = vmatmul.bf16.gmra.mxu0 %v2353_v20 }
  0xb6   :  { %v289_v22 = vpop.f32.mrf.mxu0 }
  0xb7   :  { %v499_v23 = vpack.c.bf16 %v289_v22, %v287_v21 }
  0xbe   :  { %v292_v25 = vpop.f32.mrf.mxu0 }
  0xc1   :  { %331 = vmatmul.bf16.gmra.mxu0 %v2354_v24 }
  0xc6   :  { %v294_v26 = vpop.f32.mrf.mxu0 }
  0xc7   :  { %v500_v27 = vpack.c.bf16 %v294_v26, %v292_v25 }
  0xce   :  { %v297_v29 = vpop.f32.mrf.mxu0 }
  0xd1   :  { %336 = vmatmul.bf16.gmra.mxu0 %v2355_v28 }
  0xd6   :  { %v299_v30 = vpop.f32.mrf.mxu0 }
  0xd7   :  { %v501_v31 = vpack.c.bf16 %v299_v30, %v297_v29 }
  0xde   :  { %v302_v33 = vpop.f32.mrf.mxu0 }
  0xe1   :  { %341 = vmatmul.bf16.gmra.mxu0 %v2356_v32 }
  0xe6   :  { %v304_v34 = vpop.f32.mrf.mxu0 }
  0xe7   :  { %v502_v49 = vpack.c.bf16 %v304_v34, %v302_v33  ;;  %v2376_v34 = vld [vmem:[%s4179_s0 + $0x4] sm:$0xf] }
  0xee   :  { %v307_v36 = vpop.f32.mrf.mxu0 }
  0xf1   :  { %346 = vmatmul.bf16.gmra.mxu0 %v2357_v35  ;;  %v2060_v35 = vld [vmem:[%s4179_s0 + $0xc] sm:$0xf0] }
  0xf6   :  { %v309_v37 = vpop.f32.mrf.mxu0 }
  0xf7   :  { %v503_v48 = vpack.c.bf16 %v309_v37, %v307_v36  ;;  %v2063_v36 = vor.u32 %v2376_v34, %v2060_v35  ;;  %v2144_v34 = vld [vmem:[%s4179_s0 + $0xb4] sm:$0xf0] }
  0xfe   :  { %v312_v39 = vpop.f32.mrf.mxu0 }
 0x101   :  { %351 = vmatmul.bf16.gmra.mxu0 %v2358_v38  ;;  %v2058_v38 = vld [vmem:[%s4179_s0] sm:$0xf] }
 0x106   :  { %v314_v40 = vpop.f32.mrf.mxu0 }
 0x107   :  { %v504_v45 = vpack.c.bf16 %v314_v40, %v312_v39  ;;  %v2377_v39 = vld [vmem:[%s4179_s0 + $0x8] sm:$0xf0] }
 0x108   :  { %v2059_v40 = vor.u32 %v2377_v39, %v2058_v38  ;;  %v2126_v39 = vld [vmem:[%s4179_s0 + $0x80] sm:$0xf] }
 0x10e   :  { %v317_v42 = vpop.f32.mrf.mxu0 }
 0x111   :  { %356 = vmatmul.bf16.gmra.mxu0 %v2359_v41 }
 0x116   :  { %v319_v43 = vpop.f32.mrf.mxu0 }
 0x117   :  { %v505_v44 = vpack.c.bf16 %v319_v43, %v317_v42  ;;  %v2379_v43 = vld [vmem:[%s4179_s0 + $0x1c] sm:$0xf] }
 0x119   :  { %910 = vmatpush.bf16.msra.mxu1 %v505_v44  ;;  %v2072_v44 = vld [vmem:[%s4179_s0 + $0x24] sm:$0xf0] }
 0x11d   :  { %911 = vmatpush.bf16.msra.mxu1 %v504_v45  ;;  %v2075_v45 = vor.u32 %v2379_v43, %v2072_v44  ;;  %v2156_v43 = vld [vmem:[%s4179_s0 + $0xcc] sm:$0xf0] }
 0x11e   :  { %v322_v47 = vpop.f32.mrf.mxu0 }
 0x121   :  { %361 = vmatmul.bf16.gmra.mxu0 %v2360_v46  ;;  %912 = vmatpush.bf16.msra.mxu1 %v503_v48  ;;  %v2380_v48 = vld [vmem:[%s4179_s0 + $0x20] sm:$0xf0] }
 0x125   :  { %913 = vmatpush.bf16.msra.mxu1 %v502_v49 }
 0x126   :  { %v324_v50 = vpop.f32.mrf.mxu0 }
 0x127   :  { %v506_v51 = vpack.c.bf16 %v324_v50, %v322_v47  ;;  %v2070_v47 = vld [vmem:[%s4179_s0 + $0x18] sm:$0xf] }
 0x128   :  { %v2071_v49 = vor.u32 %v2380_v48, %v2070_v47 }
 0x129   :  { %914 = vmatpush.bf16.msra.mxu1 %v501_v31 }
 0x12d   :  { %915 = vmatpush.bf16.msra.mxu1 %v500_v27 }
 0x12e   :  { %v327_v53 = vpop.f32.mrf.mxu0 }
 0x131   :  { %366 = vmatmul.bf16.gmra.mxu0 %v2361_v52  ;;  %916 = vmatpush.bf16.msra.mxu1 %v499_v23  ;;  %v2382_v52 = vld [vmem:[%s4179_s0 + $0x34] sm:$0xf] }
 0x135   :  { %917 = vmatpush.bf16.msra.mxu1 %v498_v19 }
 0x136   :  { %v329_v54 = vpop.f32.mrf.mxu0 }
 0x137   :  { %v507_v55 = vpack.c.bf16 %v329_v54, %v327_v53  ;;  %v2084_v53 = vld [vmem:[%s4179_s0 + $0x3c] sm:$0xf0] }
 0x138   :  { %918 = vmatmul.bf16.vlgmr.msra.gmra.mxu1 %v2059_v40  ;;  %v2087_v54 = vor.u32 %v2382_v52, %v2084_v53  ;;  %v2393_v40 = vld [vmem:[%s4179_s0 + $0x88] sm:$0xf0] }
 0x13e   :  { %v332_v57 = vpop.f32.mrf.mxu0 }
 0x141   :  { %371 = vmatmul.bf16.gmra.mxu0 %v2362_v56  ;;  %v2383_v56 = vld [vmem:[%s4179_s0 + $0x38] sm:$0xf0] }
 0x146   :  { %v334_v58 = vpop.f32.mrf.mxu0 }
 0x147   :  { %v508_v59 = vpack.c.bf16 %v334_v58, %v332_v57  ;;  %v2066_v58 = vld [vmem:[%s4179_s0 + $0x8] sm:$0xf] }
 0x148   :  { %923 = vmatmul.bf16.gmra.mxu1 %v2071_v49  ;;  %v2138_v49 = vld [vmem:[%s4179_s0 + $0x98] sm:$0xf] }
 0x14e   :  { %v337_v61 = vpop.f32.mrf.mxu0 }
 0x151   :  { %376 = vmatmul.bf16.gmra.mxu0 %v2363_v60 }
 0x156   :  { %v339_v62 = vpop.f32.mrf.mxu0 }
 0x157   :  { %v509_v63 = vpack.c.bf16 %v339_v62, %v337_v61  ;;  %v2385_v61 = vld [vmem:[%s4179_s0 + $0x4c] sm:$0xf]  ;;  %v2096_v62 = vld [vmem:[%s4179_s0 + $0x54] sm:$0xf0] }
 0x15e   :  { %v342_v1 = vpop.f32.mrf.mxu0 }
 0x161   :  { %381 = vmatmul.bf16.gmra.mxu0 %v2364_v0  ;;  %v2094_v0 = vld [vmem:[%s4179_s0 + $0x48] sm:$0xf] }
 0x166   :  { %v344_v2 = vpop.f32.mrf.mxu0 }
 0x167   :  { %v510_v16 = vpack.c.bf16 %v344_v2, %v342_v1  ;;  %v2386_v1 = vld [vmem:[%s4179_s0 + $0x50] sm:$0xf0] }
 0x168   :  { %v2095_v2 = vor.u32 %v2386_v1, %v2094_v0 }
 0x16e   :  { %v347_v4 = vpop.f32.mrf.mxu0 }
 0x171   :  { %386 = vmatmul.bf16.gmra.mxu0 %v2365_v3  ;;  %v2078_v3 = vld [vmem:[%s4179_s0 + $0x20] sm:$0xf] }
 0x176   :  { %v349_v5 = vpop.f32.mrf.mxu0 }
 0x177   :  { %v511_v15 = vpack.c.bf16 %v349_v5, %v347_v4  ;;  %v2381_v4 = vld [vmem:[%s4179_s0 + $0x28] sm:$0xf0] }
 0x178   :  { %v2079_v5 = vor.u32 %v2381_v4, %v2078_v3  ;;  %v2406_v4 = vld [vmem:[%s4179_s0 + $0xf4] sm:$0xf] }
 0x17e   :  { %v352_v7 = vpop.f32.mrf.mxu0 }
 0x181   :  { %391 = vmatmul.bf16.gmra.mxu0 %v2366_v6  ;;  %v2388_v6 = vld [vmem:[%s4179_s0 + $0x64] sm:$0xf] }
 0x186   :  { %v354_v8 = vpop.f32.mrf.mxu0 }
 0x187   :  { %v512_v13 = vpack.c.bf16 %v354_v8, %v352_v7  ;;  %v2108_v7 = vld [vmem:[%s4179_s0 + $0x6c] sm:$0xf0] }
 0x188   :  { %v2111_v8 = vor.u32 %v2388_v6, %v2108_v7 }
 0x18e   :  { %v357_v10 = vpop.f32.mrf.mxu0 }
 0x191   :  { %396 = vmatmul.bf16.gmra.mxu0 %v2367_v9  ;;  %v2106_v9 = vld [vmem:[%s4179_s0 + $0x60] sm:$0xf] }
 0x196   :  { %v359_v11 = vpop.f32.mrf.mxu0 }
 0x197   :  { %v513_v12 = vpack.c.bf16 %v359_v11, %v357_v10  ;;  %v2389_v10 = vld [vmem:[%s4179_s0 + $0x68] sm:$0xf0] }
 0x198   :  { %v2107_v11 = vor.u32 %v2389_v10, %v2106_v9  ;;  %v2407_v9 = vld [vmem:[%s4179_s0 + $0xf8] sm:$0xf0]  ;;  %v2956_v10 = vld [vmem:[%s4180_s3] ss:$0 sm:$0xff] }
 0x199   :  { %1039 = vmatpush.bf16.msra.mxu2 %v513_v12  ;;  %v2090_v12 = vld [vmem:[%s4179_s0 + $0x38] sm:$0xf] }
 0x19d   :  { %1040 = vmatpush.bf16.msra.mxu2 %v512_v13  ;;  %v2384_v13 = vld [vmem:[%s4179_s0 + $0x40] sm:$0xf0] }
 0x19e   :  { %v2763_v14 = vpop.f32.mrf.mxu0 }
 0x1a1   :  { %1041 = vmatpush.bf16.msra.mxu2 %v511_v15  ;;  %v2391_v15 = vld [vmem:[%s4179_s0 + $0x7c] sm:$0xf] }
 0x1a5   :  { %1042 = vmatpush.bf16.msra.mxu2 %v510_v16  ;;  %v2120_v16 = vld [vmem:[%s4179_s0 + $0x84] sm:$0xf0] }
 0x1a6   :  { %v2765_v17 = vpop.f32.mrf.mxu0 }
 0x1a7   :  { %v514_v18 = vpack.c.bf16 %v2765_v17, %v2763_v14  ;;  %v2091_v14 = vor.u32 %v2384_v13, %v2090_v12  ;;  %v2123_v17 = vor.u32 %v2391_v15, %v2120_v16  ;;  %v2162_v12 = vld [vmem:[%s4179_s0 + $0xc8] sm:$0xf]  ;;  %v2402_v13 = vld [vmem:[%s4179_s0 + $0xd0] sm:$0xf0]  ;;  %v1297_v15 = vlaneseq }
 0x1a9   :  { %1043 = vmatpush.bf16.msra.mxu2 %v509_v63  ;;  %v2099_v63 = vor.u32 %v2385_v61, %v2096_v62  ;;  %v2150_v62 = vld [vmem:[%s4179_s0 + $0xb0] sm:$0xf] }
 0x1ad   :  { %1044 = vmatpush.bf16.msra.mxu2 %v508_v59  ;;  %v2378_v59 = vld [vmem:[%s4179_s0 + $0x10] sm:$0xf0] }
 0x1ae   :  { %v367_v19 = vpop.f32.mrf.mxu0  ;;  %v2067_v60 = vor.u32 %v2378_v59, %v2066_v58  ;;  %v2166_v59 = vld [vmem:[%s4179_s0 + $0xd8] sm:$0xf] }
 0x1b1   :  { %1045 = vmatpush.bf16.msra.mxu2 %v507_v55  ;;  %v2082_v55 = vld [vmem:[%s4179_s0 + $0x30] sm:$0xf] }
 0x1b2   :  { %v2083_v57 = vor.u32 %v2383_v56, %v2082_v55  ;;  %v2403_v55 = vld [vmem:[%s4179_s0 + $0xdc] sm:$0xf]  ;;  %v2168_v56 = vld [vmem:[%s4179_s0 + $0xe4] sm:$0xf0] }
 0x1b4   :  { %928 = vmatmul.bf16.gmra.mxu1 %v2083_v57  ;;  %v2171_v57 = vor.u32 %v2403_v55, %v2168_v56  ;;  %v2186_v56 = vld [vmem:[%s4179_s0 + $0xf8] sm:$0xf] }
 0x1b5   :  { %1046 = vmatpush.bf16.msra.mxu2 %v506_v51  ;;  %v919_v48 = vpop.f32.mrf.mxu1 }
 0x1b6   :  { %v369_v20 = vpop.f32.mrf.mxu0  ;;  %v920_v16 = vadd.f32 %v2956_v10, %v919_v48 }
 0x1b7   :  { %v515_v21 = vpack.c.bf16 %v369_v20, %v367_v19  ;;  %v2392_v19 = vld [vmem:[%s4179_s0 + $0x80] sm:$0xf0] }
 0x1b8   :  { %1047 = vmatmul.bf16.vlgmr.msra.gmra.mxu2 %v2063_v36  ;;  %v2142_v36 = vld [vmem:[%s4179_s0 + $0xa8] sm:$0xf] }
 0x1bd   :  { %v921_v53 = vpop.f32.mrf.mxu1 }
 0x1be   :  { %v372_v22 = vpop.f32.mrf.mxu0 }
 0x1c4   :  { %933 = vmatmul.bf16.gmra.mxu1 %v2095_v2 }
 0x1c5   :  { %v924_v58 = vpop.f32.mrf.mxu1 }
 0x1c6   :  { %v374_v23 = vpop.f32.mrf.mxu0 }
 0x1c7   :  { %v516_v24 = vpack.c.bf16 %v374_v23, %v372_v22  ;;  %v2387_v22 = vld [vmem:[%s4179_s0 + $0x58] sm:$0xf0] }
 0x1c8   :  { %1052 = vmatmul.bf16.gmra.mxu2 %v2075_v45  ;;  %v2154_v45 = vld [vmem:[%s4179_s0 + $0xc0] sm:$0xf] }
 0x1cd   :  { %v926_v2 = vpop.f32.mrf.mxu1 }
 0x1ce   :  { %v377_v25 = vpop.f32.mrf.mxu0 }
 0x1d4   :  { %938 = vmatmul.bf16.gmra.mxu1 %v2107_v11 }
 0x1d6   :  { %v379_v26 = vpop.f32.mrf.mxu0 }
 0x1d7   :  { %v517_v27 = vpack.c.bf16 %v379_v26, %v377_v25  ;;  %v2132_v25 = vld [vmem:[%s4179_s0 + $0x9c] sm:$0xf0] }
 0x1d8   :  { %1057 = vmatmul.bf16.gmra.mxu2 %v2087_v54 }
 0x1de   :  { %v382_v28 = vpop.f32.mrf.mxu0 }
 0x1e6   :  { %v384_v29 = vpop.f32.mrf.mxu0 }
 0x1e7   :  { %v518_v51 = vpack.c.bf16 %v384_v29, %v382_v28  ;;  %v2395_v28 = vld [vmem:[%s4179_s0 + $0x98] sm:$0xf0] }
 0x1e8   :  { %1062 = vmatmul.bf16.gmra.mxu2 %v2099_v63  ;;  %v2399_v63 = vld [vmem:[%s4179_s0 + $0xb8] sm:$0xf0] }
 0x1e9   :  { %v2151_v1 = vor.u32 %v2399_v63, %v2150_v62 }
 0x1ee   :  { %v387_v30 = vpop.f32.mrf.mxu0 }
 0x1f6   :  { %v389_v31 = vpop.f32.mrf.mxu0 }
 0x1f7   :  { %v519_v50 = vpack.c.bf16 %v389_v31, %v387_v30  ;;  %v2114_v30 = vld [vmem:[%s4179_s0 + $0x68] sm:$0xf]  ;;  %v2390_v31 = vld [vmem:[%s4179_s0 + $0x70] sm:$0xf0] }
 0x1f8   :  { %1067 = vmatmul.bf16.gmra.mxu2 %v2111_v8  ;;  %v2178_v8 = vld [vmem:[%s4179_s0 + $0xf0] sm:$0xf] }
 0x1f9   :  { %v2179_v11 = vor.u32 %v2407_v9, %v2178_v8 }
 0x1fe   :  { %v392_v32 = vpop.f32.mrf.mxu0 }
 0x206   :  { %v394_v33 = vpop.f32.mrf.mxu0 }
 0x207   :  { %v520_v46 = vpack.c.bf16 %v394_v33, %v392_v32  ;;  %v2115_v32 = vor.u32 %v2390_v31, %v2114_v30  ;;  %v2397_v33 = vld [vmem:[%s4179_s0 + $0xac] sm:$0xf]  ;;  %v2190_v30 = vld [vmem:[%s4179_s0 + $0x108] sm:$0xf]  ;;  %v2410_v31 = vld [vmem:[%s4179_s0 + $0x110] sm:$0xf0] }
 0x208   :  { %1072 = vmatmul.bf16.gmra.mxu2 %v2123_v17  ;;  %v2147_v35 = vor.u32 %v2397_v33, %v2144_v34  ;;  %v2163_v17 = vor.u32 %v2402_v13, %v2162_v12  ;;  %v2174_v33 = vld [vmem:[%s4179_s0 + $0xe0] sm:$0xf]  ;;  %v2405_v34 = vld [vmem:[%s4179_s0 + $0xe8] sm:$0xf0]  ;;  %v2214_v13 = vld [vmem:[%s4179_s0 + $0x138] sm:$0xf] }
 0x20e   :  { %v397_v37 = vpop.f32.mrf.mxu0 }
 0x216   :  { %v399_v41 = vpop.f32.mrf.mxu0 }
 0x217   :  { %v521_v42 = vpack.c.bf16 %v399_v41, %v397_v37  ;;  %v2398_v37 = vld [vmem:[%s4179_s0 + $0xb0] sm:$0xf0]  ;;  %v2127_v41 = vor.u32 %v2393_v40, %v2126_v39  ;;  %v2175_v40 = vor.u32 %v2405_v34, %v2174_v33 }
 0x218   :  { %v2143_v38 = vor.u32 %v2398_v37, %v2142_v36 }
 0x219   :  { %1168 = vmatpush.bf16.msra.mxu3 %v521_v42  ;;  %v2400_v42 = vld [vmem:[%s4179_s0 + $0xc4] sm:$0xf] }
 0x21a   :  { %v2159_v44 = vor.u32 %v2400_v42, %v2156_v43 }
 0x21d   :  { %1169 = vmatpush.bf16.msra.mxu3 %v520_v46  ;;  %v2401_v46 = vld [vmem:[%s4179_s0 + $0xc8] sm:$0xf0] }
 0x21e   :  { %v2155_v47 = vor.u32 %v2401_v46, %v2154_v45  ;;  %v2412_v46 = vld [vmem:[%s4179_s0 + $0x124] sm:$0xf] }
 0x221   :  { %1170 = vmatpush.bf16.msra.mxu3 %v519_v50  ;;  %v2396_v50 = vld [vmem:[%s4179_s0 + $0xa0] sm:$0xf0] }
 0x222   :  { %v2139_v52 = vor.u32 %v2396_v50, %v2138_v49  ;;  %v927_v50 = vadd.f32 %v2956_v10, %v926_v2 }
 0x225   :  { %1171 = vmatpush.bf16.msra.mxu3 %v518_v51 }
 0x229   :  { %1172 = vmatpush.bf16.msra.mxu3 %v517_v27  ;;  %v2130_v27 = vld [vmem:[%s4179_s0 + $0x90] sm:$0xf] }
 0x22a   :  { %v2131_v29 = vor.u32 %v2395_v28, %v2130_v27  ;;  %v922_v27 = vadd.f32 %v2956_v10, %v921_v53  ;;  %v2202_v53 = vld [vmem:[%s4179_s0 + $0x120] sm:$0xf] }
 0x22d   :  { %1173 = vmatpush.bf16.msra.mxu3 %v516_v24  ;;  %v2394_v24 = vld [vmem:[%s4179_s0 + $0x94] sm:$0xf] }
 0x22e   :  { %v2135_v26 = vor.u32 %v2394_v24, %v2132_v25  ;;  %v2192_v24 = vld [vmem:[%s4179_s0 + $0x114] sm:$0xf0] }
 0x230   :  { %1077 = vmatmul.bf16.gmra.mxu2 %v2135_v26 }
 0x231   :  { %1174 = vmatpush.bf16.msra.mxu3 %v515_v21  ;;  %v2102_v21 = vld [vmem:[%s4179_s0 + $0x50] sm:$0xf]  ;;  %v2945_v7 = vpop.f32.mrf.mxu1 }
 0x232   :  { %v2103_v23 = vor.u32 %v2387_v22, %v2102_v21 }
 0x235   :  { %1175 = vmatpush.bf16.msra.mxu3 %v514_v18  ;;  %v2118_v18 = vld [vmem:[%s4179_s0 + $0x78] sm:$0xf] }
 0x236   :  { %v2119_v20 = vor.u32 %v2392_v19, %v2118_v18  ;;  %v2967_v18 = vand.u32 127, %v1297_v15 }
 0x238   :  { %1176 = vmatmul.bf16.vlgmr.msra.gmra.mxu3 %v2067_v60  ;;  %943 = vmatmul.bf16.gmra.mxu1 %v2119_v20  ;;  %v2404_v60 = vld [vmem:[%s4179_s0 + $0xe0] sm:$0xf0]  ;;  %vm1299_vm0 = vcmp.lt.s32.totalorder %v2967_v18, 7 }
 0x239   :  { %v2167_v61 = vor.u32 %v2404_v60, %v2166_v59  ;;  %v2969_v19 = vpop.f32.mrf.mxu1 }
 0x23a   :  { %v932_v9 = vadd.f32 %v2956_v10, %v2969_v19 }
 0x23b   :  { %v1048_v51 = vpop.f32.mrf.mxu2 }
 0x23c   :  { %v1049_v20 = vadd.f32 %v1048_v51, %v920_v16  ;;  %v2198_v16 = vld [vmem:[%s4179_s0 + $0x110] sm:$0xf] }
 0x240   :  { %1082 = vmatmul.bf16.gmra.mxu2 %v2147_v35 }
 0x243   :  { %v1050_v54 = vpop.f32.mrf.mxu2 }
 0x244   :  { %v1051_v36 = vadd.f32 %v1050_v54, %v922_v27  ;;  %v2413_v54 = vld [vmem:[%s4179_s0 + $0x128] sm:$0xf0] }
 0x245   :  { %v2203_v55 = vor.u32 %v2413_v54, %v2202_v53 }
 0x248   :  { %1181 = vmatmul.bf16.gmra.mxu3 %v2079_v5  ;;  %948 = vmatmul.bf16.gmra.mxu1 %v2131_v29  ;;  %v2180_v5 = vld [vmem:[%s4179_s0 + $0xfc] sm:$0xf0]  ;;  %v2986_v29 = vpop.f32.mrf.mxu1 }
 0x249   :  { %v2183_v6 = vor.u32 %v2406_v4, %v2180_v5  ;;  %v2415_v5 = vld [vmem:[%s4179_s0 + $0x13c] sm:$0xf] }
 0x24b   :  { %v1053_v0 = vpop.f32.mrf.mxu2 }
 0x250   :  { %1087 = vmatmul.bf16.gmra.mxu2 %v2159_v44  ;;  %v3008_v42 = vpop.f32.mrf.mxu1 }
 0x253   :  { %v2937_v3 = vpop.f32.mrf.mxu2 }
 0x254   :  { %v1056_v59 = vadd.f32 %v2937_v3, %v927_v50 }
 0x258   :  { %1186 = vmatmul.bf16.gmra.mxu3 %v2091_v14  ;;  %953 = vmatmul.bf16.gmra.mxu1 %v2143_v38  ;;  %v925_v38 = vadd.f32 %v2956_v10, %v924_v58 }
 0x25a   :  { %v1054_v43 = vadd.f32 %v1053_v0, %v925_v38  ;;  %v2226_v38 = vld [vmem:[%s4179_s0 + $0x150] sm:$0xf] }
 0x25b   :  { %v2964_v14 = vpop.f32.mrf.mxu2 }
 0x260   :  { %1092 = vmatmul.bf16.gmra.mxu2 %v2171_v57  ;;  %v2408_v57 = vld [vmem:[%s4179_s0 + $0x100] sm:$0xf0] }
 0x261   :  { %v2187_v63 = vor.u32 %v2408_v57, %v2186_v56  ;;  %v2240_v57 = vld [vmem:[%s4179_s0 + $0x174] sm:$0xf0] }
 0x263   :  { %v2971_v21 = vpop.f32.mrf.mxu2 }
 0x268   :  { %1191 = vmatmul.bf16.gmra.mxu3 %v2103_v23  ;;  %958 = vmatmul.bf16.gmra.mxu1 %v2155_v47  ;;  %v2409_v23 = vld [vmem:[%s4179_s0 + $0x10c] sm:$0xf]  ;;  %v2204_v47 = vld [vmem:[%s4179_s0 + $0x12c] sm:$0xf0] }
 0x269   :  { %v2195_v26 = vor.u32 %v2409_v23, %v2192_v24  ;;  %v2207_v49 = vor.u32 %v2412_v46, %v2204_v47  ;;  %v935_v23 = vadd.f32 %v2956_v10, %v2986_v29  ;;  %v2418_v29 = vld [vmem:[%s4179_s0 + $0x154] sm:$0xf] }
 0x26b   :  { %v3000_v35 = vpop.f32.mrf.mxu2 }
 0x270   :  { %1097 = vmatmul.bf16.gmra.mxu2 %v2183_v6  ;;  %v2216_v6 = vld [vmem:[%s4179_s0 + $0x144] sm:$0xf0] }
 0x271   :  { %v2219_v8 = vor.u32 %v2415_v5, %v2216_v6  ;;  %v2417_v5 = vld [vmem:[%s4179_s0 + $0x148] sm:$0xf0] }
 0x273   :  { %v3010_v44 = vpop.f32.mrf.mxu2 }
 0x278   :  { %1196 = vmatmul.bf16.gmra.mxu3 %v2115_v32  ;;  %963 = vmatmul.bf16.gmra.mxu1 %v2167_v61  ;;  %v2191_v32 = vor.u32 %v2410_v31, %v2190_v30  ;;  %v930_v61 = vadd.f32 %v2956_v10, %v2945_v7  ;;  %v1064_v30 = vadd.f32 %v3000_v35, %v935_v23 }
 0x27a   :  { %v1059_v2 = vadd.f32 %v2964_v14, %v930_v61  ;;  %v2416_v14 = vld [vmem:[%s4179_s0 + $0x140] sm:$0xf0] }
 0x27b   :  { %v3038_v58 = vpop.f32.mrf.mxu2  ;;  %v2215_v15 = vor.u32 %v2416_v14, %v2214_v13 }
 0x280   :  { %1102 = vmatmul.bf16.gmra.mxu2 %v2195_v26 }
 0x283   :  { %v3051_v4 = vpop.f32.mrf.mxu2 }
 0x288   :  { %1201 = vmatmul.bf16.gmra.mxu3 %v2127_v41  ;;  %968 = vmatmul.bf16.gmra.mxu1 %v2179_v11 }
 0x28b   :  { %v3080_v19 = vpop.f32.mrf.mxu2 }
 0x290   :  { %1107 = vmatmul.bf16.gmra.mxu2 %v2207_v49 }
 0x293   :  { %v3093_v31 = vpop.f32.mrf.mxu2 }
 0x298   :  { %1206 = vmatmul.bf16.gmra.mxu3 %v2139_v52  ;;  %973 = vmatmul.bf16.gmra.mxu1 %v2191_v32  ;;  %v3024_v52 = vpop.f32.mrf.mxu1  ;;  %v2228_v32 = vld [vmem:[%s4179_s0 + $0x15c] sm:$0xf0] }
 0x299   :  { %v2231_v34 = vor.u32 %v2418_v29, %v2228_v32  ;;  %v940_v49 = vadd.f32 %v2956_v10, %v3024_v52  ;;  %v2421_v52 = vld [vmem:[%s4179_s0 + $0x16c] sm:$0xf] }
 0x29a   :  { %v2425_v29 = vld [vmem:[%s4179_s0 + $0x188] sm:$0xf0] }
 0x2a0   :  { %1112 = vmatmul.bf16.gmra.mxu2 %v2219_v8 }
 0x2a8   :  { %1211 = vmatmul.bf16.gmra.mxu3 %v2151_v1  ;;  %978 = vmatmul.bf16.gmra.mxu1 %v2203_v55  ;;  %v3048_v1 = vpop.f32.mrf.mxu1  ;;  %v1069_v55 = vadd.f32 %v3038_v58, %v940_v49 }
 0x2a9   :  { %v942_v61 = vadd.f32 %v2956_v10, %v3048_v1  ;;  %v2222_v1 = vld [vmem:[%s4179_s0 + $0x140] sm:$0xf] }
 0x2aa   :  { %v2223_v14 = vor.u32 %v2417_v5, %v2222_v1 }
 0x2ab   :  { %v1071_v8 = vadd.f32 %v3051_v4, %v942_v61 }
 0x2b0   :  { %1117 = vmatmul.bf16.gmra.mxu2 %v2231_v34  ;;  %v2420_v34 = vld [vmem:[%s4179_s0 + $0x160] sm:$0xf0] }
 0x2b5   :  { %v3066_v12 = vpop.f32.mrf.mxu1 }
 0x2b8   :  { %1216 = vmatmul.bf16.gmra.mxu3 %v2163_v17  ;;  %v2411_v17 = vld [vmem:[%s4179_s0 + $0x118] sm:$0xf0]  ;;  %983 = vmatmul.bf16.gmra.mxu1 %v2215_v15 }
 0x2b9   :  { %v2199_v26 = vor.u32 %v2411_v17, %v2198_v16 }
 0x2bb   :  { %v1177_v22 = vpop.f32.mrf.mxu3 }
 0x2bc   :  { %v2980_v25 = vadd.f32 %v1177_v22, %v1049_v20  ;;  %v1061_v20 = vadd.f32 %v2971_v21, %v932_v9 }
 0x2be   :  { %v1300_v28 = vsel %vm1299_vm0, %v2980_v25, -inf }
 0x2bf   :  { %1348 = vmax.xlane.f32.xlu0 %v1300_v28  ;;  %v3090_v28 = vpop.f32.mrf.mxu1 }
 0x2c3   :  { %v1179_v37 = vpop.f32.mrf.mxu3 }
 0x2c4   :  { %v3003_v39 = vadd.f32 %v1179_v37, %v1051_v36  ;;  %v937_v36 = vadd.f32 %v2956_v10, %v3008_v42  ;;  %v2210_v42 = vld [vmem:[%s4179_s0 + $0x128] sm:$0xf] }
 0x2c6   :  { %v1301_v41 = vsel %vm1299_vm0, %v3003_v39, -inf  ;;  %v1066_v46 = vadd.f32 %v3010_v44, %v937_v36 }
 0x2c7   :  { %1350 = vmax.xlane.f32.xlu0 %v1301_v41  ;;  %v3108_v37 = vpop.f32.mrf.mxu1 }
 0x2c8   :  { %1221 = vmatmul.bf16.gmra.mxu3 %v2175_v40  ;;  %v2419_v40 = vld [vmem:[%s4179_s0 + $0x158] sm:$0xf0] }
 0x2c9   :  { %v2227_v41 = vor.u32 %v2419_v40, %v2226_v38  ;;  %v950_v40 = vadd.f32 %v2956_v10, %v3108_v37  ;;  %v2427_v37 = vld [vmem:[%s4179_s0 + $0x19c] sm:$0xf] }
 0x2cb   :  { %v1182_v45 = vpop.f32.mrf.mxu3  ;;  %988 = vmatmul.bf16.gmra.mxu1 %v2227_v41 }
 0x2cc   :  { %v3018_v48 = vadd.f32 %v1182_v45, %v1054_v43  ;;  %v2414_v43 = vld [vmem:[%s4179_s0 + $0x130] sm:$0xf0]  ;;  %v3122_v45 = vpop.f32.mrf.mxu2 }
 0x2ce   :  { %v1302_v51 = vsel %vm1299_vm0, %v3018_v48, -inf }
 0x2cf   :  { %1352 = vmax.xlane.f32.xlu1 %v1302_v51  ;;  %v2211_v51 = vor.u32 %v2414_v43, %v2210_v42  ;;  %v3132_v54 = vpop.f32.mrf.mxu1 }
 0x2d3   :  { %v1184_v60 = vpop.f32.mrf.mxu3 }
 0x2d4   :  { %v3043_v62 = vadd.f32 %v1184_v60, %v1056_v59  ;;  %v3135_v56 = vpop.f32.mrf.mxu2  ;;  %v2243_v60 = vor.u32 %v2421_v52, %v2240_v57  ;;  %v2262_v57 = vld [vmem:[%s4179_s0 + $0x198] sm:$0xf] }
 0x2d6   :  { %v1303_v0 = vsel %vm1299_vm0, %v3043_v62, -inf  ;;  %1122 = vmatmul.bf16.gmra.mxu2 %v2243_v60  ;;  %v2428_v60 = vld [vmem:[%s4179_s0 + $0x1a0] sm:$0xf0] }
 0x2d7   :  { %1354 = vmax.xlane.f32.xlu1 %v1303_v0  ;;  %v2238_v0 = vld [vmem:[%s4179_s0 + $0x168] sm:$0xf]  ;;  %v2263_v61 = vor.u32 %v2428_v60, %v2262_v57 }
 0x2d8   :  { %1226 = vmatmul.bf16.gmra.mxu3 %v2187_v63  ;;  %v3150_v63 = vpop.f32.mrf.mxu1 }
 0x2d9   :  { %v955_v1 = vadd.f32 %v2956_v10, %v3150_v63  ;;  %v2430_v63 = vld [vmem:[%s4179_s0 + $0x1b4] sm:$0xf] }
 0x2db   :  { %v1187_v3 = vpop.f32.mrf.mxu3 }
 0x2dc   :  { %v3059_v7 = vadd.f32 %v1187_v3, %v1059_v2  ;;  %v2422_v2 = vld [vmem:[%s4179_s0 + $0x170] sm:$0xf0]  ;;  %v3164_v6 = vpop.f32.mrf.mxu2 }
 0x2dd   :  { %v2239_v3 = vor.u32 %v2422_v2, %v2238_v0 }
 0x2de   :  { %v1304_v11 = vsel %vm1299_vm0, %v3059_v7, -inf }
 0x2df   :  { %1356 = vmax.xlane.f32.xlu2 %v1304_v11  ;;  %993 = vmatmul.bf16.gmra.mxu1 %v2239_v3  ;;  %v945_v11 = vadd.f32 %v2956_v10, %v3066_v12  ;;  %v2424_v12 = vld [vmem:[%s4179_s0 + $0x184] sm:$0xf] }
 0x2e0   :  { %v3174_v16 = vpop.f32.mrf.mxu1 }
 0x2e1   :  { %v1074_v17 = vadd.f32 %v3080_v19, %v945_v11 }
 0x2e3   :  { %v1189_v22 = vpop.f32.mrf.mxu3 }
 0x2e4   :  { %v3085_v24 = vadd.f32 %v1189_v22, %v1061_v20  ;;  %v3177_v20 = vpop.f32.mrf.mxu2  ;;  %v2252_v22 = vld [vmem:[%s4179_s0 + $0x18c] sm:$0xf0] }
 0x2e6   :  { %v1305_v27 = vsel %vm1299_vm0, %v3085_v24, -inf }
 0x2e7   :  { %1358 = vmax.xlane.f32.xlu2 %v1305_v27  ;;  %v947_v27 = vadd.f32 %v2956_v10, %v3090_v28  ;;  %v2234_v28 = vld [vmem:[%s4179_s0 + $0x158] sm:$0xf] }
 0x2e8   :  { %1231 = vmatmul.bf16.gmra.mxu3 %v2199_v26  ;;  %v2255_v26 = vor.u32 %v2424_v12, %v2252_v22  ;;  %v2235_v42 = vor.u32 %v2420_v34, %v2234_v28  ;;  %v957_v22 = vadd.f32 %v2956_v10, %v3174_v16  ;;  %v2258_v16 = vld [vmem:[%s4179_s0 + $0x188] sm:$0xf] }
 0x2ea   :  { %1127 = vmatmul.bf16.gmra.mxu2 %v2255_v26  ;;  %v1086_v28 = vadd.f32 %v3177_v20, %v957_v22 }
 0x2eb   :  { %v1192_v21 = vpop.f32.mrf.mxu3 }
 0x2ec   :  { %v3101_v33 = vadd.f32 %v1192_v21, %v1064_v30  ;;  %v3192_v30 = vpop.f32.mrf.mxu1  ;;  %v2250_v21 = vld [vmem:[%s4179_s0 + $0x180] sm:$0xf]  ;;  %v3206_v36 = vpop.f32.mrf.mxu2 }
 0x2ed   :  { %v2251_v32 = vor.u32 %v2425_v29, %v2250_v21  ;;  %v2426_v29 = vld [vmem:[%s4179_s0 + $0x190] sm:$0xf0] }
 0x2ee   :  { %v1306_v35 = vsel %vm1299_vm0, %v3101_v33, -inf }
 0x2ef   :  { %1360 = vmax.xlane.f32.xlu0 %v1306_v35  ;;  %v1076_v35 = vadd.f32 %v3093_v31, %v947_v27  ;;  %998 = vmatmul.bf16.gmra.mxu1 %v2251_v32  ;;  %v2274_v27 = vld [vmem:[%s4179_s0 + $0x1b0] sm:$0xf] }
 0x2f3   :  { %v1194_v47 = vpop.f32.mrf.mxu3 }
 0x2f4   :  { %v3127_v50 = vadd.f32 %v1194_v47, %v1066_v46  ;;  %v3216_v46 = vpop.f32.mrf.mxu1  ;;  %v1079_v47 = vadd.f32 %v3122_v45, %v950_v40  ;;  %v3219_v49 = vpop.f32.mrf.mxu2  ;;  %v960_v40 = vadd.f32 %v2956_v10, %v3192_v30 }
 0x2f6   :  { %v1307_v53 = vsel %vm1299_vm0, %v3127_v50, -inf }
 0x2f7   :  { %1362 = vmax.xlane.f32.xlu1 %v1307_v53 }
 0x2f8   :  { %1236 = vmatmul.bf16.gmra.mxu3 %v2211_v51  ;;  %v2264_v51 = vld [vmem:[%s4179_s0 + $0x1a4] sm:$0xf0] }
 0x2fb   :  { %v1197_v44 = vpop.f32.mrf.mxu3 }
 0x2fc   :  { %v3143_v59 = vadd.f32 %v1197_v44, %v1069_v55  ;;  %v2267_v55 = vor.u32 %v2427_v37, %v2264_v51  ;;  %v952_v44 = vadd.f32 %v2956_v10, %v3132_v54  ;;  %v3234_v52 = vpop.f32.mrf.mxu1  ;;  %v2246_v54 = vld [vmem:[%s4179_s0 + $0x170] sm:$0xf]  ;;  %v3248_v0 = vpop.f32.mrf.mxu2 }
 0x2fd   :  { %v965_v22 = vadd.f32 %v2956_v10, %v3234_v52 }
 0x2fe   :  { %v1308_v58 = vsel %vm1299_vm0, %v3143_v59, -inf  ;;  %1132 = vmatmul.bf16.gmra.mxu2 %v2267_v55  ;;  %v1081_v2 = vadd.f32 %v3135_v56, %v952_v44  ;;  %v2433_v44 = vld [vmem:[%s4179_s0 + $0x1cc] sm:$0xf] }
 0x2ff   :  { %1364 = vmax.xlane.f32.xlu2 %v1308_v58  ;;  %v2423_v58 = vld [vmem:[%s4179_s0 + $0x178] sm:$0xf0]  ;;  %1003 = vmatmul.bf16.gmra.mxu1 %v2263_v61  ;;  %v1094_v52 = vadd.f32 %v3248_v0, %v965_v22 }
 0x303   :  { %v1199_v9 = vpop.f32.mrf.mxu3 }
 0x304   :  { %v3169_v13 = vadd.f32 %v1199_v9, %v1071_v8  ;;  %v2247_v8 = vor.u32 %v2423_v58, %v2246_v54  ;;  %v3258_v11 = vpop.f32.mrf.mxu1  ;;  %v962_v54 = vadd.f32 %v2956_v10, %v3216_v46  ;;  %v2434_v46 = vld [vmem:[%s4179_s0 + $0x1d0] sm:$0xf0] }
 0x306   :  { %v1309_v15 = vsel %vm1299_vm0, %v3169_v13, -inf }
 0x307   :  { %1366 = vmax.xlane.f32.xlu0 %v1309_v15  ;;  %v3261_v15 = vpop.f32.mrf.mxu2 }
 0x308   :  { %1241 = vmatmul.bf16.gmra.mxu3 %v2223_v14  ;;  %v1084_v14 = vadd.f32 %v3164_v6, %v955_v1 }
 0x30b   :  { %v1202_v4 = vpop.f32.mrf.mxu3 }
 0x30c   :  { %v3185_v23 = vadd.f32 %v1202_v4, %v1074_v17  ;;  %v2276_v17 = vld [vmem:[%s4179_s0 + $0x1bc] sm:$0xf0]  ;;  %v3276_v26 = vpop.f32.mrf.mxu1 }
 0x30d   :  { %v2279_v12 = vor.u32 %v2430_v63, %v2276_v17 }
 0x30e   :  { %v1310_v19 = vsel %vm1299_vm0, %v3185_v23, -inf }
 0x30f   :  { %1368 = vmax.xlane.f32.xlu1 %v1310_v19  ;;  %1137 = vmatmul.bf16.gmra.mxu2 %v2279_v12  ;;  %v2431_v19 = vld [vmem:[%s4179_s0 + $0x1b8] sm:$0xf0]  ;;  %v3290_v32 = vpop.f32.mrf.mxu2 }
 0x310   :  { %v2275_v21 = vor.u32 %v2431_v19, %v2274_v27 }
 0x312   :  { %1008 = vmatmul.bf16.gmra.mxu1 %v2275_v21 }
 0x313   :  { %v1204_v38 = vpop.f32.mrf.mxu3 }
 0x314   :  { %v3211_v41 = vadd.f32 %v1204_v38, %v1076_v35  ;;  %v3304_v20 = vpop.f32.mrf.mxu1 }
 0x316   :  { %v1311_v43 = vsel %vm1299_vm0, %v3211_v41, -inf }
 0x317   :  { %1370 = vmax.xlane.f32.xlu2 %v1311_v43  ;;  %v2259_v43 = vor.u32 %v2426_v29, %v2258_v16  ;;  %v3307_v37 = vpop.f32.mrf.mxu2 }
 0x318   :  { %1246 = vmatmul.bf16.gmra.mxu3 %v2235_v42 }
 0x31b   :  { %v1207_v31 = vpop.f32.mrf.mxu3 }
 0x31c   :  { %v3227_v53 = vadd.f32 %v1207_v31, %v1079_v47 }
 0x31e   :  { %v1312_v45 = vsel %vm1299_vm0, %v3227_v53, -inf }
 0x31f   :  { %1372 = vmax.xlane.f32.xlu0 %v1312_v45  ;;  %v2288_v45 = vld [vmem:[%s4179_s0 + $0x1d4] sm:$0xf0] }
 0x320   :  { %v2291_v60 = vor.u32 %v2433_v44, %v2288_v45  ;;  %v2298_v45 = vld [vmem:[%s4179_s0 + $0x1e0] sm:$0xf] }
 0x322   :  { %1142 = vmatmul.bf16.gmra.mxu2 %v2291_v60 }
 0x323   :  { %v1209_v3 = vpop.f32.mrf.mxu3 }
 0x324   :  { %v3253_v5 = vadd.f32 %v1209_v3, %v1081_v2  ;;  %v3328_v2 = vpop.f32.mrf.mxu1  ;;  %v2286_v3 = vld [vmem:[%s4179_s0 + $0x1c8] sm:$0xf] }
 0x325   :  { %v2287_v1 = vor.u32 %v2434_v46, %v2286_v3 }
 0x326   :  { %v1313_v9 = vsel %vm1299_vm0, %v3253_v5, -inf }
 0x327   :  { %1374 = vmax.xlane.f32.xlu1 %v1313_v9  ;;  %v2429_v9 = vld [vmem:[%s4179_s0 + $0x1a8] sm:$0xf0]  ;;  %1013 = vmatmul.bf16.gmra.mxu1 %v2287_v1  ;;  %v970_v1 = vadd.f32 %v2956_v10, %v3276_v26 }
 0x328   :  { %1251 = vmatmul.bf16.gmra.mxu3 %v2247_v8  ;;  %v2270_v8 = vld [vmem:[%s4179_s0 + $0x1a0] sm:$0xf] }
 0x329   :  { %v2271_v27 = vor.u32 %v2429_v9, %v2270_v8  ;;  %v1099_v26 = vadd.f32 %v3290_v32, %v970_v1 }
 0x32b   :  { %v1212_v56 = vpop.f32.mrf.mxu3 }
 0x32c   :  { %v3269_v4 = vadd.f32 %v1212_v56, %v1084_v14  ;;  %v3342_v14 = vpop.f32.mrf.mxu2  ;;  %v1091_v56 = vadd.f32 %v3219_v49, %v962_v54 }
 0x32e   :  { %v1314_v6 = vsel %vm1299_vm0, %v3269_v4, -inf }
 0x32f   :  { %1376 = vmax.xlane.f32.xlu2 %v1314_v6 }
 0x332   :  { %v1349_v34 = vpop.xlane.xlu0 %1348 }
 0x333   :  { %v3294_v35 = vsub.f32 %v2980_v25, %v1349_v34  ;;  %v1214_v38 = vpop.f32.mrf.mxu3  ;;  %v1089_v25 = vadd.f32 %v3206_v36, %v960_v40  ;;  %v2436_v40 = vld [vmem:[%s4179_s0 + $0x1e4] sm:$0xf] }
 0x334   :  { %v3298_v42 = vadd.f32 %v1214_v38, %v1086_v28  ;;  %v3361_v29 = vpop.f32.mrf.mxu2 }
 0x335   :  { %v1492_v47 = vmul.f32 1.442695, %v3294_v35 }
 0x336   :  { %v1315_v31 = vsel %vm1299_vm0, %v3298_v42, -inf }
 0x337   :  { %2449 = vpow2.f32 %v1492_v47  ;;  %1378 = vmax.xlane.f32.xlu0 %v1315_v31 }
 0x338   :  { %1256 = vmatmul.bf16.gmra.mxu3 %v2259_v43  ;;  %v2300_v43 = vld [vmem:[%s4179_s0 + $0x1ec] sm:$0xf0] }
 0x339   :  { %v2303_v31 = vor.u32 %v2436_v40, %v2300_v43  ;;  %v972_v40 = vadd.f32 %v2956_v10, %v3304_v20  ;;  %v2440_v20 = vld [vmem:[%s4179_s0 + $0x200] sm:$0xf0] }
 0x33a   :  { %v1351_v51 = vpop.xlane.xlu0 %1350 }
 0x33b   :  { %v3310_v30 = vsub.f32 %v3003_v39, %v1351_v51  ;;  %v1217_v55 = vpop.f32.mrf.mxu3  ;;  %v967_v51 = vadd.f32 %v2956_v10, %v3258_v11  ;;  %1147 = vmatmul.bf16.gmra.mxu2 %v2303_v31  ;;  %v2437_v11 = vld [vmem:[%s4179_s0 + $0x1e8] sm:$0xf0] }
 0x33c   :  { %v3318_v57 = vadd.f32 %v1217_v55, %v1089_v25  ;;  %v2299_v60 = vor.u32 %v2437_v11, %v2298_v45  ;;  %v3396_v54 = vpop.f32.mrf.mxu2  ;;  %v1101_v45 = vadd.f32 %v3307_v37, %v972_v40  ;;  %v2322_v40 = vld [vmem:[%s4179_s0 + $0x210] sm:$0xf] }
 0x33d   :  { %v2450_v36 = vpop.eup %2449  ;;  %v1494_v61 = vmul.f32 1.442695, %v3310_v30 }
 0x33e   :  { %v1316_v39 = vsel %vm1299_vm0, %v3318_v57, -inf  ;;  %v1588_v58 = vsel %vm1299_vm0, %v2450_v36, 0.0  ;;  %v2282_v36 = vld [vmem:[%s4179_s0 + $0x1b8] sm:$0xf]  ;;  %1018 = vmatmul.bf16.gmra.mxu1 %v2299_v60 }
 0x33f   :  { %2451 = vpow2.f32 %v1494_v61  ;;  %1380 = vmax.xlane.f32.xlu1 %v1316_v39  ;;  %1636 = vadd.xlane.f32.xlu0 %v1588_v58  ;;  %v2432_v61 = vld [vmem:[%s4179_s0 + $0x1c0] sm:$0xf0]  ;;  %v1096_v39 = vadd.f32 %v3261_v15, %v967_v51  ;;  %v2294_v51 = vld [vmem:[%s4179_s0 + $0x1d0] sm:$0xf] }
 0x340   :  { %v2283_v9 = vor.u32 %v2432_v61, %v2282_v36  ;;  %v975_v61 = vadd.f32 %v2956_v10, %v3328_v2 }
 0x342   :  { %v1353_v63 = vpop.xlane.xlu1 %1352  ;;  %v1104_v2 = vadd.f32 %v3342_v14, %v975_v61 }
 0x343   :  { %v3346_v17 = vsub.f32 %v3018_v48, %v1353_v63  ;;  %v1219_v12 = vpop.f32.mrf.mxu3  ;;  %v3358_v48 = vpop.f32.mrf.mxu1 }
 0x344   :  { %v3350_v6 = vadd.f32 %v1219_v12, %v1091_v56  ;;  %v3415_v22 = vpop.f32.mrf.mxu2 }
 0x345   :  { %v2452_v19 = vpop.eup %2451  ;;  %v1496_v21 = vmul.f32 1.442695, %v3346_v17 }
 0x346   :  { %v1317_v16 = vsel %vm1299_vm0, %v3350_v6, -inf  ;;  %v1589_v49 = vsel %vm1299_vm0, %v2452_v19, 0.0 }
 0x347   :  { %2453 = vpow2.f32 %v1496_v21  ;;  %1382 = vmax.xlane.f32.xlu2 %v1317_v16  ;;  %1638 = vadd.xlane.f32.xlu1 %v1589_v49  ;;  %v2439_v16 = vld [vmem:[%s4179_s0 + $0x1fc] sm:$0xf]  ;;  %v2312_v49 = vld [vmem:[%s4179_s0 + $0x204] sm:$0xf0] }
 0x348   :  { %1261 = vmatmul.bf16.gmra.mxu3 %v2271_v27 }
 0x34a   :  { %v1355_v28 = vpop.xlane.xlu1 %1354 }
 0x34b   :  { %v3364_v34 = vsub.f32 %v3043_v62, %v1355_v28  ;;  %v1222_v38 = vpop.f32.mrf.mxu3  ;;  %v3382_v44 = vpop.f32.mrf.mxu1  ;;  %v2315_v28 = vor.u32 %v2439_v16, %v2312_v49 }
 0x34c   :  { %v3372_v47 = vadd.f32 %v1222_v38, %v1094_v52 }
 0x34d   :  { %v2454_v0 = vpop.eup %2453  ;;  %v1498_v25 = vmul.f32 1.442695, %v3364_v34  ;;  %1152 = vmatmul.bf16.gmra.mxu2 %v2315_v28  ;;  %v977_v28 = vadd.f32 %v2956_v10, %v3358_v48  ;;  %v2443_v48 = vld [vmem:[%s4179_s0 + $0x218] sm:$0xf0] }
 0x34e   :  { %v1590_v62 = vsel %vm1299_vm0, %v2454_v0, 0.0  ;;  %v1318_v55 = vsel %vm1299_vm0, %v3372_v47, -inf  ;;  %v2310_v0 = vld [vmem:[%s4179_s0 + $0x1f8] sm:$0xf] }
 0x34f   :  { %2455 = vpow2.f32 %v1498_v25  ;;  %1640 = vadd.xlane.f32.xlu2 %v1590_v62  ;;  %1384 = vmax.xlane.f32.xlu0 %v1318_v55  ;;  %v2311_v25 = vor.u32 %v2440_v20, %v2310_v0  ;;  %v2435_v62 = vld [vmem:[%s4179_s0 + $0x1d8] sm:$0xf0]  ;;  %v3450_v55 = vpop.f32.mrf.mxu2  ;;  %v2438_v0 = vld [vmem:[%s4179_s0 + $0x1f0] sm:$0xf0] }
 0x351   :  { %1023 = vmatmul.bf16.gmra.mxu1 %v2311_v25  ;;  %v1106_v25 = vadd.f32 %v3361_v29, %v977_v28 }
 0x352   :  { %v1357_v58 = vpop.xlane.xlu2 %1356 }
 0x353   :  { %v3400_v3 = vsub.f32 %v3059_v7, %v1357_v58  ;;  %v1224_v46 = vpop.f32.mrf.mxu3  ;;  %v3412_v7 = vpop.f32.mrf.mxu1  ;;  %v2295_v58 = vor.u32 %v2435_v62, %v2294_v51 }
 0x354   :  { %v3404_v8 = vadd.f32 %v1224_v46, %v1096_v39 }
 0x355   :  { %v2456_v56 = vpop.eup %2455  ;;  %v1500_v63 = vmul.f32 1.442695, %v3400_v3 }
 0x356   :  { %v1591_v12 = vsel %vm1299_vm0, %v2456_v56, 0.0  ;;  %v1319_v15 = vsel %vm1299_vm0, %v3404_v8, -inf }
 0x357   :  { %2457 = vpow2.f32 %v1500_v63  ;;  %1642 = vadd.xlane.f32.xlu0 %v1591_v12  ;;  %1386 = vmax.xlane.f32.xlu1 %v1319_v15  ;;  %v3469_v56 = vpop.f32.mrf.mxu2 }
 0x358   :  { %1266 = vmatmul.bf16.gmra.mxu3 %v2283_v9 }
 0x35a   :  { %v1359_v27 = vpop.xlane.xlu2 %1358 }
 0x35b   :  { %v3418_v19 = vsub.f32 %v3085_v24, %v1359_v27  ;;  %v1227_v21 = vpop.f32.mrf.mxu3  ;;  %v3436_v31 = vpop.f32.mrf.mxu1  ;;  %v2324_v27 = vld [vmem:[%s4179_s0 + $0x21c] sm:$0xf0] }
 0x35c   :  { %v3426_v52 = vadd.f32 %v1227_v21, %v1099_v26  ;;  %v2442_v26 = vld [vmem:[%s4179_s0 + $0x214] sm:$0xf] }
 0x35d   :  { %v2458_v32 = vpop.eup %2457  ;;  %v1502_v38 = vmul.f32 1.442695, %v3418_v19  ;;  %v2327_v16 = vor.u32 %v2442_v26, %v2324_v27  ;;  %v2336_v26 = vld [vmem:[%s4179_s0 + $0x234] sm:$0xf0] }
 0x35e   :  { %v1320_v24 = vsel %vm1299_vm0, %v3426_v52, -inf  ;;  %v1592_v43 = vsel %vm1299_vm0, %v2458_v32, 0.0 }
 0x35f   :  { %2459 = vpow2.f32 %v1502_v38  ;;  %1388 = vmax.xlane.f32.xlu2 %v1320_v24  ;;  %1644 = vadd.xlane.f32.xlu1 %v1592_v43  ;;  %v2323_v24 = vor.u32 %v2443_v48, %v2322_v40  ;;  %v2306_v43 = vld [vmem:[%s4179_s0 + $0x1e8] sm:$0xf]  ;;  %v3504_v20 = vpop.f32.mrf.mxu2  ;;  %v2318_v40 = vld [vmem:[%s4179_s0 + $0x200] sm:$0xf]  ;;  %v2441_v48 = vld [vmem:[%s4179_s0 + $0x208] sm:$0xf0] }
 0x360   :  { %1157 = vmatmul.bf16.gmra.mxu2 %v2327_v16  ;;  %v2307_v61 = vor.u32 %v2438_v0, %v2306_v43 }
 0x361   :  { %1028 = vmatmul.bf16.gmra.mxu1 %v2323_v24 }
 0x362   :  { %v1361_v11 = vpop.xlane.xlu0 %1360 }
 0x363   :  { %v3454_v60 = vsub.f32 %v3101_v33, %v1361_v11  ;;  %v1229_v36 = vpop.f32.mrf.mxu3  ;;  %v3466_v33 = vpop.f32.mrf.mxu1  ;;  %v980_v11 = vadd.f32 %v2956_v10, %v3382_v44 }
 0x364   :  { %v3458_v39 = vadd.f32 %v1229_v36, %v1101_v45 }
 0x365   :  { %v2460_v46 = vpop.eup %2459  ;;  %v1504_v1 = vmul.f32 1.442695, %v3454_v60  ;;  %v1109_v44 = vadd.f32 %v3396_v54, %v980_v11 }
 0x366   :  { %v1593_v9 = vsel %vm1299_vm0, %v2460_v46, 0.0  ;;  %v1321_v37 = vsel %vm1299_vm0, %v3458_v39, -inf }
 0x367   :  { %2461 = vpow2.f32 %v1504_v1  ;;  %1646 = vadd.xlane.f32.xlu2 %v1593_v9  ;;  %1390 = vmax.xlane.f32.xlu0 %v1321_v37 }
 0x368   :  { %1271 = vmatmul.bf16.gmra.mxu3 %v2295_v58 }
 0x36a   :  { %v1363_v63 = vpop.xlane.xlu1 %1362 }
 0x36b   :  { %v3472_v12 = vsub.f32 %v3127_v50, %v1363_v63  ;;  %v1232_v15 = vpop.f32.mrf.mxu3  ;;  %v3490_v38 = vpop.f32.mrf.mxu1 }
 0x36c   :  { %v3480_v21 = vadd.f32 %v1232_v15, %v1104_v2  ;;  %v3526_v63 = vpop.f32.mrf.mxu2  ;;  %v2445_v15 = vld [vmem:[%s4179_s0 + $0x22c] sm:$0xf] }
 0x36d   :  { %v2462_v14 = vpop.eup %2461  ;;  %v1506_v49 = vmul.f32 1.442695, %v3472_v12  ;;  %v2339_v16 = vor.u32 %v2445_v15, %v2336_v26 }
 0x36e   :  { %v1322_v50 = vsel %vm1299_vm0, %v3480_v21, -inf  ;;  %v1594_v32 = vsel %vm1299_vm0, %v2462_v14, 0.0 }
 0x36f   :  { %2463 = vpow2.f32 %v1506_v49  ;;  %1392 = vmax.xlane.f32.xlu1 %v1322_v50  ;;  %1648 = vadd.xlane.f32.xlu0 %v1594_v32  ;;  %v2334_v50 = vld [vmem:[%s4179_s0 + $0x228] sm:$0xf]  ;;  %v2446_v32 = vld [vmem:[%s4179_s0 + $0x230] sm:$0xf0] }
 0x370   :  { %1162 = vmatmul.bf16.gmra.mxu2 %v2339_v16 }
 0x372   :  { %v1365_v51 = vpop.xlane.xlu2 %1364 }
 0x373   :  { %v3508_v62 = vsub.f32 %v3143_v59, %v1365_v51  ;;  %v1234_v45 = vpop.f32.mrf.mxu3  ;;  %v3520_v59 = vpop.f32.mrf.mxu1 }
 0x374   :  { %v3512_v36 = vadd.f32 %v1234_v45, %v1106_v25  ;;  %v985_v45 = vadd.f32 %v2956_v10, %v3436_v31 }
 0x375   :  { %v2464_v58 = vpop.eup %2463  ;;  %v1508_v46 = vmul.f32 1.442695, %v3508_v62 }
 0x376   :  { %v1323_v1 = vsel %vm1299_vm0, %v3512_v36, -inf  ;;  %v1595_v29 = vsel %vm1299_vm0, %v2464_v58, 0.0  ;;  %v1114_v31 = vadd.f32 %v3450_v55, %v985_v45 }
 0x377   :  { %2465 = vpow2.f32 %v1508_v46  ;;  %1394 = vmax.xlane.f32.xlu2 %v1323_v1  ;;  %1650 = vadd.xlane.f32.xlu1 %v1595_v29  ;;  %v3567_v1 = vpop.f32.mrf.mxu2 }
 0x378   :  { %1276 = vmatmul.bf16.gmra.mxu3 %v2307_v61  ;;  %v2319_v61 = vor.u32 %v2441_v48, %v2318_v40 }
 0x37a   :  { %v1367_v9 = vpop.xlane.xlu0 %1366 }
 0x37b   :  { %v3524_v37 = vsub.f32 %v3169_v13, %v1367_v9  ;;  %v1237_v2 = vpop.f32.mrf.mxu3  ;;  %v982_v13 = vadd.f32 %v2956_v10, %v3412_v7  ;;  %v2335_v7 = vor.u32 %v2446_v32, %v2334_v50  ;;  %v3556_v24 = vpop.f32.mrf.mxu1 }
 0x37c   :  { %v3534_v27 = vadd.f32 %v1237_v2, %v1109_v44 }
 0x37d   :  { %v2466_v54 = vpop.eup %2465  ;;  %v1510_v14 = vmul.f32 1.442695, %v3524_v37  ;;  %v1111_v43 = vadd.f32 %v3415_v22, %v982_v13  ;;  %1033 = vmatmul.bf16.gmra.mxu1 %v2335_v7  ;;  %v2330_v13 = vld [vmem:[%s4179_s0 + $0x218] sm:$0xf]  ;;  %v990_v7 = vadd.f32 %v2956_v10, %v3490_v38 }
 0x37e   :  { %v1596_v49 = vsel %vm1299_vm0, %v2466_v54, 0.0  ;;  %v1324_v28 = vsel %vm1299_vm0, %v3534_v27, -inf  ;;  %v987_v54 = vadd.f32 %v2956_v10, %v3466_v33  ;;  %v2444_v33 = vld [vmem:[%s4179_s0 + $0x220] sm:$0xf0] }
 0x37f   :  { %2467 = vpow2.f32 %v1510_v14  ;;  %1652 = vadd.xlane.f32.xlu2 %v1596_v49  ;;  %1396 = vmax.xlane.f32.xlu0 %v1324_v28  ;;  %v2331_v48 = vor.u32 %v2444_v33, %v2330_v13  ;;  %v995_v33 = vadd.f32 %v2956_v10, %v3556_v24 }
 0x380   :  { %v1116_v49 = vadd.f32 %v3469_v56, %v987_v54  ;;  %v1119_v56 = vadd.f32 %v3504_v20, %v990_v7 }
 0x382   :  { %v1369_v0 = vpop.xlane.xlu1 %1368 }
 0x383   :  { %v3560_v25 = vsub.f32 %v3185_v23, %v1369_v0  ;;  %v1239_v51 = vpop.f32.mrf.mxu3  ;;  %v3578_v2 = vpop.f32.mrf.mxu1 }
 0x384   :  { %v3564_v11 = vadd.f32 %v1239_v51, %v1111_v43 }
 0x385   :  { %v2468_v58 = vpop.eup %2467  ;;  %v1512_v46 = vmul.f32 1.442695, %v3560_v25 }
 0x386   :  { %v1325_v22 = vsel %vm1299_vm0, %v3564_v11, -inf  ;;  %v1597_v23 = vsel %vm1299_vm0, %v2468_v58, 0.0 }
 0x387   :  { %2469 = vpow2.f32 %v1512_v46  ;;  %1398 = vmax.xlane.f32.xlu1 %v1325_v22  ;;  %1654 = vadd.xlane.f32.xlu0 %v1597_v23 }
 0x388   :  { %1281 = vmatmul.bf16.gmra.mxu3 %v2319_v61 }
 0x38a   :  { %v1371_v29 = vpop.xlane.xlu2 %1370 }
 0x38b   :  { %v3576_v44 = vsub.f32 %v3211_v41, %v1371_v29  ;;  %v1242_v9 = vpop.f32.mrf.mxu3  ;;  %v3590_v41 = vpop.f32.mrf.mxu2  ;;  %v992_v29 = vadd.f32 %v2956_v10, %v3520_v59  ;;  %v2447_v59 = vld [vmem:[%s4179_s0 + $0x238] sm:$0xf0] }
 0x38c   :  { %v3580_v15 = vadd.f32 %v1242_v9, %v1114_v31  ;;  %v3607_v51 = vpop.f32.mrf.mxu1 }
 0x38d   :  { %v2470_v26 = vpop.eup %2469  ;;  %v1514_v16 = vmul.f32 1.442695, %v3576_v44 }
 0x38e   :  { %v1326_v55 = vsel %vm1299_vm0, %v3580_v15, -inf  ;;  %v1598_v14 = vsel %vm1299_vm0, %v2470_v26, 0.0  ;;  %v2342_v26 = vld [vmem:[%s4179_s0 + $0x230] sm:$0xf] }
 0x38f   :  { %2471 = vpow2.f32 %v1514_v16  ;;  %1400 = vmax.xlane.f32.xlu2 %v1326_v55  ;;  %1656 = vadd.xlane.f32.xlu1 %v1598_v14  ;;  %v1121_v16 = vadd.f32 %v3526_v63, %v992_v29 }
 0x392   :  { %v1373_v28 = vpop.xlane.xlu0 %1372 }
 0x393   :  { %v3600_v50 = vsub.f32 %v3227_v53, %v1373_v28  ;;  %v1244_v32 = vpop.f32.mrf.mxu3  ;;  %v3615_v38 = vpop.f32.mrf.mxu2  ;;  %v2343_v28 = vor.u32 %v2447_v59, %v2342_v26 }
 0x394   :  { %v3604_v40 = vadd.f32 %v1244_v32, %v1116_v49 }
 0x395   :  { %v2472_v43 = vpop.eup %2471  ;;  %v1516_v0 = vmul.f32 1.442695, %v3600_v50 }
 0x396   :  { %v1599_v45 = vsel %vm1299_vm0, %v2472_v43, 0.0  ;;  %v1327_v53 = vsel %vm1299_vm0, %v3604_v40, -inf }
 0x397   :  { %2473 = vpow2.f32 %v1516_v0  ;;  %1658 = vadd.xlane.f32.xlu2 %v1599_v45  ;;  %1402 = vmax.xlane.f32.xlu0 %v1327_v53 }
 0x398   :  { %1286 = vmatmul.bf16.gmra.mxu3 %v2331_v48  ;;  %v1124_v48 = vadd.f32 %v3567_v1, %v995_v33 }
 0x39a   :  { %v1375_v61 = vpop.xlane.xlu1 %1374 }
 0x39b   :  { %v3618_v58 = vsub.f32 %v3253_v5, %v1375_v61  ;;  %v1247_v46 = vpop.f32.mrf.mxu3  ;;  %v3630_v5 = vpop.f32.mrf.mxu1 }
 0x39c   :  { %v3620_v22 = vadd.f32 %v1247_v46, %v1119_v56  ;;  %v3642_v13 = vpop.f32.mrf.mxu2  ;;  %v3668_v46 = vld [vmem:[%s4180_s3] ss:$0 sm:$0xff] }
 0x39d   :  { %v2474_v23 = vpop.eup %2473  ;;  %v1518_v31 = vmul.f32 1.442695, %v3618_v58  ;;  %v997_v1 = vadd.f32 %v3668_v46, %v3578_v2  ;;  %v1000_v59 = vadd.f32 %v3668_v46, %v3607_v51 }
 0x39e   :  { %v1328_v20 = vsel %vm1299_vm0, %v3620_v22, -inf  ;;  %v1600_v9 = vsel %vm1299_vm0, %v2474_v23, 0.0 }
 0x39f   :  { %2475 = vpow2.f32 %v1518_v31  ;;  %1404 = vmax.xlane.f32.xlu1 %v1328_v20  ;;  %1660 = vadd.xlane.f32.xlu0 %v1600_v9  ;;  %v1126_v31 = vadd.f32 %v3590_v41, %v997_v1 }
 0x3a2   :  { %v1377_v54 = vpop.xlane.xlu2 %1376 }
 0x3a3   :  { %v3640_v55 = vsub.f32 %v3269_v4, %v1377_v54  ;;  %v1249_v14 = vpop.f32.mrf.mxu3  ;;  %v3655_v10 = vpop.f32.mrf.mxu1 }
 0x3a4   :  { %v3646_v49 = vadd.f32 %v1249_v14, %v1121_v16  ;;  %v3663_v61 = vpop.f32.mrf.mxu2 }
 0x3a5   :  { %v2476_v32 = vpop.eup %2475  ;;  %v1520_v7 = vmul.f32 1.442695, %v3640_v55 }
 0x3a6   :  { %v1329_v63 = vsel %vm1299_vm0, %v3646_v49, -inf  ;;  %v1601_v4 = vsel %vm1299_vm0, %v2476_v32, 0.0 }
 0x3a7   :  { %2477 = vpow2.f32 %v1520_v7  ;;  %1406 = vmax.xlane.f32.xlu2 %v1329_v63  ;;  %1662 = vadd.xlane.f32.xlu1 %v1601_v4 }
 0x3a8   :  { %1291 = vmatmul.bf16.gmra.mxu3 %v2343_v28  ;;  %v1129_v28 = vadd.f32 %v3615_v38, %v1000_v59  ;;  %v1002_v38 = vadd.f32 %v3668_v46, %v3630_v5 }
 0x3aa   :  { %v1379_v24 = vpop.xlane.xlu0 %1378 }
 0x3ab   :  { %v3658_v43 = vsub.f32 %v3298_v42, %v1379_v24  ;;  %v1252_v0 = vpop.f32.mrf.mxu3  ;;  %v3681_v2 = vpop.f32.mrf.mxu1 }
 0x3ac   :  { %v3660_v45 = vadd.f32 %v1252_v0, %v1124_v48  ;;  %v3693_v33 = vpop.f32.mrf.mxu2 }
 0x3ad   :  { %v2478_v53 = vpop.eup %2477  ;;  %v1522_v56 = vmul.f32 1.442695, %v3658_v43 }
 0x3ae   :  { %v1602_v42 = vsel %vm1299_vm0, %v2478_v53, 0.0  ;;  %v1330_v23 = vsel %vm1299_vm0, %v3660_v45, -inf }
 0x3af   :  { %2479 = vpow2.f32 %v1522_v56  ;;  %1664 = vadd.xlane.f32.xlu2 %v1602_v42  ;;  %1408 = vmax.xlane.f32.xlu0 %v1330_v23 }
 0x3b2   :  { %v1381_v29 = vpop.xlane.xlu1 %1380  ;;  %v1637_v20 = vpop.xlane.xlu0 %1636 }
 0x3b3   :  { %v3679_v9 = vsub.f32 %v3318_v57, %v1381_v29  ;;  %2481 = vlog2.f32 %v1637_v20  ;;  %v1254_v26 = vpop.f32.mrf.mxu3  ;;  %v1009_v1 = vpop.f32.mrf.mxu1 }
 0x3b4   :  { %v3685_v16 = vadd.f32 %v1254_v26, %v1126_v31  ;;  %v1138_v23 = vpop.f32.mrf.mxu2  ;;  %v1131_v31 = vadd.f32 %v3642_v13, %v1002_v38 }
 0x3b5   :  { %v2480_v54 = vpop.eup %2479  ;;  %v1524_v14 = vmul.f32 1.442695, %v3679_v9 }
 0x3b6   :  { %v1331_v41 = vsel %vm1299_vm0, %v3685_v16, -inf  ;;  %v1603_v57 = vsel %vm1299_vm0, %v2480_v54, 0.0 }
 0x3b7   :  { %2483 = vpow2.f32 %v1524_v14  ;;  %1410 = vmax.xlane.f32.xlu1 %v1331_v41  ;;  %1666 = vadd.xlane.f32.xlu0 %v1603_v57  ;;  %v1005_v14 = vadd.f32 %v3668_v46, %v3655_v10 }
 0x3b9   :  { %v2482_v51 = vpop.eup %2481  ;;  %v1134_v10 = vadd.f32 %v3663_v61, %v1005_v14  ;;  %v1007_v61 = vadd.f32 %v3668_v46, %v3681_v2 }
 0x3ba   :  { %v1733_v32 = vmul.f32 0.6931472, %v2482_v51  ;;  %v1383_v7 = vpop.xlane.xlu2 %1382  ;;  %v1639_v63 = vpop.xlane.xlu1 %1638 }
 0x3bb   :  { %v3697_v4 = vsub.f32 %v3350_v6, %v1383_v7  ;;  %2485 = vlog2.f32 %v1639_v63  ;;  %v1257_v48 = vpop.f32.mrf.mxu3 }
 0x3bc   :  { %v1828_v24 = vsub.f32 %v3294_v35, %v1733_v32  ;;  %v3700_v0 = vadd.f32 %v1257_v48, %v1129_v28 }
 0x3bd   :  { %v2484_v53 = vpop.eup %2483  ;;  %v1526_v56 = vmul.f32 1.442695, %v3697_v4 }
 0x3be   :  { %1876 = vst [vmem:[%s4181_s4] sm:$0xff] %v1828_v24  ;;  %v1332_v6 = vsel %vm1299_vm0, %v3700_v0, -inf  ;;  %v1604_v35 = vsel %vm1299_vm0, %v2484_v53, 0.0  ;;  %v1140_v53 = vpop.f32.mrf.mxu2 }
 0x3bf   :  { %2487 = vpow2.f32 %v1526_v56  ;;  %1412 = vmax.xlane.f32.xlu2 %v1332_v6  ;;  %1668 = vadd.xlane.f32.xlu1 %v1604_v35 }
 0x3c1   :  { %v2486_v42 = vpop.eup %2485 }
 0x3c2   :  { %v1735_v29 = vmul.f32 0.6931472, %v2486_v42  ;;  %v1641_v20 = vpop.xlane.xlu2 %1640  ;;  %v1385_v26 = vpop.xlane.xlu0 %1384 }
 0x3c3   :  { %2489 = vlog2.f32 %v1641_v20  ;;  %v3715_v5 = vsub.f32 %v3372_v47, %v1385_v26  ;;  %v1259_v59 = vpop.f32.mrf.mxu3 }
 0x3c4   :  { %v1829_v54 = vsub.f32 %v3310_v30, %v1735_v29  ;;  %v3720_v41 = vadd.f32 %v1259_v59, %v1131_v31  ;;  %v1011_v30 = vpop.f32.mrf.mxu1  ;;  %v1136_v29 = vadd.f32 %v3693_v33, %v1007_v61 }
 0x3c5   :  { %v2488_v57 = vpop.eup %2487  ;;  %v1528_v28 = vmul.f32 1.442695, %v3715_v5 }
 0x3c6   :  { %1877 = vst [vmem:[%s4181_s4 + $0x8] sm:$0xff] %v1829_v54  ;;  %v1605_v13 = vsel %vm1299_vm0, %v2488_v57, 0.0  ;;  %v1333_v47 = vsel %vm1299_vm0, %v3720_v41, -inf  ;;  %v1010_v57 = vadd.f32 %v3668_v46, %v1009_v1 }
 0x3c7   :  { %2491 = vpow2.f32 %v1528_v28  ;;  %1670 = vadd.xlane.f32.xlu2 %v1605_v13  ;;  %1414 = vmax.xlane.f32.xlu0 %v1333_v47 }
 0x3c9   :  { %v2490_v51 = vpop.eup %2489 }
 0x3ca   :  { %v1737_v32 = vmul.f32 0.6931472, %v2490_v51  ;;  %v1387_v7 = vpop.xlane.xlu1 %1386  ;;  %v1643_v63 = vpop.xlane.xlu0 %1642 }
 0x3cb   :  { %v3733_v48 = vsub.f32 %v3404_v8, %v1387_v7  ;;  %2493 = vlog2.f32 %v1643_v63  ;;  %v1262_v24 = vpop.f32.mrf.mxu3 }
 0x3cc   :  { %v1830_v56 = vsub.f32 %v3346_v17, %v1737_v32  ;;  %v3736_v38 = vadd.f32 %v1262_v24, %v1134_v10  ;;  %v1014_v31 = vpop.f32.mrf.mxu1  ;;  %v1143_v10 = vpop.f32.mrf.mxu2 }
 0x3cd   :  { %v2492_v6 = vpop.eup %2491  ;;  %v1530_v35 = vmul.f32 1.442695, %v3733_v48 }
 0x3ce   :  { %1878 = vst [vmem:[%s4181_s4 + $0x10] sm:$0xff] %v1830_v56  ;;  %v1334_v8 = vsel %vm1299_vm0, %v3736_v38, -inf  ;;  %v1606_v42 = vsel %vm1299_vm0, %v2492_v6, 0.0 }
 0x3cf   :  { %2495 = vpow2.f32 %v1530_v35  ;;  %1416 = vmax.xlane.f32.xlu1 %v1334_v8  ;;  %1672 = vadd.xlane.f32.xlu0 %v1606_v42 }
 0x3d1   :  { %v2494_v17 = vpop.eup %2493 }
 0x3d2   :  { %v1739_v20 = vmul.f32 0.6931472, %v2494_v17  ;;  %v1389_v26 = vpop.xlane.xlu2 %1388  ;;  %v1645_v59 = vpop.xlane.xlu1 %1644 }
 0x3d3   :  { %v3751_v54 = vsub.f32 %v3426_v52, %v1389_v26  ;;  %2497 = vlog2.f32 %v1645_v59  ;;  %v1264_v2 = vpop.f32.mrf.mxu3 }
 0x3d4   :  { %v1831_v14 = vsub.f32 %v3364_v34, %v1739_v20  ;;  %v3755_v28 = vadd.f32 %v1264_v2, %v1136_v29  ;;  %v1139_v34 = vadd.f32 %v1138_v23, %v1010_v57  ;;  %v1016_v56 = vpop.f32.mrf.mxu1  ;;  %v1012_v23 = vadd.f32 %v3668_v46, %v1011_v30 }
 0x3d5   :  { %v2496_v13 = vpop.eup %2495  ;;  %v1532_v47 = vmul.f32 1.442695, %v3751_v54  ;;  %v1015_v57 = vadd.f32 %v3668_v46, %v1014_v31 }
 0x3d6   :  { %1879 = vst [vmem:[%s4181_s4 + $0x18] sm:$0xff] %v1831_v14  ;;  %v1335_v52 = vsel %vm1299_vm0, %v3755_v28, -inf  ;;  %v1607_v33 = vsel %vm1299_vm0, %v2496_v13, 0.0  ;;  %v1141_v29 = vadd.f32 %v1140_v53, %v1012_v23 }
 0x3d7   :  { %2499 = vpow2.f32 %v1532_v47  ;;  %1418 = vmax.xlane.f32.xlu2 %v1335_v52  ;;  %1674 = vadd.xlane.f32.xlu1 %v1607_v33 }
 0x3d9   :  { %v2498_v1 = vpop.eup %2497 }
 0x3da   :  { %v1741_v51 = vmul.f32 0.6931472, %v2498_v1  ;;  %v1647_v32 = vpop.xlane.xlu2 %1646  ;;  %v1391_v7 = vpop.xlane.xlu0 %1390 }
 0x3db   :  { %2501 = vlog2.f32 %v1647_v32  ;;  %v3767_v63 = vsub.f32 %v3458_v39, %v1391_v7  ;;  %v1267_v24 = vpop.f32.mrf.mxu3 }
 0x3dc   :  { %v1832_v6 = vsub.f32 %v3400_v3, %v1741_v51  ;;  %v3770_v35 = vadd.f32 %v1267_v24, %v1139_v34  ;;  %v1145_v3 = vpop.f32.mrf.mxu2  ;;  %v1019_v33 = vpop.f32.mrf.mxu1 }
 0x3dd   :  { %v2500_v61 = vpop.eup %2499  ;;  %v1534_v8 = vmul.f32 1.442695, %v3767_v63 }
 0x3de   :  { %1880 = vst [vmem:[%s4181_s4 + $0x20] sm:$0xff] %v1832_v6  ;;  %v1608_v42 = vsel %vm1299_vm0, %v2500_v61, 0.0  ;;  %v1336_v39 = vsel %vm1299_vm0, %v3770_v35, -inf }
 0x3df   :  { %2503 = vpow2.f32 %v1534_v8  ;;  %1676 = vadd.xlane.f32.xlu2 %v1608_v42  ;;  %1420 = vmax.xlane.f32.xlu0 %v1336_v39 }
 0x3e1   :  { %v2502_v17 = vpop.eup %2501 }
 0x3e2   :  { %v1743_v20 = vmul.f32 0.6931472, %v2502_v17  ;;  %v1393_v26 = vpop.xlane.xlu1 %1392  ;;  %v1649_v59 = vpop.xlane.xlu0 %1648 }
 0x3e3   :  { %v3783_v2 = vsub.f32 %v3480_v21, %v1393_v26  ;;  %2505 = vlog2.f32 %v1649_v59  ;;  %v1269_v30 = vpop.f32.mrf.mxu3 }
 0x3e4   :  { %v1833_v14 = vsub.f32 %v3418_v19, %v1743_v20  ;;  %v3787_v13 = vadd.f32 %v1269_v30, %v1141_v29  ;;  %v1144_v19 = vadd.f32 %v1143_v10, %v1015_v57  ;;  %v1148_v34 = vpop.f32.mrf.mxu2  ;;  %v1017_v10 = vadd.f32 %v3668_v46, %v1016_v56 }
 0x3e5   :  { %v2504_v47 = vpop.eup %2503  ;;  %v1536_v52 = vmul.f32 1.442695, %v3783_v2  ;;  %v1020_v57 = vadd.f32 %v3668_v46, %v1019_v33 }
 0x3e6   :  { %1881 = vst [vmem:[%s4181_s4 + $0x28] sm:$0xff] %v1833_v14  ;;  %v1337_v21 = vsel %vm1299_vm0, %v3787_v13, -inf  ;;  %v1609_v53 = vsel %vm1299_vm0, %v2504_v47, 0.0  ;;  %v1146_v17 = vadd.f32 %v1145_v3, %v1017_v10 }
 0x3e7   :  { %2507 = vpow2.f32 %v1536_v52  ;;  %1422 = vmax.xlane.f32.xlu1 %v1337_v21  ;;  %1678 = vadd.xlane.f32.xlu0 %v1609_v53 }
 0x3e9   :  { %v2506_v31 = vpop.eup %2505 }
 0x3ea   :  { %v1745_v1 = vmul.f32 0.6931472, %v2506_v31  ;;  %v1395_v51 = vpop.xlane.xlu2 %1394  ;;  %v1651_v32 = vpop.xlane.xlu1 %1650 }
 0x3eb   :  { %v3799_v7 = vsub.f32 %v3512_v36, %v1395_v51  ;;  %2509 = vlog2.f32 %v1651_v32  ;;  %v1272_v24 = vpop.f32.mrf.mxu3 }
 0x3ec   :  { %v1834_v6 = vsub.f32 %v3454_v60, %v1745_v1  ;;  %v3802_v61 = vadd.f32 %v1272_v24, %v1144_v19  ;;  %v1021_v60 = vpop.f32.mrf.mxu1  ;;  %v1150_v30 = vpop.f32.mrf.mxu2 }
 0x3ed   :  { %v2508_v8 = vpop.eup %2507  ;;  %v1538_v23 = vmul.f32 1.442695, %v3799_v7 }
 0x3ee   :  { %1882 = vst [vmem:[%s4181_s4 + $0x30] sm:$0xff] %v1834_v6  ;;  %v1338_v36 = vsel %vm1299_vm0, %v3802_v61, -inf  ;;  %v1610_v42 = vsel %vm1299_vm0, %v2508_v8, 0.0 }
 0x3ef   :  { %2511 = vpow2.f32 %v1538_v23  ;;  %1424 = vmax.xlane.f32.xlu2 %v1338_v36  ;;  %1680 = vadd.xlane.f32.xlu1 %v1610_v42 }
 0x3f1   :  { %v2510_v39 = vpop.eup %2509 }
 0x3f2   :  { %v1747_v29 = vmul.f32 0.6931472, %v2510_v39  ;;  %v1653_v20 = vpop.xlane.xlu2 %1652  ;;  %v1397_v26 = vpop.xlane.xlu0 %1396 }
 0x3f3   :  { %2513 = vlog2.f32 %v1653_v20  ;;  %v3815_v59 = vsub.f32 %v3534_v27, %v1397_v26  ;;  %v1274_v56 = vpop.f32.mrf.mxu3 }
 0x3f4   :  { %v1835_v14 = vsub.f32 %v3472_v12, %v1747_v29  ;;  %v3819_v47 = vadd.f32 %v1274_v56, %v1146_v17  ;;  %v1149_v12 = vadd.f32 %v1148_v34, %v1020_v57  ;;  %v1024_v53 = vpop.f32.mrf.mxu1  ;;  %v1153_v10 = vpop.f32.mrf.mxu2  ;;  %v1022_v34 = vadd.f32 %v3668_v46, %v1021_v60 }
 0x3f5   :  { %v2512_v52 = vpop.eup %2511  ;;  %v1540_v21 = vmul.f32 1.442695, %v3815_v59 }
 0x3f6   :  { %1883 = vst [vmem:[%s4181_s4 + $0x38] sm:$0xff] %v1835_v14  ;;  %v1611_v3 = vsel %vm1299_vm0, %v2512_v52, 0.0  ;;  %v1339_v27 = vsel %vm1299_vm0, %v3819_v47, -inf  ;;  %v1151_v42 = vadd.f32 %v1150_v30, %v1022_v34  ;;  %v1025_v14 = vadd.f32 %v3668_v46, %v1024_v53 }
 0x3f7   :  { %2515 = vpow2.f32 %v1540_v21  ;;  %1682 = vadd.xlane.f32.xlu2 %v1611_v3  ;;  %1426 = vmax.xlane.f32.xlu0 %v1339_v27 }
 0x3f8   :  { %v1154_v3 = vadd.f32 %v1153_v10, %v1025_v14 }
 0x3f9   :  { %v2514_v33 = vpop.eup %2513 }
 0x3fa   :  { %v1749_v19 = vmul.f32 0.6931472, %v2514_v33  ;;  %v1399_v31 = vpop.xlane.xlu1 %1398  ;;  %v1655_v1 = vpop.xlane.xlu0 %1654 }
 0x3fb   :  { %v3831_v51 = vsub.f32 %v3564_v11, %v1399_v31  ;;  %2517 = vlog2.f32 %v1655_v1  ;;  %v1277_v32 = vpop.f32.mrf.mxu3 }
 0x3fc   :  { %v1836_v24 = vsub.f32 %v3508_v62, %v1749_v19  ;;  %v3834_v6 = vadd.f32 %v1277_v32, %v1149_v12  ;;  %v1026_v26 = vpop.f32.mrf.mxu1 }
 0x3fd   :  { %v2516_v8 = vpop.eup %2515  ;;  %v1542_v23 = vmul.f32 1.442695, %v3831_v51 }
 0x3fe   :  { %1884 = vst [vmem:[%s4181_s4 + $0x40] sm:$0xff] %v1836_v24  ;;  %v1340_v11 = vsel %vm1299_vm0, %v3834_v6, -inf  ;;  %v1612_v36 = vsel %vm1299_vm0, %v2516_v8, 0.0  ;;  %v1027_v8 = vadd.f32 %v3668_v46, %v1026_v26 }
 0x3ff   :  { %2519 = vpow2.f32 %v1542_v23  ;;  %1428 = vmax.xlane.f32.xlu1 %v1340_v11  ;;  %1684 = vadd.xlane.f32.xlu0 %v1612_v36 }
 0x401   :  { %v2518_v62 = vpop.eup %2517 }
 0x402   :  { %v1751_v39 = vmul.f32 0.6931472, %v2518_v62  ;;  %v1401_v17 = vpop.xlane.xlu2 %1400  ;;  %v1657_v29 = vpop.xlane.xlu1 %1656 }
 0x403   :  { %v3847_v20 = vsub.f32 %v3580_v15, %v1401_v17  ;;  %2521 = vlog2.f32 %v1657_v29  ;;  %v1279_v60 = vpop.f32.mrf.mxu3 }
 0x404   :  { %v1837_v56 = vsub.f32 %v3524_v37, %v1751_v39  ;;  %v3851_v57 = vadd.f32 %v1279_v60, %v1151_v42  ;;  %v1155_v37 = vpop.f32.mrf.mxu2  ;;  %v1029_v24 = vpop.f32.mrf.mxu1 }
 0x405   :  { %v2520_v52 = vpop.eup %2519  ;;  %v1544_v21 = vmul.f32 1.442695, %v3847_v20  ;;  %v1156_v11 = vadd.f32 %v1155_v37, %v1027_v8  ;;  %v1030_v29 = vadd.f32 %v3668_v46, %v1029_v24 }
 0x406   :  { %1885 = vst [vmem:[%s4181_s4 + $0x48] sm:$0xff] %v1837_v56  ;;  %v1341_v15 = vsel %vm1299_vm0, %v3851_v57, -inf  ;;  %v1613_v30 = vsel %vm1299_vm0, %v2520_v52, 0.0 }
 0x407   :  { %2523 = vpow2.f32 %v1544_v21  ;;  %1430 = vmax.xlane.f32.xlu2 %v1341_v15  ;;  %1686 = vadd.xlane.f32.xlu1 %v1613_v30 }
 0x409   :  { %v2522_v27 = vpop.eup %2521 }
 0x40a   :  { %v1753_v12 = vmul.f32 0.6931472, %v2522_v27  ;;  %v1659_v33 = vpop.xlane.xlu2 %1658  ;;  %v1403_v53 = vpop.xlane.xlu0 %1402 }
 0x40b   :  { %2525 = vlog2.f32 %v1659_v33  ;;  %v1282_v19 = vpop.f32.mrf.mxu3 }
 0x40c   :  { %v1838_v31 = vsub.f32 %v3560_v25, %v1753_v12  ;;  %v3863_v1 = vadd.f32 %v1282_v19, %v1154_v3  ;;  %v1158_v34 = vpop.f32.mrf.mxu2  ;;  %v1031_v56 = vpop.f32.mrf.mxu1  ;;  %v3888_v12 = vsub.f32 %v3604_v40, %v1403_v53 }
 0x40d   :  { %v2524_v32 = vpop.eup %2523  ;;  %v1159_v14 = vadd.f32 %v1158_v34, %v1030_v29  ;;  %v1032_v33 = vadd.f32 %v3668_v46, %v1031_v56 }
 0x40e   :  { %1886 = vst [vmem:[%s4181_s4 + $0x50] sm:$0xff] %v1838_v31  ;;  %v1614_v23 = vsel %vm1299_vm0, %v2524_v32, 0.0  ;;  %v1342_v10 = vsel %vm1299_vm0, %v3863_v1, -inf  ;;  %v1546_v32 = vmul.f32 1.442695, %v3888_v12 }
 0x40f   :  { %1688 = vadd.xlane.f32.xlu2 %v1614_v23  ;;  %1432 = vmax.xlane.f32.xlu0 %v1342_v10 }
 0x411   :  { %v2526_v25 = vpop.eup %2525 }
 0x412   :  { %v1755_v36 = vmul.f32 0.6931472, %v2526_v25  ;;  %v1405_v62 = vpop.xlane.xlu1 %1404  ;;  %v1661_v42 = vpop.xlane.xlu0 %1660 }
 0x413   :  { %2527 = vlog2.f32 %v1661_v42  ;;  %v1284_v39 = vpop.f32.mrf.mxu3 }
 0x414   :  { %v1839_v17 = vsub.f32 %v3576_v44, %v1755_v36  ;;  %v3876_v60 = vadd.f32 %v1284_v39, %v1156_v11  ;;  %v1160_v44 = vpop.f32.mrf.mxu2  ;;  %v3903_v11 = vsub.f32 %v3620_v22, %v1405_v62 }
 0x415   :  { %v1161_v24 = vadd.f32 %v1160_v44, %v1032_v33 }
 0x416   :  { %1887 = vst [vmem:[%s4181_s4 + $0x58] sm:$0xff] %v1839_v17  ;;  %v1343_v26 = vsel %vm1299_vm0, %v3876_v60, -inf  ;;  %v1548_v29 = vmul.f32 1.442695, %v3903_v11 }
 0x417   :  { %1434 = vmax.xlane.f32.xlu1 %v1343_v26 }
 0x419   :  { %v2528_v52 = vpop.eup %2527 }
 0x41a   :  { %v1757_v21 = vmul.f32 0.6931472, %v2528_v52  ;;  %v1407_v15 = vpop.xlane.xlu2 %1406  ;;  %v1663_v30 = vpop.xlane.xlu1 %1662 }
 0x41b   :  { %2529 = vlog2.f32 %v1663_v30  ;;  %v1287_v37 = vpop.f32.mrf.mxu3 }
 0x41c   :  { %v1840_v3 = vsub.f32 %v3600_v50, %v1757_v21  ;;  %v3885_v27 = vadd.f32 %v1287_v37, %v1159_v14  ;;  %v1034_v50 = vpop.f32.mrf.mxu1  ;;  %v1163_v36 = vpop.f32.mrf.mxu2 }
 0x41d   :  { %v1035_v25 = vadd.f32 %v3668_v46, %v1034_v50 }
 0x41e   :  { %1888 = vst [vmem:[%s4181_s4 + $0x60] sm:$0xff] %v1840_v3  ;;  %v1344_v19 = vsel %vm1299_vm0, %v3885_v27, -inf }
 0x41f   :  { %1436 = vmax.xlane.f32.xlu2 %v1344_v19  ;;  %v1164_v39 = vadd.f32 %v1163_v36, %v1035_v25 }
 0x421   :  { %v2530_v31 = vpop.eup %2529 }
 0x422   :  { %v1759_v8 = vmul.f32 0.6931472, %v2530_v31  ;;  %v1665_v23 = vpop.xlane.xlu2 %1664  ;;  %v1409_v40 = vpop.xlane.xlu0 %1408 }
 0x423   :  { %2531 = vlog2.f32 %v1665_v23  ;;  %v1289_v53 = vpop.f32.mrf.mxu3  ;;  %v3909_v42 = vsub.f32 %v3660_v45, %v1409_v40  ;;  %v3917_v45 = vsub.f32 %v3646_v49, %v1407_v15 }
 0x424   :  { %v1841_v10 = vsub.f32 %v3618_v58, %v1759_v8  ;;  %v3900_v34 = vadd.f32 %v1289_v53, %v1161_v24  ;;  %2533 = vpow2.f32 %v1546_v32  ;;  %v1036_v52 = vpop.f32.mrf.mxu1  ;;  %v1165_v15 = vpop.f32.mrf.mxu2 }
 0x425   :  { %v1552_v22 = vmul.f32 1.442695, %v3909_v42  ;;  %v1037_v3 = vadd.f32 %v3668_v46, %v1036_v52 }
 0x426   :  { %1889 = vst [vmem:[%s4181_s4 + $0x68] sm:$0xff] %v1841_v10  ;;  %v1345_v58 = vsel %vm1299_vm0, %v3900_v34, -inf }
 0x427   :  { %1438 = vmax.xlane.f32.xlu0 %v1345_v58  ;;  %v1166_v31 = vadd.f32 %v1165_v15, %v1037_v3 }
 0x429   :  { %v2532_v17 = vpop.eup %2531 }
 0x42a   :  { %v1761_v26 = vmul.f32 0.6931472, %v2532_v17  ;;  %v1411_v62 = vpop.xlane.xlu1 %1410  ;;  %v1667_v56 = vpop.xlane.xlu0 %1666 }
 0x42b   :  { %v2534_v14 = vpop.eup %2533  ;;  %2535 = vlog2.f32 %v1667_v56  ;;  %v1292_v21 = vpop.f32.mrf.mxu3  ;;  %v3923_v37 = vsub.f32 %v3685_v16, %v1411_v62  ;;  %v1550_v16 = vmul.f32 1.442695, %v3917_v45 }
 0x42c   :  { %v1842_v30 = vsub.f32 %v3640_v55, %v1761_v26  ;;  %v3920_v44 = vadd.f32 %v1292_v21, %v1164_v39  ;;  %2537 = vpow2.f32 %v1548_v29  ;;  %v1615_v55 = vsel %vm1299_vm0, %v2534_v14, 0.0 }
 0x42d   :  { %2539 = vpow2.f32 %v1552_v22  ;;  %v1554_v19 = vmul.f32 1.442695, %v3923_v37 }
 0x42e   :  { %1890 = vst [vmem:[%s4181_s4 + $0x70] sm:$0xff] %v1842_v30  ;;  %v1346_v49 = vsel %vm1299_vm0, %v3920_v44, -inf }
 0x42f   :  { %1440 = vmax.xlane.f32.xlu1 %v1346_v49  ;;  %1690 = vadd.xlane.f32.xlu0 %v1615_v55 }
 0x431   :  { %v2536_v33 = vpop.eup %2535 }
 0x432   :  { %v1763_v32 = vmul.f32 0.6931472, %v2536_v33  ;;  %v1413_v50 = vpop.xlane.xlu2 %1412  ;;  %v1669_v24 = vpop.xlane.xlu1 %1668 }
 0x433   :  { %v2538_v46 = vpop.eup %2537  ;;  %2541 = vlog2.f32 %v1669_v24  ;;  %v1294_v8 = vpop.f32.mrf.mxu3  ;;  %v3940_v10 = vsub.f32 %v3700_v0, %v1413_v50 }
 0x434   :  { %v2540_v23 = vpop.eup %2539  ;;  %2543 = vpow2.f32 %v1550_v16  ;;  %v1843_v40 = vsub.f32 %v3658_v43, %v1763_v32  ;;  %v3937_v53 = vadd.f32 %v1294_v8, %v1166_v31  ;;  %v1616_v36 = vsel %vm1299_vm0, %v2538_v46, 0.0 }
 0x435   :  { %2545 = vpow2.f32 %v1554_v19  ;;  %v1618_v43 = vsel %vm1299_vm0, %v2540_v23, 0.0  ;;  %v1556_v0 = vmul.f32 1.442695, %v3940_v10 }
 0x436   :  { %1891 = vst [vmem:[%s4181_s4 + $0x78] sm:$0xff] %v1843_v40  ;;  %v1347_v25 = vsel %vm1299_vm0, %v3937_v53, -inf }
 0x437   :  { %1442 = vmax.xlane.f32.xlu2 %v1347_v25  ;;  %1692 = vadd.xlane.f32.xlu1 %v1616_v36 }
 0x438   :  { %1696 = vadd.xlane.f32.xlu0 %v1618_v43 }
 0x439   :  { %v2542_v58 = vpop.eup %2541 }
 0x43a   :  { %v2544_v39 = vpop.eup %2543  ;;  %v1765_v17 = vmul.f32 0.6931472, %v2542_v58  ;;  %v1671_v29 = vpop.xlane.xlu2 %1670 }
 0x43b   :  { %v1415_v26 = vpop.xlane.xlu0 %1414  ;;  %v2546_v22 = vpop.eup %2545  ;;  %2547 = vlog2.f32 %v1671_v29  ;;  %v1617_v52 = vsel %vm1299_vm0, %v2544_v39, 0.0 }
 0x43c   :  { %v3954_v62 = vsub.f32 %v3720_v41, %v1415_v26  ;;  %v1844_v56 = vsub.f32 %v3679_v9, %v1765_v17  ;;  %2549 = vpow2.f32 %v1556_v0  ;;  %v1619_v21 = vsel %vm1299_vm0, %v2546_v22, 0.0 }
 0x43e   :  { %v1558_v14 = vmul.f32 1.442695, %v3954_v62  ;;  %1892 = vst [vmem:[%s4181_s4 + $0x80] sm:$0xff] %v1844_v56 }
 0x43f   :  { %1694 = vadd.xlane.f32.xlu2 %v1617_v52  ;;  %1698 = vadd.xlane.f32.xlu1 %v1619_v21 }
 0x440   :  { %2551 = vpow2.f32 %v1558_v14 }
 0x441   :  { %v2548_v41 = vpop.eup %2547 }
 0x442   :  { %v1767_v30 = vmul.f32 0.6931472, %v2548_v41  ;;  %v1417_v3 = vpop.xlane.xlu1 %1416  ;;  %v2550_v49 = vpop.eup %2549 }
 0x443   :  { %v1673_v9 = vpop.xlane.xlu0 %1672  ;;  %v3966_v55 = vsub.f32 %v3736_v38, %v1417_v3  ;;  %v1620_v19 = vsel %vm1299_vm0, %v2550_v49, 0.0 }
 0x444   :  { %2553 = vlog2.f32 %v1673_v9  ;;  %v1845_v15 = vsub.f32 %v3697_v4, %v1767_v30 }
 0x445   :  { %v1560_v33 = vmul.f32 1.442695, %v3966_v55 }
 0x446   :  { %v2552_v16 = vpop.eup %2551  ;;  %1893 = vst [vmem:[%s4181_s4 + $0x88] sm:$0xff] %v1845_v15 }
 0x447   :  { %v1621_v31 = vsel %vm1299_vm0, %v2552_v16, 0.0  ;;  %2555 = vpow2.f32 %v1560_v33  ;;  %1700 = vadd.xlane.f32.xlu2 %v1620_v19 }
 0x448   :  { %1702 = vadd.xlane.f32.xlu0 %v1621_v31 }
 0x44a   :  { %v2554_v38 = vpop.eup %2553  ;;  %v1419_v50 = vpop.xlane.xlu2 %1418 }
 0x44b   :  { %v1769_v32 = vmul.f32 0.6931472, %v2554_v38  ;;  %v1675_v4 = vpop.xlane.xlu1 %1674  ;;  %v3978_v24 = vsub.f32 %v3755_v28, %v1419_v50 }
 0x44c   :  { %2557 = vlog2.f32 %v1675_v4 }
 0x44d   :  { %v1846_v46 = vsub.f32 %v3715_v5, %v1769_v32  ;;  %v2556_v8 = vpop.eup %2555  ;;  %v1562_v23 = vmul.f32 1.442695, %v3978_v24 }
 0x44e   :  { %v1622_v40 = vsel %vm1299_vm0, %v2556_v8, 0.0 }
 0x44f   :  { %1894 = vst [vmem:[%s4181_s4 + $0x90] sm:$0xff] %v1846_v46  ;;  %2559 = vpow2.f32 %v1562_v23  ;;  %1704 = vadd.xlane.f32.xlu1 %v1622_v40 }
 0x452   :  { %v2558_v25 = vpop.eup %2557  ;;  %v1677_v43 = vpop.xlane.xlu2 %1676 }
 0x453   :  { %v1771_v36 = vmul.f32 0.6931472, %v2558_v25  ;;  %v1421_v28 = vpop.xlane.xlu0 %1420  ;;  %2561 = vlog2.f32 %v1677_v43 }
 0x454   :  { %v3988_v58 = vsub.f32 %v3770_v35, %v1421_v28 }
 0x455   :  { %v1847_v5 = vsub.f32 %v3733_v48, %v1771_v36  ;;  %v2560_v0 = vpop.eup %2559 }
 0x456   :  { %v1564_v39 = vmul.f32 1.442695, %v3988_v58  ;;  %v1623_v17 = vsel %vm1299_vm0, %v2560_v0, 0.0 }
 0x457   :  { %1895 = vst [vmem:[%s4181_s4 + $0x98] sm:$0xff] %v1847_v5  ;;  %1706 = vadd.xlane.f32.xlu2 %v1623_v17 }
 0x458   :  { %2563 = vpow2.f32 %v1564_v39 }
 0x459   :  { %v2562_v29 = vpop.eup %2561 }
 0x45a   :  { %v1773_v26 = vmul.f32 0.6931472, %v2562_v29  ;;  %v1423_v22 = vpop.xlane.xlu1 %1422 }
 0x45b   :  { %v1679_v56 = vpop.xlane.xlu0 %1678  ;;  %v3998_v35 = vsub.f32 %v3787_v13, %v1423_v22 }
 0x45c   :  { %2565 = vlog2.f32 %v1679_v56  ;;  %v1848_v48 = vsub.f32 %v3751_v54, %v1773_v26 }
 0x45d   :  { %v1566_v52 = vmul.f32 1.442695, %v3998_v35 }
 0x45e   :  { %v2564_v14 = vpop.eup %2563  ;;  %1896 = vst [vmem:[%s4181_s4 + $0xa0] sm:$0xff] %v1848_v48 }
 0x45f   :  { %v1624_v21 = vsel %vm1299_vm0, %v2564_v14, 0.0  ;;  %2567 = vpow2.f32 %v1566_v52 }
 0x460   :  { %1708 = vadd.xlane.f32.xlu0 %v1624_v21 }
 0x462   :  { %v2566_v41 = vpop.eup %2565  ;;  %v1425_v3 = vpop.xlane.xlu2 %1424 }
 0x463   :  { %v1775_v30 = vmul.f32 0.6931472, %v2566_v41  ;;  %v1681_v13 = vpop.xlane.xlu1 %1680  ;;  %v4008_v9 = vsub.f32 %v3802_v61, %v1425_v3 }
 0x464   :  { %2569 = vlog2.f32 %v1681_v13 }
 0x465   :  { %v1849_v54 = vsub.f32 %v3767_v63, %v1775_v30  ;;  %v2568_v49 = vpop.eup %2567  ;;  %v1568_v15 = vmul.f32 1.442695, %v4008_v9 }
 0x466   :  { %v1625_v16 = vsel %vm1299_vm0, %v2568_v49, 0.0 }
 0x467   :  { %1897 = vst [vmem:[%s4181_s4 + $0xa8] sm:$0xff] %v1849_v54  ;;  %2571 = vpow2.f32 %v1568_v15  ;;  %1710 = vadd.xlane.f32.xlu1 %v1625_v16 }
 0x46a   :  { %v2570_v33 = vpop.eup %2569  ;;  %v1683_v31 = vpop.xlane.xlu2 %1682 }
 0x46b   :  { %v1777_v19 = vmul.f32 0.6931472, %v2570_v33  ;;  %v1427_v61 = vpop.xlane.xlu0 %1426  ;;  %2573 = vlog2.f32 %v1683_v31 }
 0x46c   :  { %v4018_v38 = vsub.f32 %v3819_v47, %v1427_v61 }
 0x46d   :  { %v1850_v63 = vsub.f32 %v3783_v2, %v1777_v19  ;;  %v2572_v32 = vpop.eup %2571 }
 0x46e   :  { %v1570_v50 = vmul.f32 1.442695, %v4018_v38  ;;  %v1626_v4 = vsel %vm1299_vm0, %v2572_v32, 0.0 }
 0x46f   :  { %1898 = vst [vmem:[%s4181_s4 + $0xb0] sm:$0xff] %v1850_v63  ;;  %1712 = vadd.xlane.f32.xlu2 %v1626_v4 }
 0x470   :  { %2575 = vpow2.f32 %v1570_v50 }
 0x471   :  { %v2574_v46 = vpop.eup %2573 }
 0x472   :  { %v1779_v8 = vmul.f32 0.6931472, %v2574_v46  ;;  %v1429_v23 = vpop.xlane.xlu1 %1428 }
 0x473   :  { %v1685_v40 = vpop.xlane.xlu0 %1684  ;;  %v4028_v47 = vsub.f32 %v3834_v6, %v1429_v23 }
 0x474   :  { %2577 = vlog2.f32 %v1685_v40  ;;  %v1851_v2 = vsub.f32 %v3799_v7, %v1779_v8 }
 0x475   :  { %v1572_v36 = vmul.f32 1.442695, %v4028_v47 }
 0x476   :  { %v2576_v25 = vpop.eup %2575  ;;  %1899 = vst [vmem:[%s4181_s4 + $0xb8] sm:$0xff] %v1851_v2 }
 0x477   :  { %v1627_v43 = vsel %vm1299_vm0, %v2576_v25, 0.0  ;;  %2579 = vpow2.f32 %v1572_v36 }
 0x478   :  { %1714 = vadd.xlane.f32.xlu0 %v1627_v43 }
 0x47a   :  { %v2578_v28 = vpop.eup %2577  ;;  %v1431_v0 = vpop.xlane.xlu2 %1430 }
 0x47b   :  { %v1781_v5 = vmul.f32 0.6931472, %v2578_v28  ;;  %v1687_v6 = vpop.xlane.xlu1 %1686  ;;  %v4038_v39 = vsub.f32 %v3851_v57, %v1431_v0 }
 0x47c   :  { %2581 = vlog2.f32 %v1687_v6 }
 0x47d   :  { %v1852_v7 = vsub.f32 %v3815_v59, %v1781_v5  ;;  %v2580_v17 = vpop.eup %2579  ;;  %v1574_v29 = vmul.f32 1.442695, %v4038_v39 }
 0x47e   :  { %v1628_v26 = vsel %vm1299_vm0, %v2580_v17, 0.0 }
 0x47f   :  { %1900 = vst [vmem:[%s4181_s4 + $0xc0] sm:$0xff] %v1852_v7  ;;  %2583 = vpow2.f32 %v1574_v29  ;;  %1716 = vadd.xlane.f32.xlu1 %v1628_v26 }
 0x482   :  { %v2582_v22 = vpop.eup %2581  ;;  %v1689_v48 = vpop.xlane.xlu2 %1688 }
 0x483   :  { %v1783_v56 = vmul.f32 0.6931472, %v2582_v22  ;;  %v1433_v57 = vpop.xlane.xlu0 %1432  ;;  %2585 = vlog2.f32 %v1689_v48 }
 0x484   :  { %v4048_v14 = vsub.f32 %v3863_v1, %v1433_v57 }
 0x485   :  { %v1853_v59 = vsub.f32 %v3831_v51, %v1783_v56  ;;  %v2584_v52 = vpop.eup %2583 }
 0x486   :  { %v1576_v21 = vmul.f32 1.442695, %v4048_v14  ;;  %v1629_v41 = vsel %vm1299_vm0, %v2584_v52, 0.0 }
 0x487   :  { %1901 = vst [vmem:[%s4181_s4 + $0xc8] sm:$0xff] %v1853_v59  ;;  %1718 = vadd.xlane.f32.xlu2 %v1629_v41 }
 0x488   :  { %2587 = vpow2.f32 %v1576_v21 }
 0x489   :  { %v2586_v30 = vpop.eup %2585 }
 0x48a   :  { %v1785_v3 = vmul.f32 0.6931472, %v2586_v30  ;;  %v1435_v13 = vpop.xlane.xlu1 %1434 }
 0x48b   :  { %v4058_v1 = vsub.f32 %v3876_v60, %v1435_v13 }
 0x48c   :  { %v1854_v51 = vsub.f32 %v3847_v20, %v1785_v3 }
 0x48d   :  { %v1578_v49 = vmul.f32 1.442695, %v4058_v1 }
 0x48e   :  { %v2588_v54 = vpop.eup %2587  ;;  %1902 = vst [vmem:[%s4181_s4 + $0xd0] sm:$0xff] %v1854_v51 }
 0x48f   :  { %v1630_v15 = vsel %vm1299_vm0, %v2588_v54, 0.0  ;;  %2589 = vpow2.f32 %v1578_v49 }
 0x490   :  { %1720 = vadd.xlane.f32.xlu0 %v1630_v15 }
 0x492   :  { %v1437_v16 = vpop.xlane.xlu2 %1436 }
 0x493   :  { %v4068_v33 = vsub.f32 %v3885_v27, %v1437_v16 }
 0x495   :  { %v2590_v60 = vpop.eup %2589  ;;  %v1580_v19 = vmul.f32 1.442695, %v4068_v33 }
 0x496   :  { %v1631_v20 = vsel %vm1299_vm0, %v2590_v60, 0.0 }
 0x497   :  { %2591 = vpow2.f32 %v1580_v19  ;;  %1722 = vadd.xlane.f32.xlu1 %v1631_v20 }
 0x49a   :  { %v1439_v31 = vpop.xlane.xlu0 %1438 }
 0x49b   :  { %v4074_v61 = vsub.f32 %v3900_v34, %v1439_v31 }
 0x49d   :  { %v2592_v63 = vpop.eup %2591  ;;  %v1582_v32 = vmul.f32 1.442695, %v4074_v61 }
 0x49e   :  { %v1632_v50 = vsel %vm1299_vm0, %v2592_v63, 0.0 }
 0x49f   :  { %2593 = vpow2.f32 %v1582_v32  ;;  %1724 = vadd.xlane.f32.xlu2 %v1632_v50 }
 0x4a2   :  { %v1441_v27 = vpop.xlane.xlu1 %1440  ;;  %v1691_v4 = vpop.xlane.xlu0 %1690 }
 0x4a3   :  { %v4080_v46 = vsub.f32 %v3920_v44, %v1441_v27  ;;  %2595 = vlog2.f32 %v1691_v4 }
 0x4a5   :  { %v2594_v8 = vpop.eup %2593  ;;  %v1584_v23 = vmul.f32 1.442695, %v4080_v46 }
 0x4a6   :  { %v1633_v34 = vsel %vm1299_vm0, %v2594_v8, 0.0 }
 0x4a7   :  { %2597 = vpow2.f32 %v1584_v23  ;;  %1726 = vadd.xlane.f32.xlu0 %v1633_v34 }
 0x4a9   :  { %v2596_v40 = vpop.eup %2595 }
 0x4aa   :  { %v1787_v2 = vmul.f32 0.6931472, %v2596_v40  ;;  %v1443_v25 = vpop.xlane.xlu2 %1442  ;;  %v1693_v36 = vpop.xlane.xlu1 %1692 }
 0x4ab   :  { %v4086_v43 = vsub.f32 %v3937_v53, %v1443_v25  ;;  %2599 = vlog2.f32 %v1693_v36  ;;  %v1697_v28 = vpop.xlane.xlu0 %1696 }
 0x4ac   :  { %v1855_v44 = vsub.f32 %v3888_v12, %v1787_v2  ;;  %2601 = vlog2.f32 %v1697_v28 }
 0x4ad   :  { %v2598_v5 = vpop.eup %2597  ;;  %v1586_v0 = vmul.f32 1.442695, %v4086_v43 }
 0x4ae   :  { %1903 = vst [vmem:[%s4181_s4 + $0xd8] sm:$0xff] %v1855_v44  ;;  %v1634_v6 = vsel %vm1299_vm0, %v2598_v5, 0.0 }
 0x4af   :  { %2603 = vpow2.f32 %v1586_v0  ;;  %1728 = vadd.xlane.f32.xlu1 %v1634_v6 }
 0x4b1   :  { %v2600_v7 = vpop.eup %2599 }
 0x4b2   :  { %v2602_v53 = vpop.eup %2601  ;;  %v1789_v17 = vmul.f32 0.6931472, %v2600_v7  ;;  %v1695_v29 = vpop.xlane.xlu2 %1694 }
 0x4b3   :  { %v1699_v26 = vpop.xlane.xlu1 %1698  ;;  %v1793_v22 = vmul.f32 0.6931472, %v2602_v53  ;;  %2605 = vlog2.f32 %v1695_v29 }
 0x4b4   :  { %v1856_v12 = vsub.f32 %v3903_v11, %v1789_v17  ;;  %2607 = vlog2.f32 %v1699_v26 }
 0x4b5   :  { %v2604_v56 = vpop.eup %2603  ;;  %v1858_v48 = vsub.f32 %v3909_v42, %v1793_v22 }
 0x4b6   :  { %1904 = vst [vmem:[%s4181_s4 + $0xe0] sm:$0xff] %v1856_v12  ;;  %v1635_v57 = vsel %vm1299_vm0, %v2604_v56, 0.0 }
 0x4b7   :  { %1906 = vst [vmem:[%s4181_s4 + $0xf0] sm:$0xff] %v1858_v48  ;;  %1730 = vadd.xlane.f32.xlu2 %v1635_v57 }
 0x4b9   :  { %v2606_v59 = vpop.eup %2605 }
 0x4ba   :  { %v2608_v52 = vpop.eup %2607  ;;  %v1791_v21 = vmul.f32 0.6931472, %v2606_v59  ;;  %v1701_v11 = vpop.xlane.xlu2 %1700 }
 0x4bb   :  { %v1703_v41 = vpop.xlane.xlu0 %1702  ;;  %v1795_v30 = vmul.f32 0.6931472, %v2608_v52  ;;  %2609 = vlog2.f32 %v1701_v11 }
 0x4bc   :  { %v1857_v42 = vsub.f32 %v3917_v45, %v1791_v21  ;;  %2611 = vlog2.f32 %v1703_v41 }
 0x4bd   :  { %v1859_v3 = vsub.f32 %v3923_v37, %v1795_v30 }
 0x4be   :  { %1905 = vst [vmem:[%s4181_s4 + $0xe8] sm:$0xff] %v1857_v42 }
 0x4bf   :  { %1907 = vst [vmem:[%s4181_s4 + $0xf8] sm:$0xff] %v1859_v3 }
 0x4c1   :  { %v2610_v18 = vpop.eup %2609 }
 0x4c2   :  { %v2612_v13 = vpop.eup %2611  ;;  %v1797_v51 = vmul.f32 0.6931472, %v2610_v18  ;;  %v1705_v54 = vpop.xlane.xlu1 %1704 }
 0x4c3   :  { %v1799_v49 = vmul.f32 0.6931472, %v2612_v13  ;;  %2613 = vlog2.f32 %v1705_v54 }
 0x4c4   :  { %v1860_v15 = vsub.f32 %v3940_v10, %v1797_v51 }
 0x4c5   :  { %v1861_v45 = vsub.f32 %v3954_v62, %v1799_v49 }
 0x4c6   :  { %1908 = vst [vmem:[%s4181_s4 + $0x100] sm:$0xff] %v1860_v15 }
 0x4c7   :  { %1909 = vst [vmem:[%s4181_s4 + $0x108] sm:$0xff] %v1861_v45 }
 0x4c9   :  { %v2614_v37 = vpop.eup %2613 }
 0x4ca   :  { %v1801_v16 = vmul.f32 0.6931472, %v2614_v37  ;;  %v1707_v60 = vpop.xlane.xlu2 %1706 }
 0x4cb   :  { %2615 = vlog2.f32 %v1707_v60 }
 0x4cc   :  { %v1862_v19 = vsub.f32 %v3966_v55, %v1801_v16 }
 0x4ce   :  { %1910 = vst [vmem:[%s4181_s4 + $0x110] sm:$0xff] %v1862_v19 }
 0x4d1   :  { %v2616_v10 = vpop.eup %2615 }
 0x4d2   :  { %v1803_v62 = vmul.f32 0.6931472, %v2616_v10 }
 0x4d3   :  { %v1709_v20 = vpop.xlane.xlu0 %1708 }
 0x4d4   :  { %2617 = vlog2.f32 %v1709_v20  ;;  %v1863_v31 = vsub.f32 %v3978_v24, %v1803_v62 }
 0x4d6   :  { %1911 = vst [vmem:[%s4181_s4 + $0x118] sm:$0xff] %v1863_v31 }
 0x4da   :  { %v2618_v63 = vpop.eup %2617  ;;  %v1711_v50 = vpop.xlane.xlu1 %1710 }
 0x4db   :  { %v1805_v32 = vmul.f32 0.6931472, %v2618_v63  ;;  %2619 = vlog2.f32 %v1711_v50 }
 0x4dd   :  { %v1864_v55 = vsub.f32 %v3988_v58, %v1805_v32 }
 0x4df   :  { %1912 = vst [vmem:[%s4181_s4 + $0x120] sm:$0xff] %v1864_v55 }
 0x4e1   :  { %v2620_v27 = vpop.eup %2619 }
 0x4e2   :  { %v1807_v4 = vmul.f32 0.6931472, %v2620_v27  ;;  %v1713_v8 = vpop.xlane.xlu2 %1712 }
 0x4e3   :  { %2621 = vlog2.f32 %v1713_v8 }
 0x4e4   :  { %v1865_v24 = vsub.f32 %v3998_v35, %v1807_v4 }
 0x4e6   :  { %1913 = vst [vmem:[%s4181_s4 + $0x128] sm:$0xff] %v1865_v24 }
 0x4e9   :  { %v2622_v23 = vpop.eup %2621 }
 0x4ea   :  { %v1809_v34 = vmul.f32 0.6931472, %v2622_v23 }
 0x4eb   :  { %v1715_v40 = vpop.xlane.xlu0 %1714 }
 0x4ec   :  { %2623 = vlog2.f32 %v1715_v40  ;;  %v1866_v58 = vsub.f32 %v4008_v9, %v1809_v34 }
 0x4ee   :  { %1914 = vst [vmem:[%s4181_s4 + $0x130] sm:$0xff] %v1866_v58 }
 0x4f2   :  { %v2624_v2 = vpop.eup %2623  ;;  %v1717_v36 = vpop.xlane.xlu1 %1716 }
 0x4f3   :  { %v1811_v25 = vmul.f32 0.6931472, %v2624_v2  ;;  %2625 = vlog2.f32 %v1717_v36 }
 0x4f5   :  { %v1867_v35 = vsub.f32 %v4018_v38, %v1811_v25 }
 0x4f7   :  { %1915 = vst [vmem:[%s4181_s4 + $0x138] sm:$0xff] %v1867_v35 }
 0x4f9   :  { %v2626_v28 = vpop.eup %2625 }
 0x4fa   :  { %v1813_v44 = vmul.f32 0.6931472, %v2626_v28  ;;  %v1719_v5 = vpop.xlane.xlu2 %1718 }
 0x4fb   :  { %2627 = vlog2.f32 %v1719_v5 }
 0x4fc   :  { %v1868_v9 = vsub.f32 %v4028_v47, %v1813_v44 }
 0x4fe   :  { %1916 = vst [vmem:[%s4181_s4 + $0x140] sm:$0xff] %v1868_v9 }
 0x501   :  { %v2628_v0 = vpop.eup %2627 }
 0x502   :  { %v1815_v6 = vmul.f32 0.6931472, %v2628_v0 }
 0x503   :  { %v1721_v7 = vpop.xlane.xlu0 %1720 }
 0x504   :  { %2629 = vlog2.f32 %v1721_v7  ;;  %v1869_v38 = vsub.f32 %v4038_v39, %v1815_v6 }
 0x506   :  { %1917 = vst [vmem:[%s4181_s4 + $0x148] sm:$0xff] %v1869_v38 }
 0x50a   :  { %v2630_v53 = vpop.eup %2629  ;;  %v1723_v29 = vpop.xlane.xlu1 %1722 }
 0x50b   :  { %v1817_v17 = vmul.f32 0.6931472, %v2630_v53  ;;  %2631 = vlog2.f32 %v1723_v29 }
 0x50d   :  { %v1870_v47 = vsub.f32 %v4048_v14, %v1817_v17 }
 0x50f   :  { %1918 = vst [vmem:[%s4181_s4 + $0x150] sm:$0xff] %v1870_v47 }
 0x511   :  { %v2632_v26 = vpop.eup %2631 }
 0x512   :  { %v1819_v22 = vmul.f32 0.6931472, %v2632_v26  ;;  %v1725_v12 = vpop.xlane.xlu2 %1724 }
 0x513   :  { %2633 = vlog2.f32 %v1725_v12 }
 0x514   :  { %v1871_v39 = vsub.f32 %v4058_v1, %v1819_v22 }
 0x516   :  { %1919 = vst [vmem:[%s4181_s4 + $0x158] sm:$0xff] %v1871_v39 }
 0x519   :  { %v2634_v56 = vpop.eup %2633 }
 0x51a   :  { %v1821_v48 = vmul.f32 0.6931472, %v2634_v56  ;;  %v1727_v57 = vpop.xlane.xlu0 %1726 }
 0x51b   :  { %2635 = vlog2.f32 %v1727_v57 }
 0x51c   :  { %v1872_v14 = vsub.f32 %v4068_v33, %v1821_v48 }
 0x51e   :  { %1920 = vst [vmem:[%s4181_s4 + $0x160] sm:$0xff] %v1872_v14 }
 0x521   :  { %v2636_v59 = vpop.eup %2635 }
 0x522   :  { %v1823_v52 = vmul.f32 0.6931472, %v2636_v59  ;;  %v1729_v21 = vpop.xlane.xlu1 %1728 }
 0x523   :  { %2637 = vlog2.f32 %v1729_v21 }
 0x524   :  { %v1873_v1 = vsub.f32 %v4074_v61, %v1823_v52 }
 0x526   :  { %1921 = vst [vmem:[%s4181_s4 + $0x168] sm:$0xff] %v1873_v1 }
 0x529   :  { %v2638_v11 = vpop.eup %2637 }
 0x52a   :  { %v1825_v41 = vmul.f32 0.6931472, %v2638_v11  ;;  %v1731_v30 = vpop.xlane.xlu2 %1730 }
 0x52b   :  { %2639 = vlog2.f32 %v1731_v30 }
 0x52c   :  { %v1874_v33 = vsub.f32 %v4080_v46, %v1825_v41 }
 0x52e   :  { %1922 = vst [vmem:[%s4181_s4 + $0x170] sm:$0xff] %v1874_v33 }
 0x531   :  { %v2640_v42 = vpop.eup %2639 }
 0x532   :  { %v1827_v3 = vmul.f32 0.6931472, %v2640_v42 }
 0x534   :  { %v1875_v18 = vsub.f32 %v4086_v43, %v1827_v3 }
 0x536   :  { %1923 = vst [vmem:[%s4181_s4 + $0x178] sm:$0xff] %v1875_v18 }

// kernel: gcn_forward.2
= control target key start
LH: loop header
LB: loop body
LE: loop exit
PB: predicated region body
PF: predicated region fallthrough
CT: control target
= control target key end

     0   :  { %s2941_s2 = inlined_call_operand.vmem [shape: bf16[128,128], index: 2, kind: input, shape index: {}]   ;;  %s2942_s1 = inlined_call_operand.vmem [shape: bf16[384,128], index: 1, kind: input, shape index: {}]   ;;  %s2943_s0 = inlined_call_operand.vmem [shape: bf16[384,384], index: 0, kind: input, shape index: {}]   ;;  %s2944_s3 = inlined_call_operand.vmem [shape: f32[1,128], index: 3, kind: input, shape index: {}]   ;;  %s2945_s4 = inlined_call_operand.vmem [shape: bf16[384,128], index: 4, kind: output, shape index: {}]  }
   0x1   :  { %v1892_v0 = vld [vmem:[%s2941_s2 + $0x38] sm:$0xff]  ;;  %v1891_v1 = vld [vmem:[%s2941_s2 + $0x30] sm:$0xff]  ;;  %v1890_v2 = vld [vmem:[%s2941_s2 + $0x28] sm:$0xff] }
   0x2   :  { %273 = vmatpush.bf16.msra.mxu0 %v1892_v0  ;;  %v1889_v3 = vld [vmem:[%s2941_s2 + $0x20] sm:$0xff]  ;;  %v1888_v4 = vld [vmem:[%s2941_s2 + $0x18] sm:$0xff]  ;;  %v1887_v5 = vld [vmem:[%s2941_s2 + $0x10] sm:$0xff] }
   0x3   :  { %v1886_v6 = vld [vmem:[%s2941_s2 + $0x8] sm:$0xff]  ;;  %v1885_v7 = vld [vmem:[%s2941_s2] sm:$0xff]  ;;  %v1863_v10 = vld [vmem:[%s2942_s1 + $0x10] sm:$0xff] }
   0x4   :  { %v1861_v8 = vld [vmem:[%s2942_s1] sm:$0xff]  ;;  %v1862_v9 = vld [vmem:[%s2942_s1 + $0x8] sm:$0xff]  ;;  %v1864_v11 = vld [vmem:[%s2942_s1 + $0x18] sm:$0xff] }
   0x5   :  { %v1865_v12 = vld [vmem:[%s2942_s1 + $0x20] sm:$0xff]  ;;  %v1866_v13 = vld [vmem:[%s2942_s1 + $0x28] sm:$0xff]  ;;  %v1867_v14 = vld [vmem:[%s2942_s1 + $0x30] sm:$0xff] }
   0x6   :  { %274 = vmatpush.bf16.msra.mxu0 %v1891_v1  ;;  %v1868_v15 = vld [vmem:[%s2942_s1 + $0x38] sm:$0xff]  ;;  %v1869_v16 = vld [vmem:[%s2942_s1 + $0x40] sm:$0xff]  ;;  %v1870_v20 = vld [vmem:[%s2942_s1 + $0x48] sm:$0xff] }
   0x7   :  { %v1871_v24 = vld [vmem:[%s2942_s1 + $0x50] sm:$0xff]  ;;  %v1872_v28 = vld [vmem:[%s2942_s1 + $0x58] sm:$0xff]  ;;  %v1873_v32 = vld [vmem:[%s2942_s1 + $0x60] sm:$0xff] }
   0x8   :  { %v1874_v35 = vld [vmem:[%s2942_s1 + $0x68] sm:$0xff]  ;;  %v1875_v38 = vld [vmem:[%s2942_s1 + $0x70] sm:$0xff]  ;;  %v1876_v41 = vld [vmem:[%s2942_s1 + $0x78] sm:$0xff] }
   0x9   :  { %v1877_v46 = vld [vmem:[%s2942_s1 + $0x80] sm:$0xff]  ;;  %v1878_v52 = vld [vmem:[%s2942_s1 + $0x88] sm:$0xff]  ;;  %v1879_v56 = vld [vmem:[%s2942_s1 + $0x90] sm:$0xff] }
   0xa   :  { %275 = vmatpush.bf16.msra.mxu0 %v1890_v2  ;;  %v1880_v60 = vld [vmem:[%s2942_s1 + $0x98] sm:$0xff]  ;;  %v1881_v0 = vld [vmem:[%s2942_s1 + $0xa0] sm:$0xff] }
   0xe   :  { %276 = vmatpush.bf16.msra.mxu0 %v1889_v3  ;;  %v1882_v3 = vld [vmem:[%s2942_s1 + $0xa8] sm:$0xff] }
  0x12   :  { %277 = vmatpush.bf16.msra.mxu0 %v1888_v4 }
  0x16   :  { %278 = vmatpush.bf16.msra.mxu0 %v1887_v5 }
  0x1a   :  { %279 = vmatpush.bf16.msra.mxu0 %v1886_v6  ;;  %v1883_v6 = vld [vmem:[%s2942_s1 + $0xb0] sm:$0xff] }
  0x1e   :  { %280 = vmatpush.bf16.msra.mxu0 %v1885_v7 }
  0x21   :  { %281 = vmatmul.bf16.vlgmr.msra.gmra.mxu0 %v1861_v8 }
  0x31   :  { %286 = vmatmul.bf16.gmra.mxu0 %v1862_v9  ;;  %v1884_v9 = vld [vmem:[%s2942_s1 + $0xb8] sm:$0xff] }
  0x41   :  { %291 = vmatmul.bf16.gmra.mxu0 %v1863_v10 }
  0x51   :  { %296 = vmatmul.bf16.gmra.mxu0 %v1864_v11 }
  0x61   :  { %301 = vmatmul.bf16.gmra.mxu0 %v1865_v12 }
  0x71   :  { %306 = vmatmul.bf16.gmra.mxu0 %v1866_v13 }
  0x81   :  { %311 = vmatmul.bf16.gmra.mxu0 %v1867_v14 }
  0x91   :  { %316 = vmatmul.bf16.gmra.mxu0 %v1868_v15 }
  0x9e   :  { %v282_v17 = vpop.f32.mrf.mxu0 }
  0xa1   :  { %321 = vmatmul.bf16.gmra.mxu0 %v1869_v16 }
  0xa6   :  { %v284_v18 = vpop.f32.mrf.mxu0 }
  0xa7   :  { %v498_v19 = vpack.c.bf16 %v284_v18, %v282_v17 }
  0xae   :  { %v287_v21 = vpop.f32.mrf.mxu0 }
  0xb1   :  { %326 = vmatmul.bf16.gmra.mxu0 %v1870_v20 }
  0xb6   :  { %v289_v22 = vpop.f32.mrf.mxu0 }
  0xb7   :  { %v499_v23 = vpack.c.bf16 %v289_v22, %v287_v21 }
  0xbe   :  { %v292_v25 = vpop.f32.mrf.mxu0 }
  0xc1   :  { %331 = vmatmul.bf16.gmra.mxu0 %v1871_v24 }
  0xc6   :  { %v294_v26 = vpop.f32.mrf.mxu0 }
  0xc7   :  { %v500_v27 = vpack.c.bf16 %v294_v26, %v292_v25 }
  0xce   :  { %v297_v29 = vpop.f32.mrf.mxu0 }
  0xd1   :  { %336 = vmatmul.bf16.gmra.mxu0 %v1872_v28 }
  0xd6   :  { %v299_v30 = vpop.f32.mrf.mxu0 }
  0xd7   :  { %v501_v31 = vpack.c.bf16 %v299_v30, %v297_v29 }
  0xde   :  { %v302_v33 = vpop.f32.mrf.mxu0 }
  0xe1   :  { %341 = vmatmul.bf16.gmra.mxu0 %v1873_v32 }
  0xe6   :  { %v304_v34 = vpop.f32.mrf.mxu0 }
  0xe7   :  { %v502_v49 = vpack.c.bf16 %v304_v34, %v302_v33  ;;  %v1893_v34 = vld [vmem:[%s2943_s0 + $0x4] sm:$0xf] }
  0xee   :  { %v307_v36 = vpop.f32.mrf.mxu0 }
  0xf1   :  { %346 = vmatmul.bf16.gmra.mxu0 %v1874_v35  ;;  %v1577_v35 = vld [vmem:[%s2943_s0 + $0xc] sm:$0xf0] }
  0xf6   :  { %v309_v37 = vpop.f32.mrf.mxu0 }
  0xf7   :  { %v503_v48 = vpack.c.bf16 %v309_v37, %v307_v36  ;;  %v1580_v36 = vor.u32 %v1893_v34, %v1577_v35  ;;  %v1661_v34 = vld [vmem:[%s2943_s0 + $0xb4] sm:$0xf0] }
  0xfe   :  { %v312_v39 = vpop.f32.mrf.mxu0 }
 0x101   :  { %351 = vmatmul.bf16.gmra.mxu0 %v1875_v38  ;;  %v1575_v38 = vld [vmem:[%s2943_s0] sm:$0xf] }
 0x106   :  { %v314_v40 = vpop.f32.mrf.mxu0 }
 0x107   :  { %v504_v45 = vpack.c.bf16 %v314_v40, %v312_v39  ;;  %v1894_v39 = vld [vmem:[%s2943_s0 + $0x8] sm:$0xf0] }
 0x108   :  { %v1576_v40 = vor.u32 %v1894_v39, %v1575_v38  ;;  %v1643_v39 = vld [vmem:[%s2943_s0 + $0x80] sm:$0xf] }
 0x10e   :  { %v317_v42 = vpop.f32.mrf.mxu0 }
 0x111   :  { %356 = vmatmul.bf16.gmra.mxu0 %v1876_v41 }
 0x116   :  { %v319_v43 = vpop.f32.mrf.mxu0 }
 0x117   :  { %v505_v44 = vpack.c.bf16 %v319_v43, %v317_v42  ;;  %v1896_v43 = vld [vmem:[%s2943_s0 + $0x1c] sm:$0xf] }
 0x119   :  { %910 = vmatpush.bf16.msra.mxu1 %v505_v44  ;;  %v1589_v44 = vld [vmem:[%s2943_s0 + $0x24] sm:$0xf0] }
 0x11d   :  { %911 = vmatpush.bf16.msra.mxu1 %v504_v45  ;;  %v1592_v45 = vor.u32 %v1896_v43, %v1589_v44  ;;  %v1673_v43 = vld [vmem:[%s2943_s0 + $0xcc] sm:$0xf0] }
 0x11e   :  { %v322_v47 = vpop.f32.mrf.mxu0 }
 0x121   :  { %361 = vmatmul.bf16.gmra.mxu0 %v1877_v46  ;;  %912 = vmatpush.bf16.msra.mxu1 %v503_v48  ;;  %v1897_v48 = vld [vmem:[%s2943_s0 + $0x20] sm:$0xf0] }
 0x125   :  { %913 = vmatpush.bf16.msra.mxu1 %v502_v49 }
 0x126   :  { %v324_v50 = vpop.f32.mrf.mxu0 }
 0x127   :  { %v506_v51 = vpack.c.bf16 %v324_v50, %v322_v47  ;;  %v1587_v47 = vld [vmem:[%s2943_s0 + $0x18] sm:$0xf] }
 0x128   :  { %v1588_v49 = vor.u32 %v1897_v48, %v1587_v47 }
 0x129   :  { %914 = vmatpush.bf16.msra.mxu1 %v501_v31 }
 0x12d   :  { %915 = vmatpush.bf16.msra.mxu1 %v500_v27 }
 0x12e   :  { %v327_v53 = vpop.f32.mrf.mxu0 }
 0x131   :  { %366 = vmatmul.bf16.gmra.mxu0 %v1878_v52  ;;  %916 = vmatpush.bf16.msra.mxu1 %v499_v23  ;;  %v1899_v52 = vld [vmem:[%s2943_s0 + $0x34] sm:$0xf] }
 0x135   :  { %917 = vmatpush.bf16.msra.mxu1 %v498_v19 }
 0x136   :  { %v329_v54 = vpop.f32.mrf.mxu0 }
 0x137   :  { %v507_v55 = vpack.c.bf16 %v329_v54, %v327_v53  ;;  %v1601_v53 = vld [vmem:[%s2943_s0 + $0x3c] sm:$0xf0] }
 0x138   :  { %918 = vmatmul.bf16.vlgmr.msra.gmra.mxu1 %v1576_v40  ;;  %v1604_v54 = vor.u32 %v1899_v52, %v1601_v53  ;;  %v1910_v40 = vld [vmem:[%s2943_s0 + $0x88] sm:$0xf0] }
 0x13e   :  { %v332_v57 = vpop.f32.mrf.mxu0 }
 0x141   :  { %371 = vmatmul.bf16.gmra.mxu0 %v1879_v56  ;;  %v1900_v56 = vld [vmem:[%s2943_s0 + $0x38] sm:$0xf0] }
 0x146   :  { %v334_v58 = vpop.f32.mrf.mxu0 }
 0x147   :  { %v508_v59 = vpack.c.bf16 %v334_v58, %v332_v57  ;;  %v1583_v58 = vld [vmem:[%s2943_s0 + $0x8] sm:$0xf] }
 0x148   :  { %923 = vmatmul.bf16.gmra.mxu1 %v1588_v49  ;;  %v1655_v49 = vld [vmem:[%s2943_s0 + $0x98] sm:$0xf] }
 0x14e   :  { %v337_v61 = vpop.f32.mrf.mxu0 }
 0x151   :  { %376 = vmatmul.bf16.gmra.mxu0 %v1880_v60 }
 0x156   :  { %v339_v62 = vpop.f32.mrf.mxu0 }
 0x157   :  { %v509_v63 = vpack.c.bf16 %v339_v62, %v337_v61  ;;  %v1902_v61 = vld [vmem:[%s2943_s0 + $0x4c] sm:$0xf]  ;;  %v1613_v62 = vld [vmem:[%s2943_s0 + $0x54] sm:$0xf0] }
 0x15e   :  { %v342_v1 = vpop.f32.mrf.mxu0 }
 0x161   :  { %381 = vmatmul.bf16.gmra.mxu0 %v1881_v0  ;;  %v1611_v0 = vld [vmem:[%s2943_s0 + $0x48] sm:$0xf] }
 0x166   :  { %v344_v2 = vpop.f32.mrf.mxu0 }
 0x167   :  { %v510_v16 = vpack.c.bf16 %v344_v2, %v342_v1  ;;  %v1903_v1 = vld [vmem:[%s2943_s0 + $0x50] sm:$0xf0] }
 0x168   :  { %v1612_v2 = vor.u32 %v1903_v1, %v1611_v0 }
 0x16e   :  { %v347_v4 = vpop.f32.mrf.mxu0 }
 0x171   :  { %386 = vmatmul.bf16.gmra.mxu0 %v1882_v3  ;;  %v1595_v3 = vld [vmem:[%s2943_s0 + $0x20] sm:$0xf] }
 0x176   :  { %v349_v5 = vpop.f32.mrf.mxu0 }
 0x177   :  { %v511_v15 = vpack.c.bf16 %v349_v5, %v347_v4  ;;  %v1898_v4 = vld [vmem:[%s2943_s0 + $0x28] sm:$0xf0] }
 0x178   :  { %v1596_v5 = vor.u32 %v1898_v4, %v1595_v3  ;;  %v1923_v4 = vld [vmem:[%s2943_s0 + $0xf4] sm:$0xf] }
 0x17e   :  { %v352_v7 = vpop.f32.mrf.mxu0 }
 0x181   :  { %391 = vmatmul.bf16.gmra.mxu0 %v1883_v6  ;;  %v1905_v6 = vld [vmem:[%s2943_s0 + $0x64] sm:$0xf] }
 0x186   :  { %v354_v8 = vpop.f32.mrf.mxu0 }
 0x187   :  { %v512_v13 = vpack.c.bf16 %v354_v8, %v352_v7  ;;  %v1625_v7 = vld [vmem:[%s2943_s0 + $0x6c] sm:$0xf0] }
 0x188   :  { %v1628_v8 = vor.u32 %v1905_v6, %v1625_v7  ;;  %v1695_v7 = vld [vmem:[%s2943_s0 + $0xf0] sm:$0xf] }
 0x18e   :  { %v357_v10 = vpop.f32.mrf.mxu0 }
 0x191   :  { %396 = vmatmul.bf16.gmra.mxu0 %v1884_v9  ;;  %v1623_v9 = vld [vmem:[%s2943_s0 + $0x60] sm:$0xf] }
 0x196   :  { %v359_v11 = vpop.f32.mrf.mxu0 }
 0x197   :  { %v513_v12 = vpack.c.bf16 %v359_v11, %v357_v10  ;;  %v1906_v10 = vld [vmem:[%s2943_s0 + $0x68] sm:$0xf0] }
 0x198   :  { %v1624_v11 = vor.u32 %v1906_v10, %v1623_v9 }
 0x199   :  { %1039 = vmatpush.bf16.msra.mxu2 %v513_v12  ;;  %v1607_v12 = vld [vmem:[%s2943_s0 + $0x38] sm:$0xf] }
 0x19d   :  { %1040 = vmatpush.bf16.msra.mxu2 %v512_v13  ;;  %v1901_v13 = vld [vmem:[%s2943_s0 + $0x40] sm:$0xf0] }
 0x19e   :  { %v2231_v14 = vpop.f32.mrf.mxu0 }
 0x1a1   :  { %1041 = vmatpush.bf16.msra.mxu2 %v511_v15  ;;  %v1908_v15 = vld [vmem:[%s2943_s0 + $0x7c] sm:$0xf] }
 0x1a5   :  { %1042 = vmatpush.bf16.msra.mxu2 %v510_v16  ;;  %v1637_v16 = vld [vmem:[%s2943_s0 + $0x84] sm:$0xf0] }
 0x1a6   :  { %v2233_v17 = vpop.f32.mrf.mxu0 }
 0x1a7   :  { %v514_v18 = vpack.c.bf16 %v2233_v17, %v2231_v14  ;;  %v1608_v14 = vor.u32 %v1901_v13, %v1607_v12  ;;  %v1640_v17 = vor.u32 %v1908_v15, %v1637_v16  ;;  %v1919_v12 = vld [vmem:[%s2943_s0 + $0xd0] sm:$0xf0]  ;;  %v2430_v15 = vld [vmem:[%s2944_s3] ss:$0 sm:$0xff] }
 0x1a9   :  { %1043 = vmatpush.bf16.msra.mxu2 %v509_v63  ;;  %v1616_v63 = vor.u32 %v1902_v61, %v1613_v62  ;;  %v1667_v62 = vld [vmem:[%s2943_s0 + $0xb0] sm:$0xf] }
 0x1ad   :  { %1044 = vmatpush.bf16.msra.mxu2 %v508_v59  ;;  %v1895_v59 = vld [vmem:[%s2943_s0 + $0x10] sm:$0xf0] }
 0x1ae   :  { %v367_v19 = vpop.f32.mrf.mxu0  ;;  %v1584_v60 = vor.u32 %v1895_v59, %v1583_v58  ;;  %v1683_v58 = vld [vmem:[%s2943_s0 + $0xd8] sm:$0xf]  ;;  %v1921_v59 = vld [vmem:[%s2943_s0 + $0xe0] sm:$0xf0] }
 0x1af   :  { %v1684_v61 = vor.u32 %v1921_v59, %v1683_v58 }
 0x1b1   :  { %1045 = vmatpush.bf16.msra.mxu2 %v507_v55  ;;  %v1599_v55 = vld [vmem:[%s2943_s0 + $0x30] sm:$0xf] }
 0x1b2   :  { %v1600_v57 = vor.u32 %v1900_v56, %v1599_v55  ;;  %v1920_v55 = vld [vmem:[%s2943_s0 + $0xdc] sm:$0xf]  ;;  %v1685_v56 = vld [vmem:[%s2943_s0 + $0xe4] sm:$0xf0] }
 0x1b4   :  { %928 = vmatmul.bf16.gmra.mxu1 %v1600_v57  ;;  %v1688_v57 = vor.u32 %v1920_v55, %v1685_v56 }
 0x1b5   :  { %1046 = vmatpush.bf16.msra.mxu2 %v506_v51  ;;  %v919_v48 = vpop.f32.mrf.mxu1 }
 0x1b6   :  { %v369_v20 = vpop.f32.mrf.mxu0 }
 0x1b7   :  { %v515_v21 = vpack.c.bf16 %v369_v20, %v367_v19  ;;  %v1909_v19 = vld [vmem:[%s2943_s0 + $0x80] sm:$0xf0] }
 0x1b8   :  { %1047 = vmatmul.bf16.vlgmr.msra.gmra.mxu2 %v1580_v36  ;;  %v1659_v36 = vld [vmem:[%s2943_s0 + $0xa8] sm:$0xf] }
 0x1bd   :  { %v921_v53 = vpop.f32.mrf.mxu1 }
 0x1be   :  { %v372_v22 = vpop.f32.mrf.mxu0 }
 0x1c4   :  { %933 = vmatmul.bf16.gmra.mxu1 %v1612_v2 }
 0x1c6   :  { %v374_v23 = vpop.f32.mrf.mxu0 }
 0x1c7   :  { %v516_v24 = vpack.c.bf16 %v374_v23, %v372_v22  ;;  %v1904_v22 = vld [vmem:[%s2943_s0 + $0x58] sm:$0xf0] }
 0x1c8   :  { %1052 = vmatmul.bf16.gmra.mxu2 %v1592_v45  ;;  %v1671_v45 = vld [vmem:[%s2943_s0 + $0xc0] sm:$0xf] }
 0x1ce   :  { %v377_v25 = vpop.f32.mrf.mxu0 }
 0x1d4   :  { %938 = vmatmul.bf16.gmra.mxu1 %v1624_v11  ;;  %v1679_v11 = vld [vmem:[%s2943_s0 + $0xc8] sm:$0xf] }
 0x1d6   :  { %v379_v26 = vpop.f32.mrf.mxu0 }
 0x1d7   :  { %v517_v27 = vpack.c.bf16 %v379_v26, %v377_v25  ;;  %v1649_v25 = vld [vmem:[%s2943_s0 + $0x9c] sm:$0xf0] }
 0x1d8   :  { %1057 = vmatmul.bf16.gmra.mxu2 %v1604_v54 }
 0x1de   :  { %v382_v28 = vpop.f32.mrf.mxu0 }
 0x1e6   :  { %v384_v29 = vpop.f32.mrf.mxu0 }
 0x1e7   :  { %v518_v51 = vpack.c.bf16 %v384_v29, %v382_v28  ;;  %v1912_v28 = vld [vmem:[%s2943_s0 + $0x98] sm:$0xf0] }
 0x1e8   :  { %1062 = vmatmul.bf16.gmra.mxu2 %v1616_v63  ;;  %v1916_v63 = vld [vmem:[%s2943_s0 + $0xb8] sm:$0xf0] }
 0x1e9   :  { %v1668_v1 = vor.u32 %v1916_v63, %v1667_v62 }
 0x1ee   :  { %v387_v30 = vpop.f32.mrf.mxu0 }
 0x1f6   :  { %v389_v31 = vpop.f32.mrf.mxu0 }
 0x1f7   :  { %v519_v50 = vpack.c.bf16 %v389_v31, %v387_v30  ;;  %v1631_v30 = vld [vmem:[%s2943_s0 + $0x68] sm:$0xf]  ;;  %v1907_v31 = vld [vmem:[%s2943_s0 + $0x70] sm:$0xf0] }
 0x1f8   :  { %1067 = vmatmul.bf16.gmra.mxu2 %v1628_v8  ;;  %v1924_v8 = vld [vmem:[%s2943_s0 + $0xf8] sm:$0xf0] }
 0x1f9   :  { %v1696_v10 = vor.u32 %v1924_v8, %v1695_v7 }
 0x1fe   :  { %v392_v32 = vpop.f32.mrf.mxu0 }
 0x206   :  { %v394_v33 = vpop.f32.mrf.mxu0 }
 0x207   :  { %v520_v46 = vpack.c.bf16 %v394_v33, %v392_v32  ;;  %v1632_v32 = vor.u32 %v1907_v31, %v1631_v30  ;;  %v1914_v33 = vld [vmem:[%s2943_s0 + $0xac] sm:$0xf] }
 0x208   :  { %1072 = vmatmul.bf16.gmra.mxu2 %v1640_v17  ;;  %v1664_v35 = vor.u32 %v1914_v33, %v1661_v34  ;;  %v1922_v30 = vld [vmem:[%s2943_s0 + $0xe8] sm:$0xf0] }
 0x20e   :  { %v397_v37 = vpop.f32.mrf.mxu0 }
 0x216   :  { %v399_v41 = vpop.f32.mrf.mxu0 }
 0x217   :  { %v521_v42 = vpack.c.bf16 %v399_v41, %v397_v37  ;;  %v1915_v37 = vld [vmem:[%s2943_s0 + $0xb0] sm:$0xf0]  ;;  %v1644_v41 = vor.u32 %v1910_v40, %v1643_v39 }
 0x218   :  { %v1660_v38 = vor.u32 %v1915_v37, %v1659_v36 }
 0x219   :  { %1168 = vmatpush.bf16.msra.mxu3 %v521_v42  ;;  %v1917_v42 = vld [vmem:[%s2943_s0 + $0xc4] sm:$0xf] }
 0x21a   :  { %v1676_v44 = vor.u32 %v1917_v42, %v1673_v43 }
 0x21d   :  { %1169 = vmatpush.bf16.msra.mxu3 %v520_v46  ;;  %v1918_v46 = vld [vmem:[%s2943_s0 + $0xc8] sm:$0xf0] }
 0x21e   :  { %v1672_v47 = vor.u32 %v1918_v46, %v1671_v45  ;;  %v1721_v45 = vld [vmem:[%s2943_s0 + $0x12c] sm:$0xf0] }
 0x221   :  { %1170 = vmatpush.bf16.msra.mxu3 %v519_v50  ;;  %v1913_v50 = vld [vmem:[%s2943_s0 + $0xa0] sm:$0xf0] }
 0x222   :  { %v1656_v52 = vor.u32 %v1913_v50, %v1655_v49  ;;  %v1719_v49 = vld [vmem:[%s2943_s0 + $0x120] sm:$0xf]  ;;  %v1930_v50 = vld [vmem:[%s2943_s0 + $0x128] sm:$0xf0] }
 0x225   :  { %1171 = vmatpush.bf16.msra.mxu3 %v518_v51 }
 0x229   :  { %1172 = vmatpush.bf16.msra.mxu3 %v517_v27  ;;  %v1647_v27 = vld [vmem:[%s2943_s0 + $0x90] sm:$0xf] }
 0x22a   :  { %v1648_v29 = vor.u32 %v1912_v28, %v1647_v27 }
 0x22d   :  { %1173 = vmatpush.bf16.msra.mxu3 %v516_v24  ;;  %v1911_v24 = vld [vmem:[%s2943_s0 + $0x94] sm:$0xf] }
 0x22e   :  { %v1652_v26 = vor.u32 %v1911_v24, %v1649_v25  ;;  %v922_v24 = vadd.f32 %v2430_v15, %v921_v53  ;;  %v1707_v25 = vld [vmem:[%s2943_s0 + $0x108] sm:$0xf]  ;;  %v1703_v53 = vld [vmem:[%s2943_s0 + $0xf8] sm:$0xf] }
 0x230   :  { %1077 = vmatmul.bf16.gmra.mxu2 %v1652_v26  ;;  %v1927_v26 = vld [vmem:[%s2943_s0 + $0x110] sm:$0xf0] }
 0x231   :  { %1174 = vmatpush.bf16.msra.mxu3 %v515_v21  ;;  %v1619_v21 = vld [vmem:[%s2943_s0 + $0x50] sm:$0xf]  ;;  %v1708_v28 = vor.u32 %v1927_v26, %v1707_v25 }
 0x232   :  { %v1620_v23 = vor.u32 %v1904_v22, %v1619_v21  ;;  %v1709_v21 = vld [vmem:[%s2943_s0 + $0x114] sm:$0xf0] }
 0x235   :  { %1175 = vmatpush.bf16.msra.mxu3 %v514_v18  ;;  %v1635_v18 = vld [vmem:[%s2943_s0 + $0x78] sm:$0xf] }
 0x236   :  { %v1636_v20 = vor.u32 %v1909_v19, %v1635_v18  ;;  %v920_v18 = vadd.f32 %v2430_v15, %v919_v48 }
 0x238   :  { %1176 = vmatmul.bf16.vlgmr.msra.gmra.mxu3 %v1584_v60  ;;  %943 = vmatmul.bf16.gmra.mxu1 %v1636_v20  ;;  %v924_v60 = vpop.f32.mrf.mxu1  ;;  %v1926_v20 = vld [vmem:[%s2943_s0 + $0x10c] sm:$0xf] }
 0x239   :  { %v1712_v22 = vor.u32 %v1926_v20, %v1709_v21  ;;  %v925_v42 = vadd.f32 %v2430_v15, %v924_v60 }
 0x23b   :  { %v1048_v51 = vpop.f32.mrf.mxu2 }
 0x240   :  { %1082 = vmatmul.bf16.gmra.mxu2 %v1664_v35  ;;  %v926_v2 = vpop.f32.mrf.mxu1 }
 0x241   :  { %v927_v48 = vadd.f32 %v2430_v15, %v926_v2 }
 0x243   :  { %v1050_v54 = vpop.f32.mrf.mxu2 }
 0x248   :  { %1181 = vmatmul.bf16.gmra.mxu3 %v1596_v5  ;;  %948 = vmatmul.bf16.gmra.mxu1 %v1648_v29  ;;  %v1697_v5 = vld [vmem:[%s2943_s0 + $0xfc] sm:$0xf0]  ;;  %v2417_v9 = vpop.f32.mrf.mxu1 }
 0x249   :  { %v1700_v6 = vor.u32 %v1923_v4, %v1697_v5  ;;  %v1691_v29 = vld [vmem:[%s2943_s0 + $0xe0] sm:$0xf]  ;;  %v930_v2 = vadd.f32 %v2430_v15, %v2417_v9  ;;  %v1932_v4 = vld [vmem:[%s2943_s0 + $0x13c] sm:$0xf]  ;;  %v1733_v5 = vld [vmem:[%s2943_s0 + $0x144] sm:$0xf0] }
 0x24a   :  { %v1692_v36 = vor.u32 %v1922_v30, %v1691_v29  ;;  %v1731_v9 = vld [vmem:[%s2943_s0 + $0x138] sm:$0xf]  ;;  %v1935_v30 = vld [vmem:[%s2943_s0 + $0x154] sm:$0xf] }
 0x24b   :  { %v1053_v0 = vpop.f32.mrf.mxu2 }
 0x250   :  { %1087 = vmatmul.bf16.gmra.mxu2 %v1676_v44  ;;  %v2432_v16 = vpop.f32.mrf.mxu1  ;;  %v1929_v44 = vld [vmem:[%s2943_s0 + $0x124] sm:$0xf] }
 0x251   :  { %v1724_v46 = vor.u32 %v1929_v44, %v1721_v45  ;;  %v932_v8 = vadd.f32 %v2430_v15, %v2432_v16 }
 0x253   :  { %v1055_v3 = vpop.f32.mrf.mxu2 }
 0x254   :  { %v1056_v56 = vadd.f32 %v1055_v3, %v927_v48 }
 0x258   :  { %1186 = vmatmul.bf16.gmra.mxu3 %v1608_v14  ;;  %953 = vmatmul.bf16.gmra.mxu1 %v1660_v38  ;;  %v1680_v14 = vor.u32 %v1919_v12, %v1679_v11  ;;  %v2450_v27 = vpop.f32.mrf.mxu1 }
 0x259   :  { %v935_v29 = vadd.f32 %v2430_v15, %v2450_v27  ;;  %v1743_v27 = vld [vmem:[%s2943_s0 + $0x150] sm:$0xf] }
 0x25b   :  { %v2425_v13 = vpop.f32.mrf.mxu2 }
 0x25c   :  { %v1059_v7 = vadd.f32 %v2425_v13, %v930_v2  ;;  %v1928_v13 = vld [vmem:[%s2943_s0 + $0x118] sm:$0xf0] }
 0x260   :  { %1092 = vmatmul.bf16.gmra.mxu2 %v1688_v57  ;;  %v2460_v39 = vpop.f32.mrf.mxu1 }
 0x263   :  { %v2434_v17 = vpop.f32.mrf.mxu2 }
 0x268   :  { %1191 = vmatmul.bf16.gmra.mxu3 %v1620_v23  ;;  %958 = vmatmul.bf16.gmra.mxu1 %v1672_v47  ;;  %v1049_v23 = vadd.f32 %v1048_v51, %v920_v18  ;;  %v1054_v47 = vadd.f32 %v1053_v0, %v925_v42  ;;  %v2481_v51 = vpop.f32.mrf.mxu1  ;;  %v1061_v18 = vadd.f32 %v2434_v17, %v932_v8 }
 0x26b   :  { %v2458_v31 = vpop.f32.mrf.mxu2 }
 0x270   :  { %1097 = vmatmul.bf16.gmra.mxu2 %v1700_v6  ;;  %v2491_v63 = vpop.f32.mrf.mxu1  ;;  %v1736_v6 = vor.u32 %v1932_v4, %v1733_v5 }
 0x278   :  { %1196 = vmatmul.bf16.gmra.mxu3 %v1632_v32  ;;  %963 = vmatmul.bf16.gmra.mxu1 %v1684_v61  ;;  %v1051_v32 = vadd.f32 %v1050_v54, %v922_v24  ;;  %v1925_v54 = vld [vmem:[%s2943_s0 + $0x100] sm:$0xf0] }
 0x279   :  { %v1704_v60 = vor.u32 %v1925_v54, %v1703_v53  ;;  %v940_v53 = vadd.f32 %v2430_v15, %v2481_v51  ;;  %v1938_v54 = vld [vmem:[%s2943_s0 + $0x16c] sm:$0xf]  ;;  %v1755_v51 = vld [vmem:[%s2943_s0 + $0x168] sm:$0xf] }
 0x280   :  { %1102 = vmatmul.bf16.gmra.mxu2 %v1712_v22 }
 0x288   :  { %1201 = vmatmul.bf16.gmra.mxu3 %v1644_v41  ;;  %968 = vmatmul.bf16.gmra.mxu1 %v1696_v10  ;;  %v2462_v41 = vpop.f32.mrf.mxu2  ;;  %v1933_v10 = vld [vmem:[%s2943_s0 + $0x140] sm:$0xf0] }
 0x289   :  { %v1732_v12 = vor.u32 %v1933_v10, %v1731_v9 }
 0x290   :  { %1107 = vmatmul.bf16.gmra.mxu2 %v1724_v46  ;;  %v2489_v55 = vpop.f32.mrf.mxu2 }
 0x298   :  { %1206 = vmatmul.bf16.gmra.mxu3 %v1656_v52  ;;  %973 = vmatmul.bf16.gmra.mxu1 %v1708_v28  ;;  %v1720_v52 = vor.u32 %v1930_v50, %v1719_v49 }
 0x2a0   :  { %1112 = vmatmul.bf16.gmra.mxu2 %v1736_v6 }
 0x2a8   :  { %1211 = vmatmul.bf16.gmra.mxu3 %v1668_v1  ;;  %978 = vmatmul.bf16.gmra.mxu1 %v1720_v52  ;;  %v2493_v1 = vpop.f32.mrf.mxu2 }
 0x2b0   :  { %v2523_v16 = vpop.f32.mrf.mxu2 }
 0x2b5   :  { %v2515_v11 = vpop.f32.mrf.mxu1 }
 0x2b8   :  { %1216 = vmatmul.bf16.gmra.mxu3 %v1680_v14  ;;  %v1715_v14 = vld [vmem:[%s2943_s0 + $0x110] sm:$0xf]  ;;  %983 = vmatmul.bf16.gmra.mxu1 %v1732_v12  ;;  %v2528_v28 = vpop.f32.mrf.mxu2 }
 0x2b9   :  { %v1716_v22 = vor.u32 %v1928_v13, %v1715_v14  ;;  %v945_v14 = vadd.f32 %v2430_v15, %v2515_v11  ;;  %v1941_v13 = vld [vmem:[%s2943_s0 + $0x184] sm:$0xf]  ;;  %v1767_v11 = vld [vmem:[%s2943_s0 + $0x180] sm:$0xf] }
 0x2bb   :  { %v1177_v19 = vpop.f32.mrf.mxu3 }
 0x2bc   :  { %v1178_v33 = vadd.f32 %v1177_v19, %v1049_v23 }
 0x2bd   :  { %v2526_v25 = vpop.f32.mrf.mxu1 }
 0x2be   :  { %v1297_v37 = vmax.f32 %v1178_v33, 0.0 }
 0x2c3   :  { %v1179_v34 = vpop.f32.mrf.mxu3 }
 0x2c4   :  { %v1180_v35 = vadd.f32 %v1179_v34, %v1051_v32  ;;  %v1745_v32 = vld [vmem:[%s2943_s0 + $0x15c] sm:$0xf0]  ;;  %v1064_v34 = vadd.f32 %v2458_v31, %v935_v29  ;;  %v1931_v31 = vld [vmem:[%s2943_s0 + $0x130] sm:$0xf0] }
 0x2c5   :  { %v1748_v33 = vor.u32 %v1935_v30, %v1745_v32 }
 0x2c6   :  { %v1298_v38 = vmax.f32 %v1180_v35, 0.0  ;;  %v937_v35 = vadd.f32 %v2430_v15, %v2460_v39  ;;  %v2558_v39 = vpop.f32.mrf.mxu2 }
 0x2c7   :  { %1117 = vmatmul.bf16.gmra.mxu2 %v1748_v33 }
 0x2c8   :  { %v1968_v40 = vpack.c.bf16 %v1298_v38, %v1297_v37  ;;  %1221 = vmatmul.bf16.gmra.mxu3 %v1692_v36  ;;  %v1936_v36 = vld [vmem:[%s2943_s0 + $0x158] sm:$0xf0]  ;;  %v2550_v37 = vpop.f32.mrf.mxu1  ;;  %v1066_v42 = vadd.f32 %v2462_v41, %v937_v35 }
 0x2c9   :  { %v1744_v38 = vor.u32 %v1936_v36, %v1743_v27 }
 0x2ca   :  { %1969 = vst [vmem:[%s2945_s4] sm:$0xff] %v1968_v40   ;;  %v1727_v40 = vld [vmem:[%s2943_s0 + $0x128] sm:$0xf] }
 0x2cb   :  { %v1182_v43 = vpop.f32.mrf.mxu3  ;;  %988 = vmatmul.bf16.gmra.mxu1 %v1744_v38  ;;  %v1728_v46 = vor.u32 %v1931_v31, %v1727_v40  ;;  %v950_v40 = vadd.f32 %v2430_v15, %v2550_v37  ;;  %v1944_v31 = vld [vmem:[%s2943_s0 + $0x19c] sm:$0xf]  ;;  %v1779_v37 = vld [vmem:[%s2943_s0 + $0x198] sm:$0xf] }
 0x2cc   :  { %v1183_v57 = vadd.f32 %v1182_v43, %v1054_v47 }
 0x2ce   :  { %v1299_v61 = vmax.f32 %v1183_v57, 0.0  ;;  %v2563_v52 = vpop.f32.mrf.mxu2 }
 0x2d0   :  { %v2561_v49 = vpop.f32.mrf.mxu1 }
 0x2d3   :  { %v1184_v58 = vpop.f32.mrf.mxu3 }
 0x2d4   :  { %v1185_v59 = vadd.f32 %v1184_v58, %v1056_v56  ;;  %v1757_v56 = vld [vmem:[%s2943_s0 + $0x174] sm:$0xf0]  ;;  %v1069_v58 = vadd.f32 %v2489_v55, %v940_v53  ;;  %v1934_v55 = vld [vmem:[%s2943_s0 + $0x148] sm:$0xf0] }
 0x2d5   :  { %v1760_v57 = vor.u32 %v1938_v54, %v1757_v56 }
 0x2d6   :  { %v1300_v62 = vmax.f32 %v1185_v59, 0.0  ;;  %v942_v59 = vadd.f32 %v2430_v15, %v2491_v63  ;;  %v2593_v63 = vpop.f32.mrf.mxu2 }
 0x2d7   :  { %1122 = vmatmul.bf16.gmra.mxu2 %v1760_v57 }
 0x2d8   :  { %v1973_v0 = vpack.c.bf16 %v1300_v62, %v1299_v61  ;;  %1226 = vmatmul.bf16.gmra.mxu3 %v1704_v60  ;;  %v1939_v60 = vld [vmem:[%s2943_s0 + $0x170] sm:$0xf0]  ;;  %v2585_v61 = vpop.f32.mrf.mxu1  ;;  %v1071_v2 = vadd.f32 %v2493_v1, %v942_v59 }
 0x2d9   :  { %v1756_v62 = vor.u32 %v1939_v60, %v1755_v51 }
 0x2da   :  { %2085 = vst [vmem:[%s2945_s4 + $0x8] sm:$0xff] %v1973_v0   ;;  %v1739_v0 = vld [vmem:[%s2943_s0 + $0x140] sm:$0xf] }
 0x2db   :  { %v1187_v3 = vpop.f32.mrf.mxu3  ;;  %993 = vmatmul.bf16.gmra.mxu1 %v1756_v62  ;;  %v1740_v6 = vor.u32 %v1934_v55, %v1739_v0  ;;  %v955_v0 = vadd.f32 %v2430_v15, %v2585_v61  ;;  %v1947_v55 = vld [vmem:[%s2943_s0 + $0x1b4] sm:$0xf]  ;;  %v1791_v61 = vld [vmem:[%s2943_s0 + $0x1b0] sm:$0xf] }
 0x2dc   :  { %v1188_v19 = vadd.f32 %v1187_v3, %v1059_v7 }
 0x2de   :  { %v1301_v23 = vmax.f32 %v1188_v19, 0.0  ;;  %v2598_v12 = vpop.f32.mrf.mxu2 }
 0x2e0   :  { %v2596_v9 = vpop.f32.mrf.mxu1 }
 0x2e3   :  { %v1189_v20 = vpop.f32.mrf.mxu3 }
 0x2e4   :  { %v1190_v21 = vadd.f32 %v1189_v20, %v1061_v18  ;;  %v1769_v18 = vld [vmem:[%s2943_s0 + $0x18c] sm:$0xf0]  ;;  %v1074_v20 = vadd.f32 %v2523_v16, %v945_v14  ;;  %v1937_v16 = vld [vmem:[%s2943_s0 + $0x160] sm:$0xf0] }
 0x2e5   :  { %v1772_v19 = vor.u32 %v1941_v13, %v1769_v18 }
 0x2e6   :  { %v1302_v24 = vmax.f32 %v1190_v21, 0.0  ;;  %v947_v21 = vadd.f32 %v2430_v15, %v2526_v25  ;;  %v2628_v25 = vpop.f32.mrf.mxu2 }
 0x2e7   :  { %1127 = vmatmul.bf16.gmra.mxu2 %v1772_v19 }
 0x2e8   :  { %v1978_v26 = vpack.c.bf16 %v1302_v24, %v1301_v23  ;;  %1231 = vmatmul.bf16.gmra.mxu3 %v1716_v22  ;;  %v1942_v22 = vld [vmem:[%s2943_s0 + $0x188] sm:$0xf0]  ;;  %v2620_v23 = vpop.f32.mrf.mxu1  ;;  %v1076_v29 = vadd.f32 %v2528_v28, %v947_v21 }
 0x2e9   :  { %v1768_v24 = vor.u32 %v1942_v22, %v1767_v11 }
 0x2ea   :  { %2086 = vst [vmem:[%s2945_s4 + $0x10] sm:$0xff] %v1978_v26   ;;  %v1751_v26 = vld [vmem:[%s2943_s0 + $0x158] sm:$0xf] }
 0x2eb   :  { %v1192_v17 = vpop.f32.mrf.mxu3  ;;  %998 = vmatmul.bf16.gmra.mxu1 %v1768_v24  ;;  %v1752_v33 = vor.u32 %v1937_v16, %v1751_v26  ;;  %v960_v26 = vadd.f32 %v2430_v15, %v2620_v23  ;;  %v1950_v16 = vld [vmem:[%s2943_s0 + $0x1cc] sm:$0xf]  ;;  %v1803_v23 = vld [vmem:[%s2943_s0 + $0x1c8] sm:$0xf] }
 0x2ec   :  { %v1193_v43 = vadd.f32 %v1192_v17, %v1064_v34 }
 0x2ee   :  { %v1303_v47 = vmax.f32 %v1193_v43, 0.0  ;;  %v2633_v38 = vpop.f32.mrf.mxu2 }
 0x2f0   :  { %v2631_v27 = vpop.f32.mrf.mxu1 }
 0x2f3   :  { %v1194_v44 = vpop.f32.mrf.mxu3 }
 0x2f4   :  { %v1195_v45 = vadd.f32 %v1194_v44, %v1066_v42  ;;  %v1781_v42 = vld [vmem:[%s2943_s0 + $0x1a4] sm:$0xf0]  ;;  %v1079_v44 = vadd.f32 %v2558_v39, %v950_v40  ;;  %v1940_v39 = vld [vmem:[%s2943_s0 + $0x178] sm:$0xf0] }
 0x2f5   :  { %v1784_v43 = vor.u32 %v1944_v31, %v1781_v42 }
 0x2f6   :  { %v1304_v48 = vmax.f32 %v1195_v45, 0.0  ;;  %v952_v45 = vadd.f32 %v2430_v15, %v2561_v49  ;;  %v2663_v49 = vpop.f32.mrf.mxu2 }
 0x2f7   :  { %1132 = vmatmul.bf16.gmra.mxu2 %v1784_v43 }
 0x2f8   :  { %v1983_v50 = vpack.c.bf16 %v1304_v48, %v1303_v47  ;;  %1236 = vmatmul.bf16.gmra.mxu3 %v1728_v46  ;;  %v1945_v46 = vld [vmem:[%s2943_s0 + $0x1a0] sm:$0xf0]  ;;  %v2655_v47 = vpop.f32.mrf.mxu1  ;;  %v1081_v53 = vadd.f32 %v2563_v52, %v952_v45 }
 0x2f9   :  { %v1780_v48 = vor.u32 %v1945_v46, %v1779_v37 }
 0x2fa   :  { %2087 = vst [vmem:[%s2945_s4 + $0x18] sm:$0xff] %v1983_v50   ;;  %v1763_v50 = vld [vmem:[%s2943_s0 + $0x170] sm:$0xf] }
 0x2fb   :  { %v1197_v41 = vpop.f32.mrf.mxu3  ;;  %1003 = vmatmul.bf16.gmra.mxu1 %v1780_v48  ;;  %v1764_v57 = vor.u32 %v1940_v39, %v1763_v50  ;;  %v965_v50 = vadd.f32 %v2430_v15, %v2655_v47  ;;  %v1953_v39 = vld [vmem:[%s2943_s0 + $0x1e4] sm:$0xf]  ;;  %v1815_v47 = vld [vmem:[%s2943_s0 + $0x1e0] sm:$0xf] }
 0x2fc   :  { %v1198_v3 = vadd.f32 %v1197_v41, %v1069_v58 }
 0x2fe   :  { %v1305_v7 = vmax.f32 %v1198_v3, 0.0  ;;  %v2668_v62 = vpop.f32.mrf.mxu2 }
 0x300   :  { %v2666_v51 = vpop.f32.mrf.mxu1 }
 0x303   :  { %v1199_v4 = vpop.f32.mrf.mxu3 }
 0x304   :  { %v1200_v5 = vadd.f32 %v1199_v4, %v1071_v2  ;;  %v1793_v2 = vld [vmem:[%s2943_s0 + $0x1bc] sm:$0xf0]  ;;  %v1084_v4 = vadd.f32 %v2593_v63, %v955_v0  ;;  %v1943_v63 = vld [vmem:[%s2943_s0 + $0x190] sm:$0xf0] }
 0x305   :  { %v1796_v3 = vor.u32 %v1947_v55, %v1793_v2 }
 0x306   :  { %v1306_v8 = vmax.f32 %v1200_v5, 0.0  ;;  %v957_v5 = vadd.f32 %v2430_v15, %v2596_v9  ;;  %v2698_v9 = vpop.f32.mrf.mxu2 }
 0x307   :  { %1137 = vmatmul.bf16.gmra.mxu2 %v1796_v3 }
 0x308   :  { %v1988_v10 = vpack.c.bf16 %v1306_v8, %v1305_v7  ;;  %1241 = vmatmul.bf16.gmra.mxu3 %v1740_v6  ;;  %v1948_v6 = vld [vmem:[%s2943_s0 + $0x1b8] sm:$0xf0]  ;;  %v2690_v7 = vpop.f32.mrf.mxu1  ;;  %v1086_v14 = vadd.f32 %v2598_v12, %v957_v5 }
 0x309   :  { %v1792_v8 = vor.u32 %v1948_v6, %v1791_v61 }
 0x30a   :  { %2088 = vst [vmem:[%s2945_s4 + $0x20] sm:$0xff] %v1988_v10   ;;  %v1775_v10 = vld [vmem:[%s2943_s0 + $0x188] sm:$0xf] }
 0x30b   :  { %v1202_v1 = vpop.f32.mrf.mxu3  ;;  %1008 = vmatmul.bf16.gmra.mxu1 %v1792_v8  ;;  %v1776_v19 = vor.u32 %v1943_v63, %v1775_v10  ;;  %v970_v10 = vadd.f32 %v2430_v15, %v2690_v7  ;;  %v1956_v63 = vld [vmem:[%s2943_s0 + $0x1fc] sm:$0xf]  ;;  %v1827_v7 = vld [vmem:[%s2943_s0 + $0x1f8] sm:$0xf] }
 0x30c   :  { %v1203_v17 = vadd.f32 %v1202_v1, %v1074_v20 }
 0x30e   :  { %v1307_v34 = vmax.f32 %v1203_v17, 0.0  ;;  %v2703_v24 = vpop.f32.mrf.mxu2 }
 0x310   :  { %v2701_v11 = vpop.f32.mrf.mxu1 }
 0x313   :  { %v1204_v30 = vpop.f32.mrf.mxu3 }
 0x314   :  { %v1205_v32 = vadd.f32 %v1204_v30, %v1076_v29  ;;  %v1805_v29 = vld [vmem:[%s2943_s0 + $0x1d4] sm:$0xf0]  ;;  %v1089_v30 = vadd.f32 %v2628_v25, %v960_v26  ;;  %v1946_v25 = vld [vmem:[%s2943_s0 + $0x1a8] sm:$0xf0] }
 0x315   :  { %v1808_v17 = vor.u32 %v1950_v16, %v1805_v29 }
 0x316   :  { %v1308_v35 = vmax.f32 %v1205_v32, 0.0  ;;  %v962_v32 = vadd.f32 %v2430_v15, %v2631_v27  ;;  %v2733_v27 = vpop.f32.mrf.mxu2 }
 0x317   :  { %1142 = vmatmul.bf16.gmra.mxu2 %v1808_v17 }
 0x318   :  { %v1993_v36 = vpack.c.bf16 %v1308_v35, %v1307_v34  ;;  %1246 = vmatmul.bf16.gmra.mxu3 %v1752_v33  ;;  %v1951_v33 = vld [vmem:[%s2943_s0 + $0x1d0] sm:$0xf0]  ;;  %v2725_v34 = vpop.f32.mrf.mxu1  ;;  %v1091_v40 = vadd.f32 %v2633_v38, %v962_v32 }
 0x319   :  { %v1804_v35 = vor.u32 %v1951_v33, %v1803_v23 }
 0x31a   :  { %2089 = vst [vmem:[%s2945_s4 + $0x28] sm:$0xff] %v1993_v36   ;;  %v1787_v36 = vld [vmem:[%s2943_s0 + $0x1a0] sm:$0xf] }
 0x31b   :  { %v1207_v28 = vpop.f32.mrf.mxu3  ;;  %1013 = vmatmul.bf16.gmra.mxu1 %v1804_v35  ;;  %v1788_v43 = vor.u32 %v1946_v25, %v1787_v36  ;;  %v975_v36 = vadd.f32 %v2430_v15, %v2725_v34  ;;  %v1959_v25 = vld [vmem:[%s2943_s0 + $0x214] sm:$0xf]  ;;  %v1839_v34 = vld [vmem:[%s2943_s0 + $0x210] sm:$0xf] }
 0x31c   :  { %v1208_v41 = vadd.f32 %v1207_v28, %v1079_v44 }
 0x31e   :  { %v1309_v58 = vmax.f32 %v1208_v41, 0.0  ;;  %v2738_v48 = vpop.f32.mrf.mxu2 }
 0x320   :  { %v2736_v37 = vpop.f32.mrf.mxu1 }
 0x323   :  { %v1209_v54 = vpop.f32.mrf.mxu3 }
 0x324   :  { %v1210_v56 = vadd.f32 %v1209_v54, %v1081_v53  ;;  %v1817_v53 = vld [vmem:[%s2943_s0 + $0x1ec] sm:$0xf0]  ;;  %v1094_v54 = vadd.f32 %v2663_v49, %v965_v50  ;;  %v1949_v49 = vld [vmem:[%s2943_s0 + $0x1c0] sm:$0xf0] }
 0x325   :  { %v1820_v41 = vor.u32 %v1953_v39, %v1817_v53 }
 0x326   :  { %v1310_v59 = vmax.f32 %v1210_v56, 0.0  ;;  %v967_v56 = vadd.f32 %v2430_v15, %v2666_v51  ;;  %v2768_v51 = vpop.f32.mrf.mxu2 }
 0x327   :  { %1147 = vmatmul.bf16.gmra.mxu2 %v1820_v41 }
 0x328   :  { %v1998_v60 = vpack.c.bf16 %v1310_v59, %v1309_v58  ;;  %1251 = vmatmul.bf16.gmra.mxu3 %v1764_v57  ;;  %v1954_v57 = vld [vmem:[%s2943_s0 + $0x1e8] sm:$0xf0]  ;;  %v2760_v58 = vpop.f32.mrf.mxu1  ;;  %v1096_v0 = vadd.f32 %v2668_v62, %v967_v56 }
 0x329   :  { %v1816_v59 = vor.u32 %v1954_v57, %v1815_v47 }
 0x32a   :  { %2090 = vst [vmem:[%s2945_s4 + $0x30] sm:$0xff] %v1998_v60   ;;  %v1799_v60 = vld [vmem:[%s2943_s0 + $0x1b8] sm:$0xf] }
 0x32b   :  { %v1212_v52 = vpop.f32.mrf.mxu3  ;;  %1018 = vmatmul.bf16.gmra.mxu1 %v1816_v59  ;;  %v1800_v3 = vor.u32 %v1949_v49, %v1799_v60  ;;  %v980_v59 = vadd.f32 %v2430_v15, %v2760_v58 }
 0x32c   :  { %v1213_v1 = vadd.f32 %v1212_v52, %v1084_v4 }
 0x32e   :  { %v1311_v20 = vmax.f32 %v1213_v1, 0.0  ;;  %v2773_v8 = vpop.f32.mrf.mxu2 }
 0x330   :  { %v2771_v61 = vpop.f32.mrf.mxu1 }
 0x331   :  { %v982_v58 = vadd.f32 %v2430_v15, %v2771_v61 }
 0x333   :  { %v1214_v13 = vpop.f32.mrf.mxu3  ;;  %v1111_v61 = vadd.f32 %v2773_v8, %v982_v58 }
 0x334   :  { %v1215_v18 = vadd.f32 %v1214_v13, %v1086_v14  ;;  %v1829_v14 = vld [vmem:[%s2943_s0 + $0x204] sm:$0xf0]  ;;  %v1099_v13 = vadd.f32 %v2698_v9, %v970_v10  ;;  %v1952_v9 = vld [vmem:[%s2943_s0 + $0x1d8] sm:$0xf0] }
 0x335   :  { %v1832_v1 = vor.u32 %v1956_v63, %v1829_v14 }
 0x336   :  { %v1312_v21 = vmax.f32 %v1215_v18, 0.0  ;;  %v972_v18 = vadd.f32 %v2430_v15, %v2701_v11  ;;  %v2803_v11 = vpop.f32.mrf.mxu2 }
 0x337   :  { %1152 = vmatmul.bf16.gmra.mxu2 %v1832_v1 }
 0x338   :  { %v2003_v22 = vpack.c.bf16 %v1312_v21, %v1311_v20  ;;  %1256 = vmatmul.bf16.gmra.mxu3 %v1776_v19  ;;  %v1957_v19 = vld [vmem:[%s2943_s0 + $0x200] sm:$0xf0]  ;;  %v2795_v20 = vpop.f32.mrf.mxu1  ;;  %v1101_v26 = vadd.f32 %v2703_v24, %v972_v18 }
 0x339   :  { %v1828_v21 = vor.u32 %v1957_v19, %v1827_v7  ;;  %v985_v19 = vadd.f32 %v2430_v15, %v2795_v20  ;;  %v1961_v20 = vld [vmem:[%s2943_s0 + $0x220] sm:$0xf0] }
 0x33a   :  { %2091 = vst [vmem:[%s2945_s4 + $0x38] sm:$0xff] %v2003_v22   ;;  %v1811_v22 = vld [vmem:[%s2943_s0 + $0x1d0] sm:$0xf] }
 0x33b   :  { %v1217_v12 = vpop.f32.mrf.mxu3  ;;  %1023 = vmatmul.bf16.gmra.mxu1 %v1828_v21  ;;  %v1812_v17 = vor.u32 %v1952_v9, %v1811_v22  ;;  %v1114_v8 = vadd.f32 %v2803_v11, %v985_v19 }
 0x33c   :  { %v1218_v28 = vadd.f32 %v1217_v12, %v1089_v30 }
 0x33e   :  { %v1313_v44 = vmax.f32 %v1218_v28, 0.0  ;;  %v2808_v35 = vpop.f32.mrf.mxu2 }
 0x340   :  { %v2806_v23 = vpop.f32.mrf.mxu1 }
 0x341   :  { %v987_v9 = vadd.f32 %v2430_v15, %v2806_v23 }
 0x343   :  { %v1219_v31 = vpop.f32.mrf.mxu3 }
 0x344   :  { %v1220_v42 = vadd.f32 %v1219_v31, %v1091_v40  ;;  %v1841_v40 = vld [vmem:[%s2943_s0 + $0x21c] sm:$0xf0]  ;;  %v1104_v31 = vadd.f32 %v2733_v27, %v975_v36  ;;  %v1955_v27 = vld [vmem:[%s2943_s0 + $0x1f0] sm:$0xf0] }
 0x345   :  { %v1844_v28 = vor.u32 %v1959_v25, %v1841_v40 }
 0x346   :  { %v1314_v45 = vmax.f32 %v1220_v42, 0.0  ;;  %v977_v42 = vadd.f32 %v2430_v15, %v2736_v37 }
 0x347   :  { %1157 = vmatmul.bf16.gmra.mxu2 %v1844_v28 }
 0x348   :  { %v2008_v46 = vpack.c.bf16 %v1314_v45, %v1313_v44  ;;  %1261 = vmatmul.bf16.gmra.mxu3 %v1788_v43  ;;  %v1960_v43 = vld [vmem:[%s2943_s0 + $0x218] sm:$0xf0]  ;;  %v2830_v44 = vpop.f32.mrf.mxu1  ;;  %v1106_v50 = vadd.f32 %v2738_v48, %v977_v42  ;;  %v1962_v48 = vld [vmem:[%s2943_s0 + $0x22c] sm:$0xf]  ;;  %v1859_v42 = vld [vmem:[%s2943_s0 + $0x230] sm:$0xf] }
 0x349   :  { %v1840_v45 = vor.u32 %v1960_v43, %v1839_v34  ;;  %v990_v25 = vadd.f32 %v2430_v15, %v2830_v44  ;;  %v1964_v34 = vld [vmem:[%s2943_s0 + $0x238] sm:$0xf0] }
 0x34a   :  { %2092 = vst [vmem:[%s2945_s4 + $0x40] sm:$0xff] %v2008_v46   ;;  %v1823_v46 = vld [vmem:[%s2943_s0 + $0x1e8] sm:$0xf]  ;;  %v1118_v37 = vpop.f32.mrf.mxu2 }
 0x34b   :  { %v1222_v38 = vpop.f32.mrf.mxu3  ;;  %1028 = vmatmul.bf16.gmra.mxu1 %v1840_v45  ;;  %v1824_v41 = vor.u32 %v1955_v27, %v1823_v46  ;;  %v1119_v28 = vadd.f32 %v1118_v37, %v990_v25 }
 0x34c   :  { %v1223_v52 = vadd.f32 %v1222_v38, %v1094_v54 }
 0x34e   :  { %v1315_v4 = vmax.f32 %v1223_v52, 0.0 }
 0x350   :  { %v991_v47 = vpop.f32.mrf.mxu1 }
 0x352   :  { %v1120_v49 = vpop.f32.mrf.mxu2 }
 0x353   :  { %v1224_v55 = vpop.f32.mrf.mxu3 }
 0x354   :  { %v1225_v2 = vadd.f32 %v1224_v55, %v1096_v0  ;;  %v1853_v0 = vld [vmem:[%s2943_s0 + $0x234] sm:$0xf0]  ;;  %v1109_v55 = vadd.f32 %v2768_v51, %v980_v59  ;;  %v1958_v51 = vld [vmem:[%s2943_s0 + $0x208] sm:$0xf0] }
 0x355   :  { %v1856_v52 = vor.u32 %v1962_v48, %v1853_v0 }
 0x356   :  { %v1316_v5 = vmax.f32 %v1225_v2, 0.0  ;;  %v1851_v2 = vld [vmem:[%s2943_s0 + $0x228] sm:$0xf] }
 0x357   :  { %1162 = vmatmul.bf16.gmra.mxu2 %v1856_v52 }
 0x358   :  { %v2013_v6 = vpack.c.bf16 %v1316_v5, %v1315_v4  ;;  %1266 = vmatmul.bf16.gmra.mxu3 %v1800_v3  ;;  %v1963_v3 = vld [vmem:[%s2943_s0 + $0x230] sm:$0xf0]  ;;  %v1835_v5 = vld [vmem:[%s2943_s0 + $0x200] sm:$0xf] }
 0x359   :  { %v1852_v4 = vor.u32 %v1963_v3, %v1851_v2  ;;  %v1836_v14 = vor.u32 %v1958_v51, %v1835_v5 }
 0x35a   :  { %2093 = vst [vmem:[%s2945_s4 + $0x48] sm:$0xff] %v2013_v6   ;;  %v994_v6 = vpop.f32.mrf.mxu1  ;;  %v1123_v1 = vpop.f32.mrf.mxu2 }
 0x35b   :  { %v1227_v62 = vpop.f32.mrf.mxu3  ;;  %1033 = vmatmul.bf16.gmra.mxu1 %v1852_v4 }
 0x35c   :  { %v1228_v12 = vadd.f32 %v1227_v62, %v1099_v13 }
 0x35e   :  { %v1317_v30 = vmax.f32 %v1228_v12, 0.0  ;;  %v1847_v12 = vld [vmem:[%s2943_s0 + $0x218] sm:$0xf] }
 0x362   :  { %v996_v22 = vpop.f32.mrf.mxu1 }
 0x363   :  { %v1229_v16 = vpop.f32.mrf.mxu3 }
 0x364   :  { %v1230_v29 = vadd.f32 %v1229_v16, %v1101_v26  ;;  %v1125_v26 = vpop.f32.mrf.mxu2  ;;  %v1116_v16 = vadd.f32 %v2808_v35, %v987_v9  ;;  %v992_v35 = vadd.f32 %v2430_v15, %v991_v47 }
 0x366   :  { %v1318_v32 = vmax.f32 %v1230_v29, 0.0  ;;  %v1121_v43 = vadd.f32 %v1120_v49, %v992_v35 }
 0x368   :  { %v2018_v33 = vpack.c.bf16 %v1318_v32, %v1317_v30  ;;  %1271 = vmatmul.bf16.gmra.mxu3 %v1812_v17  ;;  %v1848_v32 = vor.u32 %v1961_v20, %v1847_v12 }
 0x36a   :  { %2094 = vst [vmem:[%s2945_s4 + $0x50] sm:$0xff] %v2018_v33   ;;  %v999_v33 = vpop.f32.mrf.mxu1 }
 0x36b   :  { %v1232_v24 = vpop.f32.mrf.mxu3  ;;  %v1000_v3 = vadd.f32 %v2430_v15, %v999_v33 }
 0x36c   :  { %v1233_v38 = vadd.f32 %v1232_v24, %v1104_v31  ;;  %v1128_v23 = vpop.f32.mrf.mxu2 }
 0x36d   :  { %v1129_v51 = vadd.f32 %v1128_v23, %v1000_v3 }
 0x36e   :  { %v1319_v54 = vmax.f32 %v1233_v38, 0.0 }
 0x372   :  { %v1001_v31 = vpop.f32.mrf.mxu1 }
 0x373   :  { %v1234_v39 = vpop.f32.mrf.mxu3 }
 0x374   :  { %v1235_v53 = vadd.f32 %v1234_v39, %v1106_v50  ;;  %v1130_v46 = vpop.f32.mrf.mxu2  ;;  %v1860_v50 = vor.u32 %v1964_v34, %v1859_v42 }
 0x376   :  { %v1320_v56 = vmax.f32 %v1235_v53, 0.0 }
 0x378   :  { %v2023_v57 = vpack.c.bf16 %v1320_v56, %v1319_v54  ;;  %1276 = vmatmul.bf16.gmra.mxu3 %v1824_v41  ;;  %v995_v41 = vadd.f32 %v2430_v15, %v994_v6  ;;  %v1002_v6 = vadd.f32 %v2430_v15, %v1001_v31 }
 0x37a   :  { %2095 = vst [vmem:[%s2945_s4 + $0x58] sm:$0xff] %v2023_v57   ;;  %v1004_v53 = vpop.f32.mrf.mxu1  ;;  %v1124_v47 = vadd.f32 %v1123_v1, %v995_v41  ;;  %v997_v57 = vadd.f32 %v2430_v15, %v996_v22 }
 0x37b   :  { %v1237_v60 = vpop.f32.mrf.mxu3  ;;  %v1005_v19 = vadd.f32 %v2430_v15, %v1004_v53 }
 0x37c   :  { %v1238_v10 = vadd.f32 %v1237_v60, %v1109_v55  ;;  %v1133_v56 = vpop.f32.mrf.mxu2  ;;  %v1126_v59 = vadd.f32 %v1125_v26, %v997_v57 }
 0x37e   :  { %v1321_v13 = vmax.f32 %v1238_v10, 0.0  ;;  %v1131_v10 = vadd.f32 %v1130_v46, %v1002_v6 }
 0x382   :  { %v1006_v48 = vpop.f32.mrf.mxu1 }
 0x383   :  { %v1239_v62 = vpop.f32.mrf.mxu3  ;;  %v1007_v9 = vadd.f32 %v2430_v15, %v1006_v48 }
 0x384   :  { %v1240_v63 = vadd.f32 %v1239_v62, %v1111_v61  ;;  %v1135_v58 = vpop.f32.mrf.mxu2 }
 0x385   :  { %v1136_v12 = vadd.f32 %v1135_v58, %v1007_v9 }
 0x386   :  { %v1322_v18 = vmax.f32 %v1240_v63, 0.0 }
 0x388   :  { %v2028_v7 = vpack.c.bf16 %v1322_v18, %v1321_v13  ;;  %1281 = vmatmul.bf16.gmra.mxu3 %v1836_v14 }
 0x38a   :  { %2096 = vst [vmem:[%s2945_s4 + $0x60] sm:$0xff] %v2028_v7   ;;  %v1009_v5 = vpop.f32.mrf.mxu1 }
 0x38b   :  { %v1242_v21 = vpop.f32.mrf.mxu3 }
 0x38c   :  { %v1243_v29 = vadd.f32 %v1242_v21, %v1114_v8  ;;  %v1138_v61 = vpop.f32.mrf.mxu2  ;;  %v1134_v8 = vadd.f32 %v1133_v56, %v1005_v19 }
 0x38e   :  { %v1323_v11 = vmax.f32 %v1243_v29, 0.0 }
 0x392   :  { %v1011_v18 = vpop.f32.mrf.mxu1 }
 0x393   :  { %v1244_v17 = vpop.f32.mrf.mxu3  ;;  %v1012_v25 = vadd.f32 %v2430_v15, %v1011_v18 }
 0x394   :  { %v1245_v30 = vadd.f32 %v1244_v17, %v1116_v16  ;;  %v1140_v22 = vpop.f32.mrf.mxu2 }
 0x396   :  { %v1324_v36 = vmax.f32 %v1245_v30, 0.0 }
 0x398   :  { %v2033_v24 = vpack.c.bf16 %v1324_v36, %v1323_v11  ;;  %1286 = vmatmul.bf16.gmra.mxu3 %v1848_v32  ;;  %v1010_v11 = vadd.f32 %v2430_v15, %v1009_v5 }
 0x39a   :  { %2097 = vst [vmem:[%s2945_s4 + $0x68] sm:$0xff] %v2033_v24   ;;  %v1014_v26 = vpop.f32.mrf.mxu1  ;;  %v1139_v23 = vadd.f32 %v1138_v61, %v1010_v11 }
 0x39b   :  { %v1247_v40 = vpop.f32.mrf.mxu3 }
 0x39c   :  { %v1248_v45 = vadd.f32 %v1247_v40, %v1119_v28  ;;  %v1143_v17 = vpop.f32.mrf.mxu2  ;;  %v1141_v28 = vadd.f32 %v1140_v22, %v1012_v25 }
 0x39e   :  { %v1325_v38 = vmax.f32 %v1248_v45, 0.0 }
 0x3a2   :  { %v1016_v24 = vpop.f32.mrf.mxu1 }
 0x3a3   :  { %v1249_v44 = vpop.f32.mrf.mxu3 }
 0x3a4   :  { %v1250_v27 = vadd.f32 %v1249_v44, %v1121_v43  ;;  %v1145_v40 = vpop.f32.mrf.mxu2 }
 0x3a6   :  { %v1326_v39 = vmax.f32 %v1250_v27, 0.0  ;;  %v1015_v27 = vadd.f32 %v2430_v15, %v1014_v26 }
 0x3a8   :  { %v2038_v37 = vpack.c.bf16 %v1326_v39, %v1325_v38  ;;  %1291 = vmatmul.bf16.gmra.mxu3 %v1860_v50  ;;  %v1144_v38 = vadd.f32 %v1143_v17, %v1015_v27  ;;  %v1017_v39 = vadd.f32 %v2430_v15, %v1016_v24 }
 0x3aa   :  { %2098 = vst [vmem:[%s2945_s4 + $0x70] sm:$0xff] %v2038_v37   ;;  %v1019_v34 = vpop.f32.mrf.mxu1  ;;  %v1146_v53 = vadd.f32 %v1145_v40, %v1017_v39 }
 0x3ab   :  { %v1252_v54 = vpop.f32.mrf.mxu3  ;;  %v1020_v48 = vadd.f32 %v2430_v15, %v1019_v34 }
 0x3ac   :  { %v1253_v60 = vadd.f32 %v1252_v54, %v1124_v47  ;;  %v1148_v46 = vpop.f32.mrf.mxu2 }
 0x3ae   :  { %v1327_v52 = vmax.f32 %v1253_v60, 0.0 }
 0x3b2   :  { %v1021_v37 = vpop.f32.mrf.mxu1 }
 0x3b3   :  { %v1254_v49 = vpop.f32.mrf.mxu3  ;;  %v1022_v58 = vadd.f32 %v2430_v15, %v1021_v37 }
 0x3b4   :  { %v1255_v0 = vadd.f32 %v1254_v49, %v1126_v59  ;;  %v1150_v56 = vpop.f32.mrf.mxu2 }
 0x3b6   :  { %v1328_v55 = vmax.f32 %v1255_v0, 0.0 }
 0x3b8   :  { %v2043_v2 = vpack.c.bf16 %v1328_v55, %v1327_v52  ;;  %v1149_v55 = vadd.f32 %v1148_v46, %v1020_v48 }
 0x3ba   :  { %2099 = vst [vmem:[%s2945_s4 + $0x78] sm:$0xff] %v2043_v2   ;;  %v1024_v49 = vpop.f32.mrf.mxu1  ;;  %v1151_v2 = vadd.f32 %v1150_v56, %v1022_v58 }
 0x3bb   :  { %v1257_v4 = vpop.f32.mrf.mxu3 }
 0x3bc   :  { %v1258_v62 = vadd.f32 %v1257_v4, %v1129_v51  ;;  %v1153_v52 = vpop.f32.mrf.mxu2 }
 0x3be   :  { %v1329_v1 = vmax.f32 %v1258_v62, 0.0 }
 0x3c2   :  { %v1026_v5 = vpop.f32.mrf.mxu1 }
 0x3c3   :  { %v1259_v63 = vpop.f32.mrf.mxu3  ;;  %v1027_v18 = vadd.f32 %v2430_v15, %v1026_v5 }
 0x3c4   :  { %v1260_v14 = vadd.f32 %v1259_v63, %v1131_v10  ;;  %v1155_v10 = vpop.f32.mrf.mxu2  ;;  %v1025_v63 = vadd.f32 %v2430_v15, %v1024_v49 }
 0x3c5   :  { %v1156_v19 = vadd.f32 %v1155_v10, %v1027_v18 }
 0x3c6   :  { %v1330_v13 = vmax.f32 %v1260_v14, 0.0 }
 0x3c8   :  { %v2048_v7 = vpack.c.bf16 %v1330_v13, %v1329_v1  ;;  %v1154_v13 = vadd.f32 %v1153_v52, %v1025_v63 }
 0x3ca   :  { %2100 = vst [vmem:[%s2945_s4 + $0x80] sm:$0xff] %v2048_v7   ;;  %v1029_v1 = vpop.f32.mrf.mxu1 }
 0x3cb   :  { %v1262_v21 = vpop.f32.mrf.mxu3 }
 0x3cc   :  { %v1263_v20 = vadd.f32 %v1262_v21, %v1134_v8  ;;  %v1158_v7 = vpop.f32.mrf.mxu2 }
 0x3ce   :  { %v1331_v30 = vmax.f32 %v1263_v20, 0.0 }
 0x3d3   :  { %v1264_v16 = vpop.f32.mrf.mxu3 }
 0x3d4   :  { %v1265_v29 = vadd.f32 %v1264_v16, %v1136_v12  ;;  %v1031_v12 = vpop.f32.mrf.mxu1  ;;  %v1030_v16 = vadd.f32 %v2430_v15, %v1029_v1 }
 0x3d6   :  { %v1332_v32 = vmax.f32 %v1265_v29, 0.0  ;;  %v1160_v29 = vpop.f32.mrf.mxu2 }
 0x3d8   :  { %v2053_v33 = vpack.c.bf16 %v1332_v32, %v1331_v30  ;;  %v1159_v30 = vadd.f32 %v1158_v7, %v1030_v16  ;;  %v2109_v32 = vld [vmem:[%s2944_s3] ss:$0 sm:$0xff] }
 0x3da   :  { %2101 = vst [vmem:[%s2945_s4 + $0x88] sm:$0xff] %v2053_v33   ;;  %v1032_v33 = vadd.f32 %v2109_v32, %v1031_v12 }
 0x3db   :  { %v1267_v36 = vpop.f32.mrf.mxu3 }
 0x3dc   :  { %v1268_v35 = vadd.f32 %v1267_v36, %v1139_v23  ;;  %v1034_v11 = vpop.f32.mrf.mxu1  ;;  %v1161_v36 = vadd.f32 %v1160_v29, %v1032_v33 }
 0x3de   :  { %v1333_v43 = vmax.f32 %v1268_v35, 0.0  ;;  %v1163_v40 = vpop.f32.mrf.mxu2 }
 0x3e3   :  { %v1269_v31 = vpop.f32.mrf.mxu3 }
 0x3e4   :  { %v1270_v42 = vadd.f32 %v1269_v31, %v1141_v28  ;;  %v1035_v31 = vadd.f32 %v2109_v32, %v1034_v11 }
 0x3e6   :  { %v1334_v45 = vmax.f32 %v1270_v42, 0.0  ;;  %v1036_v42 = vpop.f32.mrf.mxu1 }
 0x3e8   :  { %v2058_v44 = vpack.c.bf16 %v1334_v45, %v1333_v43  ;;  %v1164_v43 = vadd.f32 %v1163_v40, %v1035_v31  ;;  %v1037_v45 = vadd.f32 %v2109_v32, %v1036_v42 }
 0x3ea   :  { %2102 = vst [vmem:[%s2945_s4 + $0x90] sm:$0xff] %v2058_v44   ;;  %v1165_v44 = vpop.f32.mrf.mxu2 }
 0x3eb   :  { %v1272_v50 = vpop.f32.mrf.mxu3  ;;  %v1166_v46 = vadd.f32 %v1165_v44, %v1037_v45 }
 0x3ec   :  { %v1273_v41 = vadd.f32 %v1272_v50, %v1144_v38 }
 0x3ee   :  { %v1335_v57 = vmax.f32 %v1273_v41, 0.0 }
 0x3f3   :  { %v1274_v54 = vpop.f32.mrf.mxu3 }
 0x3f4   :  { %v1275_v47 = vadd.f32 %v1274_v54, %v1146_v53 }
 0x3f6   :  { %v1336_v59 = vmax.f32 %v1275_v47, 0.0 }
 0x3f8   :  { %v2063_v60 = vpack.c.bf16 %v1336_v59, %v1335_v57 }
 0x3fa   :  { %2103 = vst [vmem:[%s2945_s4 + $0x98] sm:$0xff] %v2063_v60  }
 0x3fb   :  { %v1277_v0 = vpop.f32.mrf.mxu3 }
 0x3fc   :  { %v1278_v3 = vadd.f32 %v1277_v0, %v1149_v55 }
 0x3fe   :  { %v1337_v6 = vmax.f32 %v1278_v3, 0.0 }
 0x403   :  { %v1279_v4 = vpop.f32.mrf.mxu3 }
 0x404   :  { %v1280_v51 = vadd.f32 %v1279_v4, %v1151_v2 }
 0x406   :  { %v1338_v61 = vmax.f32 %v1280_v51, 0.0 }
 0x408   :  { %v2068_v62 = vpack.c.bf16 %v1338_v61, %v1337_v6 }
 0x40a   :  { %2104 = vst [vmem:[%s2945_s4 + $0xa0] sm:$0xff] %v2068_v62  }
 0x40b   :  { %v1282_v14 = vpop.f32.mrf.mxu3 }
 0x40c   :  { %v1283_v21 = vadd.f32 %v1282_v14, %v1154_v13 }
 0x40e   :  { %v1339_v9 = vmax.f32 %v1283_v21, 0.0 }
 0x413   :  { %v1284_v22 = vpop.f32.mrf.mxu3 }
 0x414   :  { %v1285_v8 = vadd.f32 %v1284_v22, %v1156_v19 }
 0x416   :  { %v1340_v26 = vmax.f32 %v1285_v8, 0.0 }
 0x418   :  { %v2073_v20 = vpack.c.bf16 %v1340_v26, %v1339_v9 }
 0x41a   :  { %2105 = vst [vmem:[%s2945_s4 + $0xa8] sm:$0xff] %v2073_v20  }
 0x41b   :  { %v1287_v17 = vpop.f32.mrf.mxu3 }
 0x41c   :  { %v1288_v24 = vadd.f32 %v1287_v17, %v1159_v30 }
 0x41e   :  { %v1341_v28 = vmax.f32 %v1288_v24, 0.0 }
 0x423   :  { %v1289_v23 = vpop.f32.mrf.mxu3 }
 0x424   :  { %v1290_v25 = vadd.f32 %v1289_v23, %v1161_v36 }
 0x426   :  { %v1342_v15 = vmax.f32 %v1290_v25, 0.0 }
 0x428   :  { %v2078_v35 = vpack.c.bf16 %v1342_v15, %v1341_v28 }
 0x42a   :  { %2106 = vst [vmem:[%s2945_s4 + $0xb0] sm:$0xff] %v2078_v35  }
 0x42b   :  { %v1292_v34 = vpop.f32.mrf.mxu3 }
 0x42c   :  { %v1293_v27 = vadd.f32 %v1292_v34, %v1164_v43 }
 0x42e   :  { %v1343_v39 = vmax.f32 %v1293_v27, 0.0 }
 0x433   :  { %v1294_v50 = vpop.f32.mrf.mxu3 }
 0x434   :  { %v1295_v38 = vadd.f32 %v1294_v50, %v1166_v46 }
 0x436   :  { %v1344_v37 = vmax.f32 %v1295_v38, 0.0 }
 0x438   :  { %v2083_v53 = vpack.c.bf16 %v1344_v37, %v1343_v39 }
 0x43a   :  { %2107 = vst [vmem:[%s2945_s4 + $0xb8] sm:$0xff] %v2083_v53  }

</bundles_post_ra>
